<compile_context>
chip_gen: v7x
topology: tpu7x:2x2x1
jax: 0.10.0
libtpu: 0.0.40
codegen_flags: <defaults>
</compile_context>

<pallas_src>
import math
from functools import partial

import jax
import jax.numpy as jnp
from jax.experimental import pallas as pl
from jax.experimental.pallas import tpu as pltpu

# ---------------------------------------------------------------------------
# Model hyper-parameters (small, consistent with the module's config object)
# ---------------------------------------------------------------------------
B = 2            # batch
S = 8            # decoder sequence length
S_ENC = 8        # encoder sequence length
D = 32           # d_model
H = 4            # num heads
DFF = 64         # feed-forward hidden dim
VOCAB = 50       # vocab size
VOCAB_PAD = 64   # table padded so the one-hot gather matmul has an aligned K dim
NUM_LAYERS = 2   # num_decoder_layers
LN_EPS = 1e-5    # torch.nn.LayerNorm default
MAX_SEQ = 64     # precomputed positional-encoding length
NEG_INF = -1e9


# ---------------------------------------------------------------------------
# Fused decoder-stack kernel: embedding + all layers, single invocation
# ---------------------------------------------------------------------------
def decoder_stack_kernel(
        ids_ref, enc_ref, emb_ref, pe_ref, tmask_ref, smask_ref,
        wqkv_s_ref, bqkv_s_ref, wo_s_ref, bo_s_ref,
        wq_c_ref, bq_c_ref, wkv_c_ref, bkv_c_ref, wo_c_ref, bo_c_ref,
        w1_ref, b1_ref, w2_ref, b2_ref,
        ln1g_ref, ln1b_ref, ln2g_ref, ln2b_ref, ln3g_ref, ln3b_ref,
        o_ref,
        *, bsz, seq, s_enc, num_layers, num_heads, use_cross):
    d_model = emb_ref.shape[-1]
    d_head = d_model // num_heads
    scale = 1.0 / math.sqrt(d_head)
    bs_total = bsz * seq

    # ---- embedding gather as a one-hot matmul (no XLA gather, no dynamic index)
    ids = ids_ref[...]                                               # (B*S, 1) int32
    vocab_iota = jax.lax.broadcasted_iota(jnp.int32, (bs_total, VOCAB_PAD), 1)
    onehot = (ids == vocab_iota).astype(jnp.float32)                 # (B*S, VOCAB_PAD)
    x = jnp.dot(onehot, emb_ref[...], preferred_element_type=jnp.float32)

    # ---- sinusoidal positional encoding (same rows for every batch element)
    pe = pe_ref[0:seq, :]                                            # (S, D)
    x = x + jnp.concatenate([pe] * bsz, axis=0)                      # (B*S, D)
    # TODO(synk): reference TransformerEmbedding may scale token embeddings by
    # sqrt(d_model); not applied here (matches the previous baseline).

    # ---- masks -> additive biases (computed once, before the layer loop)
    tbias = jnp.where(tmask_ref[...] > 0.0, 0.0, NEG_INF)            # (S, S)
    if use_cross:
        enc = enc_ref[...]                                           # (B*S_enc, D)
        sbias = jnp.where(smask_ref[...] > 0.0, 0.0, NEG_INF)        # (S, S_enc)

    def layer_norm(y, gamma, beta):
        # biased variance, matching torch.nn.LayerNorm; rsqrt -> EUP slot
        mean = jnp.mean(y, axis=-1, keepdims=True)
        cent = y - mean
        var = jnp.mean(cent * cent, axis=-1, keepdims=True)
        return cent * jax.lax.rsqrt(var + LN_EPS) * gamma + beta

    def mha(q, k, v, bias, wo, bo, s_kv):
        """Multi-head attention on flattened (B*S, D) activations.

        Per (batch, head) score/softmax/PV dots on static sublane/lane slices
        (the batch loop inside the kernel replaces the block-diagonal bias);
        each head's PV result is fused directly into the output projection and
        accumulated in registers -> no heads scratch, no masked partial stores.
        """
        out = jnp.zeros((bs_total, d_model), jnp.float32)
        for h in range(num_heads):
            lo = h * d_head
            qh = q[:, lo:lo + d_head]                                # (B*S,   dh)
            kh = k[:, lo:lo + d_head]                                # (B*Skv, dh)
            vh = v[:, lo:lo + d_head]
            pv_rows = []
            for b in range(bsz):
                qb = qh[b * seq:(b + 1) * seq, :]                    # (S,   dh)
                kb = kh[b * s_kv:(b + 1) * s_kv, :]                  # (Skv, dh)
                vb = vh[b * s_kv:(b + 1) * s_kv, :]
                sc = jax.lax.dot_general(                            # q . k^T (no .T)
                    qb, kb, (((1,), (1,)), ((), ())),
                    preferred_element_type=jnp.float32) * scale + bias
                sc = sc - jnp.max(sc, axis=-1, keepdims=True)
                p = jnp.exp(sc)
                p = p / jnp.sum(p, axis=-1, keepdims=True)           # exact divide
                pv_rows.append(jnp.dot(p, vb, preferred_element_type=jnp.float32))
            pv = jnp.concatenate(pv_rows, axis=0)                    # (B*S, dh)
            out = out + jnp.dot(pv, wo[lo:lo + d_head, :],           # fused Wo slice
                                preferred_element_type=jnp.float32)
        return out + bo

    for li in range(num_layers):
        # ---- 1) masked self-attention (packed QKV, bf16 operands) + Add & LN
        qkv = jnp.dot(x.astype(jnp.bfloat16), wqkv_s_ref[li],
                      preferred_element_type=jnp.float32) + bqkv_s_ref[li]
        attn = mha(qkv[:, :d_model], qkv[:, d_model:2 * d_model], qkv[:, 2 * d_model:],
                   tbias, wo_s_ref[li], bo_s_ref[li], seq)
        x = layer_norm(attn + x, ln1g_ref[li], ln1b_ref[li])

        # ---- 2) encoder-decoder cross-attention + Add & LN
        if use_cross:
            qc = jnp.dot(x.astype(jnp.bfloat16), wq_c_ref[li],
                         preferred_element_type=jnp.float32) + bq_c_ref[li]
            kvc = jnp.dot(enc.astype(jnp.bfloat16), wkv_c_ref[li],
                          preferred_element_type=jnp.float32) + bkv_c_ref[li]
            cross = mha(qc, kvc[:, :d_model], kvc[:, d_model:],
                        sbias, wo_c_ref[li], bo_c_ref[li], s_enc)
            x = layer_norm(cross + x, ln2g_ref[li], ln2b_ref[li])

        # ---- 3) position-wise FFN + Add & LN
        h1 = jnp.dot(x.astype(jnp.bfloat16), w1_ref[li],
                     preferred_element_type=jnp.float32) + b1_ref[li]
        h1 = jnp.maximum(h1, 0.0)
        f = jnp.dot(h1.astype(jnp.bfloat16), w2_ref[li],
                    preferred_element_type=jnp.float32) + b2_ref[li]
        x = layer_norm(f + x, ln3g_ref[li], ln3b_ref[li])

    o_ref[...] = x.astype(o_ref.dtype)


# ---------------------------------------------------------------------------
# pallas_call wrapper — single grid step, everything resident in VMEM
# ---------------------------------------------------------------------------
def _full_spec(shape):
    rank = len(shape)
    return pl.BlockSpec(shape, lambda i, rank=rank: (0,) * rank)


def fused_decoder_stack(ids, enc_flat, emb, pe, tmask, smask, weights,
                        *, bsz, seq, s_enc, use_cross):
    bs_total = bsz * seq
    d = emb.shape[-1]
    operands = (ids, enc_flat, emb, pe, tmask, smask) + tuple(weights)
    in_specs = [_full_spec(a.shape) for a in operands]

    return pl.pallas_call(
        partial(decoder_stack_kernel, bsz=bsz, seq=seq, s_enc=s_enc,
                num_layers=NUM_LAYERS, num_heads=H, use_cross=use_cross),
        out_shape=jax.ShapeDtypeStruct((bs_total, d), jnp.float32),
        grid=(1,),
        in_specs=in_specs,
        out_specs=pl.BlockSpec((bs_total, d), lambda i: (0, 0)),
        compiler_params=pltpu.CompilerParams(
            dimension_semantics=("arbitrary",)),  # tiny problem: keep it on one core
    )(*operands)


# ---------------------------------------------------------------------------
# Parameters (deterministic init) and full Decoder forward
# ---------------------------------------------------------------------------
def sinusoidal_pe(seq_len, d_model):
    pos = jnp.arange(seq_len, dtype=jnp.float32)[:, None]
    i = jnp.arange(d_model, dtype=jnp.float32)[None, :]
    angle = pos / jnp.power(10000.0, (2.0 * jnp.floor(i / 2.0)) / d_model)
    pe = jnp.where(jnp.mod(jnp.arange(d_model), 2) == 0,
                   jnp.sin(angle), jnp.cos(angle))
    return pe  # (seq_len, D)


def init_params(key):
    def uniform(k, shape, fan_in, dtype=jnp.float32):
        lim = 1.0 / math.sqrt(fan_in)
        return jax.random.uniform(k, shape, jnp.float32, -lim, lim).astype(dtype)

    k_emb, k_w = jax.random.split(key)
    wk = jax.random.split(k_w, 14)
    L = NUM_LAYERS
    bf = jnp.bfloat16
    # Weight tuple order must match the kernel signature.
    weights = (
        uniform(wk[0], (L, D, 3 * D), D, bf),    # wqkv_self (packed Q|K|V), bf16 MXU operand
        uniform(wk[1], (L, 1, 3 * D), D),        # bqkv_self
        uniform(wk[2], (L, D, D), D),            # wo_self   (f32: fused per-head slices)
        uniform(wk[3], (L, 1, D), D),            # bo_self
        uniform(wk[4], (L, D, D), D, bf),        # wq_cross
        uniform(wk[5], (L, 1, D), D),            # bq_cross
        uniform(wk[6], (L, D, 2 * D), D, bf),    # wkv_cross (packed K|V)
        uniform(wk[7], (L, 1, 2 * D), D),        # bkv_cross
        uniform(wk[8], (L, D, D), D),            # wo_cross
        uniform(wk[9], (L, 1, D), D),            # bo_cross
        uniform(wk[10], (L, D, DFF), D, bf),     # ffn w1
        uniform(wk[11], (L, 1, DFF), D),         # ffn b1
        uniform(wk[12], (L, DFF, D), DFF, bf),   # ffn w2
        uniform(wk[13], (L, 1, D), DFF),         # ffn b2
        jnp.ones((L, 1, D), jnp.float32),        # ln1 gamma
        jnp.zeros((L, 1, D), jnp.float32),       # ln1 beta
        jnp.ones((L, 1, D), jnp.float32),        # ln2 gamma
        jnp.zeros((L, 1, D), jnp.float32),       # ln2 beta
        jnp.ones((L, 1, D), jnp.float32),        # ln3 gamma
        jnp.zeros((L, 1, D), jnp.float32),       # ln3 beta
    )
    emb = jnp.zeros((VOCAB_PAD, D), jnp.float32)
    emb = emb.at[:VOCAB].set(jax.random.normal(k_emb, (VOCAB, D), jnp.float32) * 0.02)
    return {
        "embedding": emb,                         # padded table for one-hot gather matmul
        "pos_enc": sinusoidal_pe(MAX_SEQ, D),     # precomputed once
        "weights": weights,
    }


def decoder_forward(params, dec_tokens, enc_out, target_mask, src_mask):
    """Mirrors Decoder.forward: embedding -> N x DecoderBlock (post-norm).

    Everything runs inside a single fused pallas_call; the wrapper only performs
    free metadata reshapes (no gather / PE add / mask ops in XLA).
    Dropout is an eval-mode no-op.
    """
    bsz, seq = dec_tokens.shape
    d = params["embedding"].shape[-1]
    use_cross = enc_out is not None

    ids = dec_tokens.reshape(bsz * seq, 1).astype(jnp.int32)
    tmask = target_mask.astype(jnp.float32)
    if use_cross:
        s_enc = enc_out.shape[1]
        enc_flat = enc_out.reshape(bsz * s_enc, d).astype(jnp.float32)
        smask = src_mask.astype(jnp.float32)
    else:
        # dummy placeholders (never read inside the kernel when use_cross=False)
        s_enc = 1
        enc_flat = jnp.zeros((bsz, d), jnp.float32)
        smask = jnp.zeros((seq, 1), jnp.float32)

    out = fused_decoder_stack(ids, enc_flat, params["embedding"], params["pos_enc"],
                              tmask, smask, params["weights"],
                              bsz=bsz, seq=seq, s_enc=s_enc, use_cross=use_cross)
    return out.reshape(bsz, seq, d)


# ---------------------------------------------------------------------------
if __name__ == "__main__":
    key = jax.random.PRNGKey(0)
    kp, kt, ke = jax.random.split(key, 3)

    params = init_params(kp)

    dec_tokens = jax.random.randint(kt, (B, S), 0, VOCAB, dtype=jnp.int32)   # (2, 8)
    enc_out = jax.random.normal(ke, (B, S_ENC, D), jnp.float32)              # (2, 8, 32)

    # causal target mask (Sq, Skv) and all-ones source mask (Sq, S_enc)
    target_mask = jnp.tril(jnp.ones((S, S), jnp.float32))
    src_mask = jnp.ones((S, S_ENC), jnp.float32)

    fwd = jax.jit(decoder_forward)
    out = fwd(params, dec_tokens, enc_out, target_mask, src_mask)
    out = jax.block_until_ready(out)

    assert out.shape == (B, S, D)
    assert bool(jnp.all(jnp.isfinite(out)))
    print("KERNEL_OK")
</pallas_src>

<mosaic_0001>
module attributes {stable_mosaic.version = 11 : i64} {
  func.func @decoder_stack_kernel(%arg0: i32, %arg1: memref<16x1xi32, #tpu.memory_space<vmem>>, %arg2: memref<16x32xf32, #tpu.memory_space<vmem>>, %arg3: memref<64x32xf32, #tpu.memory_space<vmem>>, %arg4: memref<64x32xf32, #tpu.memory_space<vmem>>, %arg5: memref<8x8xf32, #tpu.memory_space<vmem>>, %arg6: memref<8x8xf32, #tpu.memory_space<vmem>>, %arg7: memref<2x32x96xbf16, #tpu.memory_space<vmem>>, %arg8: memref<2x1x96xf32, #tpu.memory_space<vmem>>, %arg9: memref<2x32x32xf32, #tpu.memory_space<vmem>>, %arg10: memref<2x1x32xf32, #tpu.memory_space<vmem>>, %arg11: memref<2x32x32xbf16, #tpu.memory_space<vmem>>, %arg12: memref<2x1x32xf32, #tpu.memory_space<vmem>>, %arg13: memref<2x32x64xbf16, #tpu.memory_space<vmem>>, %arg14: memref<2x1x64xf32, #tpu.memory_space<vmem>>, %arg15: memref<2x32x32xf32, #tpu.memory_space<vmem>>, %arg16: memref<2x1x32xf32, #tpu.memory_space<vmem>>, %arg17: memref<2x32x64xbf16, #tpu.memory_space<vmem>>, %arg18: memref<2x1x64xf32, #tpu.memory_space<vmem>>, %arg19: memref<2x64x32xbf16, #tpu.memory_space<vmem>>, %arg20: memref<2x1x32xf32, #tpu.memory_space<vmem>>, %arg21: memref<2x1x32xf32, #tpu.memory_space<vmem>>, %arg22: memref<2x1x32xf32, #tpu.memory_space<vmem>>, %arg23: memref<2x1x32xf32, #tpu.memory_space<vmem>>, %arg24: memref<2x1x32xf32, #tpu.memory_space<vmem>>, %arg25: memref<2x1x32xf32, #tpu.memory_space<vmem>>, %arg26: memref<2x1x32xf32, #tpu.memory_space<vmem>>, %arg27: memref<16x32xf32, #tpu.memory_space<vmem>>) attributes {dimension_semantics = [#tpu.dimension_semantics<arbitrary>], iteration_bounds = array<i64: 1>, scalar_prefetch = 0 : i64, scratch_operands = 0 : i64, tpu.core_type = #tpu.core_type<tc>, window_params = [{pipeline_mode = #tpu.pipeline_mode<synchronous>, transform_indices = @transform_0, window_bounds = array<i64: 16, 1>}, {pipeline_mode = #tpu.pipeline_mode<synchronous>, transform_indices = @transform_1, window_bounds = array<i64: 16, 32>}, {pipeline_mode = #tpu.pipeline_mode<synchronous>, transform_indices = @transform_2, window_bounds = array<i64: 64, 32>}, {pipeline_mode = #tpu.pipeline_mode<synchronous>, transform_indices = @transform_3, window_bounds = array<i64: 64, 32>}, {pipeline_mode = #tpu.pipeline_mode<synchronous>, transform_indices = @transform_4, window_bounds = array<i64: 8, 8>}, {pipeline_mode = #tpu.pipeline_mode<synchronous>, transform_indices = @transform_5, window_bounds = array<i64: 8, 8>}, {pipeline_mode = #tpu.pipeline_mode<synchronous>, transform_indices = @transform_6, window_bounds = array<i64: 2, 32, 96>}, {pipeline_mode = #tpu.pipeline_mode<synchronous>, transform_indices = @transform_7, window_bounds = array<i64: 2, 1, 96>}, {pipeline_mode = #tpu.pipeline_mode<synchronous>, transform_indices = @transform_8, window_bounds = array<i64: 2, 32, 32>}, {pipeline_mode = #tpu.pipeline_mode<synchronous>, transform_indices = @transform_9, window_bounds = array<i64: 2, 1, 32>}, {pipeline_mode = #tpu.pipeline_mode<synchronous>, transform_indices = @transform_10, window_bounds = array<i64: 2, 32, 32>}, {pipeline_mode = #tpu.pipeline_mode<synchronous>, transform_indices = @transform_11, window_bounds = array<i64: 2, 1, 32>}, {pipeline_mode = #tpu.pipeline_mode<synchronous>, transform_indices = @transform_12, window_bounds = array<i64: 2, 32, 64>}, {pipeline_mode = #tpu.pipeline_mode<synchronous>, transform_indices = @transform_13, window_bounds = array<i64: 2, 1, 64>}, {pipeline_mode = #tpu.pipeline_mode<synchronous>, transform_indices = @transform_14, window_bounds = array<i64: 2, 32, 32>}, {pipeline_mode = #tpu.pipeline_mode<synchronous>, transform_indices = @transform_15, window_bounds = array<i64: 2, 1, 32>}, {pipeline_mode = #tpu.pipeline_mode<synchronous>, transform_indices = @transform_16, window_bounds = array<i64: 2, 32, 64>}, {pipeline_mode = #tpu.pipeline_mode<synchronous>, transform_indices = @transform_17, window_bounds = array<i64: 2, 1, 64>}, {pipeline_mode = #tpu.pipeline_mode<synchronous>, transform_indices = @transform_18, window_bounds = array<i64: 2, 64, 32>}, {pipeline_mode = #tpu.pipeline_mode<synchronous>, transform_indices = @transform_19, window_bounds = array<i64: 2, 1, 32>}, {pipeline_mode = #tpu.pipeline_mode<synchronous>, transform_indices = @transform_20, window_bounds = array<i64: 2, 1, 32>}, {pipeline_mode = #tpu.pipeline_mode<synchronous>, transform_indices = @transform_21, window_bounds = array<i64: 2, 1, 32>}, {pipeline_mode = #tpu.pipeline_mode<synchronous>, transform_indices = @transform_22, window_bounds = array<i64: 2, 1, 32>}, {pipeline_mode = #tpu.pipeline_mode<synchronous>, transform_indices = @transform_23, window_bounds = array<i64: 2, 1, 32>}, {pipeline_mode = #tpu.pipeline_mode<synchronous>, transform_indices = @transform_24, window_bounds = array<i64: 2, 1, 32>}, {pipeline_mode = #tpu.pipeline_mode<synchronous>, transform_indices = @transform_25, window_bounds = array<i64: 2, 1, 32>}, {pipeline_mode = #tpu.pipeline_mode<synchronous>, transform_indices = @transform_26, window_bounds = array<i64: 16, 32>}]} {
    %c0 = arith.constant 0 : index
    %c0_0 = arith.constant 0 : index
    %0 = vector.load %arg1[%c0, %c0_0] : memref<16x1xi32, #tpu.memory_space<vmem>>, vector<16x1xi32>
    %1 = tpu.iota {dimensions = array<i32: 1>} : vector<16x64xi32>
    %2 = vector.broadcast %0 : vector<16x1xi32> to vector<16x64xi32>
    %3 = arith.cmpi eq, %2, %1 : vector<16x64xi32>
    %4 = arith.extui %3 : vector<16x64xi1> to vector<16x64xi32>
    %5 = arith.sitofp %4 : vector<16x64xi32> to vector<16x64xf32>
    %c0_1 = arith.constant 0 : index
    %c0_2 = arith.constant 0 : index
    %6 = vector.load %arg3[%c0_1, %c0_2] : memref<64x32xf32, #tpu.memory_space<vmem>>, vector<64x32xf32>
    %cst = arith.constant dense<0.000000e+00> : vector<16x32xf32>
    %7 = tpu.matmul %5, %6, %cst {dimension_numbers = #tpu.dot_dimension_numbers<[1], [0], [0], [1], [0, 0, 1, 1], [], []>} : vector<16x64xf32>, vector<64x32xf32>, vector<16x32xf32> -> vector<16x32xf32>
    %c0_3 = arith.constant 0 : index
    %c0_4 = arith.constant 0 : index
    %8 = vector.load %arg4[%c0_3, %c0_4] : memref<64x32xf32, #tpu.memory_space<vmem>>, vector<8x32xf32>
    %9 = tpu.concatenate %8, %8 in 0 : vector<8x32xf32>, vector<8x32xf32> -> vector<16x32xf32>
    %10 = arith.addf %7, %9 : vector<16x32xf32>
    %c0_5 = arith.constant 0 : index
    %c0_6 = arith.constant 0 : index
    %11 = vector.load %arg5[%c0_5, %c0_6] : memref<8x8xf32, #tpu.memory_space<vmem>>, vector<8x8xf32>
    %cst_7 = arith.constant 0.000000e+00 : f32
    %12 = vector.broadcast %cst_7 : f32 to vector<8x8xf32>
    %13 = arith.cmpf ogt, %11, %12 : vector<8x8xf32>
    %cst_8 = arith.constant 0.000000e+00 : f32
    %cst_9 = arith.constant -1.000000e+09 : f32
    %14 = vector.broadcast %cst_8 : f32 to vector<8x8xf32>
    %15 = vector.broadcast %cst_9 : f32 to vector<8x8xf32>
    %16 = arith.select %13, %14, %15 : vector<8x8xi1>, vector<8x8xf32>
    %c0_10 = arith.constant 0 : index
    %c0_11 = arith.constant 0 : index
    %17 = vector.load %arg2[%c0_10, %c0_11] : memref<16x32xf32, #tpu.memory_space<vmem>>, vector<16x32xf32>
    %c0_12 = arith.constant 0 : index
    %c0_13 = arith.constant 0 : index
    %18 = vector.load %arg6[%c0_12, %c0_13] : memref<8x8xf32, #tpu.memory_space<vmem>>, vector<8x8xf32>
    %cst_14 = arith.constant 0.000000e+00 : f32
    %19 = vector.broadcast %cst_14 : f32 to vector<8x8xf32>
    %20 = arith.cmpf ogt, %18, %19 : vector<8x8xf32>
    %cst_15 = arith.constant 0.000000e+00 : f32
    %cst_16 = arith.constant -1.000000e+09 : f32
    %21 = vector.broadcast %cst_15 : f32 to vector<8x8xf32>
    %22 = vector.broadcast %cst_16 : f32 to vector<8x8xf32>
    %23 = arith.select %20, %21, %22 : vector<8x8xi1>, vector<8x8xf32>
    %24 = arith.truncf %10 : vector<16x32xf32> to vector<16x32xbf16>
    %c0_17 = arith.constant 0 : index
    %c0_18 = arith.constant 0 : index
    %c0_19 = arith.constant 0 : index
    %25 = vector.load %arg7[%c0_17, %c0_18, %c0_19] : memref<2x32x96xbf16, #tpu.memory_space<vmem>>, vector<1x32x96xbf16>
    %26 = vector.shape_cast %25 : vector<1x32x96xbf16> to vector<32x96xbf16>
    %cst_20 = arith.constant dense<0.000000e+00> : vector<16x96xf32>
    %27 = tpu.matmul %24, %26, %cst_20 {dimension_numbers = #tpu.dot_dimension_numbers<[1], [0], [0], [1], [0, 0, 1, 1], [], []>} : vector<16x32xbf16>, vector<32x96xbf16>, vector<16x96xf32> -> vector<16x96xf32>
    %c0_21 = arith.constant 0 : index
    %c0_22 = arith.constant 0 : index
    %c0_23 = arith.constant 0 : index
    %28 = vector.load %arg8[%c0_21, %c0_22, %c0_23] : memref<2x1x96xf32, #tpu.memory_space<vmem>>, vector<1x1x96xf32>
    %29 = vector.shape_cast %28 : vector<1x1x96xf32> to vector<1x96xf32>
    %30 = vector.broadcast %29 : vector<1x96xf32> to vector<16x96xf32>
    %31 = arith.addf %27, %30 : vector<16x96xf32>
    %32 = vector.extract_strided_slice %31 {offsets = [0, 0], sizes = [16, 32], strides = [1, 1]} : vector<16x96xf32> to vector<16x32xf32>
    %33 = vector.extract_strided_slice %31 {offsets = [0, 32], sizes = [16, 32], strides = [1, 1]} : vector<16x96xf32> to vector<16x32xf32>
    %34 = vector.extract_strided_slice %31 {offsets = [0, 64], sizes = [16, 32], strides = [1, 1]} : vector<16x96xf32> to vector<16x32xf32>
    %c0_24 = arith.constant 0 : index
    %c0_25 = arith.constant 0 : index
    %c0_26 = arith.constant 0 : index
    %35 = vector.load %arg9[%c0_24, %c0_25, %c0_26] : memref<2x32x32xf32, #tpu.memory_space<vmem>>, vector<1x32x32xf32>
    %36 = vector.shape_cast %35 : vector<1x32x32xf32> to vector<32x32xf32>
    %c0_27 = arith.constant 0 : index
    %c0_28 = arith.constant 0 : index
    %c0_29 = arith.constant 0 : index
    %37 = vector.load %arg10[%c0_27, %c0_28, %c0_29] : memref<2x1x32xf32, #tpu.memory_space<vmem>>, vector<1x1x32xf32>
    %38 = vector.shape_cast %37 : vector<1x1x32xf32> to vector<1x32xf32>
    %cst_30 = arith.constant 0.000000e+00 : f32
    %39 = vector.broadcast %cst_30 : f32 to vector<16x32xf32>
    %40 = vector.extract_strided_slice %32 {offsets = [0, 0], sizes = [16, 8], strides = [1, 1]} : vector<16x32xf32> to vector<16x8xf32>
    %41 = vector.extract_strided_slice %33 {offsets = [0, 0], sizes = [16, 8], strides = [1, 1]} : vector<16x32xf32> to vector<16x8xf32>
    %42 = vector.extract_strided_slice %34 {offsets = [0, 0], sizes = [16, 8], strides = [1, 1]} : vector<16x32xf32> to vector<16x8xf32>
    %43 = vector.extract_strided_slice %40 {offsets = [0, 0], sizes = [8, 8], strides = [1, 1]} : vector<16x8xf32> to vector<8x8xf32>
    %44 = vector.extract_strided_slice %41 {offsets = [0, 0], sizes = [8, 8], strides = [1, 1]} : vector<16x8xf32> to vector<8x8xf32>
    %45 = vector.extract_strided_slice %42 {offsets = [0, 0], sizes = [8, 8], strides = [1, 1]} : vector<16x8xf32> to vector<8x8xf32>
    %cst_31 = arith.constant dense<0.000000e+00> : vector<8x8xf32>
    %46 = tpu.matmul %43, %44, %cst_31 {dimension_numbers = #tpu.dot_dimension_numbers<[1], [1], [0], [0], [0, 0, 1, 0], [], []>} : vector<8x8xf32>, vector<8x8xf32>, vector<8x8xf32> -> vector<8x8xf32>
    %cst_32 = arith.constant 0.353553385 : f32
    %47 = vector.broadcast %cst_32 : f32 to vector<8x8xf32>
    %48 = arith.mulf %46, %47 : vector<8x8xf32>
    %49 = arith.addf %48, %16 : vector<8x8xf32>
    %cst_33 = arith.constant dense<0xFF800000> : vector<8xf32>
    %50 = vector.multi_reduction <maximumf>, %49, %cst_33 [1] : vector<8x8xf32> to vector<8xf32>
    %51 = vector.shape_cast %50 : vector<8xf32> to vector<8x1xf32>
    %52 = vector.broadcast %51 : vector<8x1xf32> to vector<8x8xf32>
    %53 = arith.subf %49, %52 : vector<8x8xf32>
    %54 = math.exp %53 : vector<8x8xf32>
    %cst_34 = arith.constant dense<0.000000e+00> : vector<8xf32>
    %55 = vector.multi_reduction <add>, %54, %cst_34 [1] : vector<8x8xf32> to vector<8xf32>
    %56 = vector.shape_cast %55 : vector<8xf32> to vector<8x1xf32>
    %57 = vector.broadcast %56 : vector<8x1xf32> to vector<8x8xf32>
    %58 = arith.divf %54, %57 : vector<8x8xf32>
    %cst_35 = arith.constant dense<0.000000e+00> : vector<8x8xf32>
    %59 = tpu.matmul %58, %45, %cst_35 {dimension_numbers = #tpu.dot_dimension_numbers<[1], [0], [0], [1], [0, 0, 1, 1], [], []>} : vector<8x8xf32>, vector<8x8xf32>, vector<8x8xf32> -> vector<8x8xf32>
    %60 = vector.extract_strided_slice %40 {offsets = [8, 0], sizes = [8, 8], strides = [1, 1]} : vector<16x8xf32> to vector<8x8xf32>
    %61 = vector.extract_strided_slice %41 {offsets = [8, 0], sizes = [8, 8], strides = [1, 1]} : vector<16x8xf32> to vector<8x8xf32>
    %62 = vector.extract_strided_slice %42 {offsets = [8, 0], sizes = [8, 8], strides = [1, 1]} : vector<16x8xf32> to vector<8x8xf32>
    %cst_36 = arith.constant dense<0.000000e+00> : vector<8x8xf32>
    %63 = tpu.matmul %60, %61, %cst_36 {dimension_numbers = #tpu.dot_dimension_numbers<[1], [1], [0], [0], [0, 0, 1, 0], [], []>} : vector<8x8xf32>, vector<8x8xf32>, vector<8x8xf32> -> vector<8x8xf32>
    %cst_37 = arith.constant 0.353553385 : f32
    %64 = vector.broadcast %cst_37 : f32 to vector<8x8xf32>
    %65 = arith.mulf %63, %64 : vector<8x8xf32>
    %66 = arith.addf %65, %16 : vector<8x8xf32>
    %cst_38 = arith.constant dense<0xFF800000> : vector<8xf32>
    %67 = vector.multi_reduction <maximumf>, %66, %cst_38 [1] : vector<8x8xf32> to vector<8xf32>
    %68 = vector.shape_cast %67 : vector<8xf32> to vector<8x1xf32>
    %69 = vector.broadcast %68 : vector<8x1xf32> to vector<8x8xf32>
    %70 = arith.subf %66, %69 : vector<8x8xf32>
    %71 = math.exp %70 : vector<8x8xf32>
    %cst_39 = arith.constant dense<0.000000e+00> : vector<8xf32>
    %72 = vector.multi_reduction <add>, %71, %cst_39 [1] : vector<8x8xf32> to vector<8xf32>
    %73 = vector.shape_cast %72 : vector<8xf32> to vector<8x1xf32>
    %74 = vector.broadcast %73 : vector<8x1xf32> to vector<8x8xf32>
    %75 = arith.divf %71, %74 : vector<8x8xf32>
    %cst_40 = arith.constant dense<0.000000e+00> : vector<8x8xf32>
    %76 = tpu.matmul %75, %62, %cst_40 {dimension_numbers = #tpu.dot_dimension_numbers<[1], [0], [0], [1], [0, 0, 1, 1], [], []>} : vector<8x8xf32>, vector<8x8xf32>, vector<8x8xf32> -> vector<8x8xf32>
    %77 = tpu.concatenate %59, %76 in 0 : vector<8x8xf32>, vector<8x8xf32> -> vector<16x8xf32>
    %78 = vector.extract_strided_slice %36 {offsets = [0, 0], sizes = [8, 32], strides = [1, 1]} : vector<32x32xf32> to vector<8x32xf32>
    %cst_41 = arith.constant dense<0.000000e+00> : vector<16x32xf32>
    %79 = tpu.matmul %77, %78, %cst_41 {dimension_numbers = #tpu.dot_dimension_numbers<[1], [0], [0], [1], [0, 0, 1, 1], [], []>} : vector<16x8xf32>, vector<8x32xf32>, vector<16x32xf32> -> vector<16x32xf32>
    %80 = arith.addf %39, %79 : vector<16x32xf32>
    %81 = vector.extract_strided_slice %32 {offsets = [0, 8], sizes = [16, 8], strides = [1, 1]} : vector<16x32xf32> to vector<16x8xf32>
    %82 = vector.extract_strided_slice %33 {offsets = [0, 8], sizes = [16, 8], strides = [1, 1]} : vector<16x32xf32> to vector<16x8xf32>
    %83 = vector.extract_strided_slice %34 {offsets = [0, 8], sizes = [16, 8], strides = [1, 1]} : vector<16x32xf32> to vector<16x8xf32>
    %84 = vector.extract_strided_slice %81 {offsets = [0, 0], sizes = [8, 8], strides = [1, 1]} : vector<16x8xf32> to vector<8x8xf32>
    %85 = vector.extract_strided_slice %82 {offsets = [0, 0], sizes = [8, 8], strides = [1, 1]} : vector<16x8xf32> to vector<8x8xf32>
    %86 = vector.extract_strided_slice %83 {offsets = [0, 0], sizes = [8, 8], strides = [1, 1]} : vector<16x8xf32> to vector<8x8xf32>
    %cst_42 = arith.constant dense<0.000000e+00> : vector<8x8xf32>
    %87 = tpu.matmul %84, %85, %cst_42 {dimension_numbers = #tpu.dot_dimension_numbers<[1], [1], [0], [0], [0, 0, 1, 0], [], []>} : vector<8x8xf32>, vector<8x8xf32>, vector<8x8xf32> -> vector<8x8xf32>
    %cst_43 = arith.constant 0.353553385 : f32
    %88 = vector.broadcast %cst_43 : f32 to vector<8x8xf32>
    %89 = arith.mulf %87, %88 : vector<8x8xf32>
    %90 = arith.addf %89, %16 : vector<8x8xf32>
    %cst_44 = arith.constant dense<0xFF800000> : vector<8xf32>
    %91 = vector.multi_reduction <maximumf>, %90, %cst_44 [1] : vector<8x8xf32> to vector<8xf32>
    %92 = vector.shape_cast %91 : vector<8xf32> to vector<8x1xf32>
    %93 = vector.broadcast %92 : vector<8x1xf32> to vector<8x8xf32>
    %94 = arith.subf %90, %93 : vector<8x8xf32>
    %95 = math.exp %94 : vector<8x8xf32>
    %cst_45 = arith.constant dense<0.000000e+00> : vector<8xf32>
    %96 = vector.multi_reduction <add>, %95, %cst_45 [1] : vector<8x8xf32> to vector<8xf32>
    %97 = vector.shape_cast %96 : vector<8xf32> to vector<8x1xf32>
    %98 = vector.broadcast %97 : vector<8x1xf32> to vector<8x8xf32>
    %99 = arith.divf %95, %98 : vector<8x8xf32>
    %cst_46 = arith.constant dense<0.000000e+00> : vector<8x8xf32>
    %100 = tpu.matmul %99, %86, %cst_46 {dimension_numbers = #tpu.dot_dimension_numbers<[1], [0], [0], [1], [0, 0, 1, 1], [], []>} : vector<8x8xf32>, vector<8x8xf32>, vector<8x8xf32> -> vector<8x8xf32>
    %101 = vector.extract_strided_slice %81 {offsets = [8, 0], sizes = [8, 8], strides = [1, 1]} : vector<16x8xf32> to vector<8x8xf32>
    %102 = vector.extract_strided_slice %82 {offsets = [8, 0], sizes = [8, 8], strides = [1, 1]} : vector<16x8xf32> to vector<8x8xf32>
    %103 = vector.extract_strided_slice %83 {offsets = [8, 0], sizes = [8, 8], strides = [1, 1]} : vector<16x8xf32> to vector<8x8xf32>
    %cst_47 = arith.constant dense<0.000000e+00> : vector<8x8xf32>
    %104 = tpu.matmul %101, %102, %cst_47 {dimension_numbers = #tpu.dot_dimension_numbers<[1], [1], [0], [0], [0, 0, 1, 0], [], []>} : vector<8x8xf32>, vector<8x8xf32>, vector<8x8xf32> -> vector<8x8xf32>
    %cst_48 = arith.constant 0.353553385 : f32
    %105 = vector.broadcast %cst_48 : f32 to vector<8x8xf32>
    %106 = arith.mulf %104, %105 : vector<8x8xf32>
    %107 = arith.addf %106, %16 : vector<8x8xf32>
    %cst_49 = arith.constant dense<0xFF800000> : vector<8xf32>
    %108 = vector.multi_reduction <maximumf>, %107, %cst_49 [1] : vector<8x8xf32> to vector<8xf32>
    %109 = vector.shape_cast %108 : vector<8xf32> to vector<8x1xf32>
    %110 = vector.broadcast %109 : vector<8x1xf32> to vector<8x8xf32>
    %111 = arith.subf %107, %110 : vector<8x8xf32>
    %112 = math.exp %111 : vector<8x8xf32>
    %cst_50 = arith.constant dense<0.000000e+00> : vector<8xf32>
    %113 = vector.multi_reduction <add>, %112, %cst_50 [1] : vector<8x8xf32> to vector<8xf32>
    %114 = vector.shape_cast %113 : vector<8xf32> to vector<8x1xf32>
    %115 = vector.broadcast %114 : vector<8x1xf32> to vector<8x8xf32>
    %116 = arith.divf %112, %115 : vector<8x8xf32>
    %cst_51 = arith.constant dense<0.000000e+00> : vector<8x8xf32>
    %117 = tpu.matmul %116, %103, %cst_51 {dimension_numbers = #tpu.dot_dimension_numbers<[1], [0], [0], [1], [0, 0, 1, 1], [], []>} : vector<8x8xf32>, vector<8x8xf32>, vector<8x8xf32> -> vector<8x8xf32>
    %118 = tpu.concatenate %100, %117 in 0 : vector<8x8xf32>, vector<8x8xf32> -> vector<16x8xf32>
    %119 = vector.extract_strided_slice %36 {offsets = [8, 0], sizes = [8, 32], strides = [1, 1]} : vector<32x32xf32> to vector<8x32xf32>
    %cst_52 = arith.constant dense<0.000000e+00> : vector<16x32xf32>
    %120 = tpu.matmul %118, %119, %cst_52 {dimension_numbers = #tpu.dot_dimension_numbers<[1], [0], [0], [1], [0, 0, 1, 1], [], []>} : vector<16x8xf32>, vector<8x32xf32>, vector<16x32xf32> -> vector<16x32xf32>
    %121 = arith.addf %80, %120 : vector<16x32xf32>
    %122 = vector.extract_strided_slice %32 {offsets = [0, 16], sizes = [16, 8], strides = [1, 1]} : vector<16x32xf32> to vector<16x8xf32>
    %123 = vector.extract_strided_slice %33 {offsets = [0, 16], sizes = [16, 8], strides = [1, 1]} : vector<16x32xf32> to vector<16x8xf32>
    %124 = vector.extract_strided_slice %34 {offsets = [0, 16], sizes = [16, 8], strides = [1, 1]} : vector<16x32xf32> to vector<16x8xf32>
    %125 = vector.extract_strided_slice %122 {offsets = [0, 0], sizes = [8, 8], strides = [1, 1]} : vector<16x8xf32> to vector<8x8xf32>
    %126 = vector.extract_strided_slice %123 {offsets = [0, 0], sizes = [8, 8], strides = [1, 1]} : vector<16x8xf32> to vector<8x8xf32>
    %127 = vector.extract_strided_slice %124 {offsets = [0, 0], sizes = [8, 8], strides = [1, 1]} : vector<16x8xf32> to vector<8x8xf32>
    %cst_53 = arith.constant dense<0.000000e+00> : vector<8x8xf32>
    %128 = tpu.matmul %125, %126, %cst_53 {dimension_numbers = #tpu.dot_dimension_numbers<[1], [1], [0], [0], [0, 0, 1, 0], [], []>} : vector<8x8xf32>, vector<8x8xf32>, vector<8x8xf32> -> vector<8x8xf32>
    %cst_54 = arith.constant 0.353553385 : f32
    %129 = vector.broadcast %cst_54 : f32 to vector<8x8xf32>
    %130 = arith.mulf %128, %129 : vector<8x8xf32>
    %131 = arith.addf %130, %16 : vector<8x8xf32>
    %cst_55 = arith.constant dense<0xFF800000> : vector<8xf32>
    %132 = vector.multi_reduction <maximumf>, %131, %cst_55 [1] : vector<8x8xf32> to vector<8xf32>
    %133 = vector.shape_cast %132 : vector<8xf32> to vector<8x1xf32>
    %134 = vector.broadcast %133 : vector<8x1xf32> to vector<8x8xf32>
    %135 = arith.subf %131, %134 : vector<8x8xf32>
    %136 = math.exp %135 : vector<8x8xf32>
    %cst_56 = arith.constant dense<0.000000e+00> : vector<8xf32>
    %137 = vector.multi_reduction <add>, %136, %cst_56 [1] : vector<8x8xf32> to vector<8xf32>
    %138 = vector.shape_cast %137 : vector<8xf32> to vector<8x1xf32>
    %139 = vector.broadcast %138 : vector<8x1xf32> to vector<8x8xf32>
    %140 = arith.divf %136, %139 : vector<8x8xf32>
    %cst_57 = arith.constant dense<0.000000e+00> : vector<8x8xf32>
    %141 = tpu.matmul %140, %127, %cst_57 {dimension_numbers = #tpu.dot_dimension_numbers<[1], [0], [0], [1], [0, 0, 1, 1], [], []>} : vector<8x8xf32>, vector<8x8xf32>, vector<8x8xf32> -> vector<8x8xf32>
    %142 = vector.extract_strided_slice %122 {offsets = [8, 0], sizes = [8, 8], strides = [1, 1]} : vector<16x8xf32> to vector<8x8xf32>
    %143 = vector.extract_strided_slice %123 {offsets = [8, 0], sizes = [8, 8], strides = [1, 1]} : vector<16x8xf32> to vector<8x8xf32>
    %144 = vector.extract_strided_slice %124 {offsets = [8, 0], sizes = [8, 8], strides = [1, 1]} : vector<16x8xf32> to vector<8x8xf32>
    %cst_58 = arith.constant dense<0.000000e+00> : vector<8x8xf32>
    %145 = tpu.matmul %142, %143, %cst_58 {dimension_numbers = #tpu.dot_dimension_numbers<[1], [1], [0], [0], [0, 0, 1, 0], [], []>} : vector<8x8xf32>, vector<8x8xf32>, vector<8x8xf32> -> vector<8x8xf32>
    %cst_59 = arith.constant 0.353553385 : f32
    %146 = vector.broadcast %cst_59 : f32 to vector<8x8xf32>
    %147 = arith.mulf %145, %146 : vector<8x8xf32>
    %148 = arith.addf %147, %16 : vector<8x8xf32>
    %cst_60 = arith.constant dense<0xFF800000> : vector<8xf32>
    %149 = vector.multi_reduction <maximumf>, %148, %cst_60 [1] : vector<8x8xf32> to vector<8xf32>
    %150 = vector.shape_cast %149 : vector<8xf32> to vector<8x1xf32>
    %151 = vector.broadcast %150 : vector<8x1xf32> to vector<8x8xf32>
    %152 = arith.subf %148, %151 : vector<8x8xf32>
    %153 = math.exp %152 : vector<8x8xf32>
    %cst_61 = arith.constant dense<0.000000e+00> : vector<8xf32>
    %154 = vector.multi_reduction <add>, %153, %cst_61 [1] : vector<8x8xf32> to vector<8xf32>
    %155 = vector.shape_cast %154 : vector<8xf32> to vector<8x1xf32>
    %156 = vector.broadcast %155 : vector<8x1xf32> to vector<8x8xf32>
    %157 = arith.divf %153, %156 : vector<8x8xf32>
    %cst_62 = arith.constant dense<0.000000e+00> : vector<8x8xf32>
    %158 = tpu.matmul %157, %144, %cst_62 {dimension_numbers = #tpu.dot_dimension_numbers<[1], [0], [0], [1], [0, 0, 1, 1], [], []>} : vector<8x8xf32>, vector<8x8xf32>, vector<8x8xf32> -> vector<8x8xf32>
    %159 = tpu.concatenate %141, %158 in 0 : vector<8x8xf32>, vector<8x8xf32> -> vector<16x8xf32>
    %160 = vector.extract_strided_slice %36 {offsets = [16, 0], sizes = [8, 32], strides = [1, 1]} : vector<32x32xf32> to vector<8x32xf32>
    %cst_63 = arith.constant dense<0.000000e+00> : vector<16x32xf32>
    %161 = tpu.matmul %159, %160, %cst_63 {dimension_numbers = #tpu.dot_dimension_numbers<[1], [0], [0], [1], [0, 0, 1, 1], [], []>} : vector<16x8xf32>, vector<8x32xf32>, vector<16x32xf32> -> vector<16x32xf32>
    %162 = arith.addf %121, %161 : vector<16x32xf32>
    %163 = vector.extract_strided_slice %32 {offsets = [0, 24], sizes = [16, 8], strides = [1, 1]} : vector<16x32xf32> to vector<16x8xf32>
    %164 = vector.extract_strided_slice %33 {offsets = [0, 24], sizes = [16, 8], strides = [1, 1]} : vector<16x32xf32> to vector<16x8xf32>
    %165 = vector.extract_strided_slice %34 {offsets = [0, 24], sizes = [16, 8], strides = [1, 1]} : vector<16x32xf32> to vector<16x8xf32>
    %166 = vector.extract_strided_slice %163 {offsets = [0, 0], sizes = [8, 8], strides = [1, 1]} : vector<16x8xf32> to vector<8x8xf32>
    %167 = vector.extract_strided_slice %164 {offsets = [0, 0], sizes = [8, 8], strides = [1, 1]} : vector<16x8xf32> to vector<8x8xf32>
    %168 = vector.extract_strided_slice %165 {offsets = [0, 0], sizes = [8, 8], strides = [1, 1]} : vector<16x8xf32> to vector<8x8xf32>
    %cst_64 = arith.constant dense<0.000000e+00> : vector<8x8xf32>
    %169 = tpu.matmul %166, %167, %cst_64 {dimension_numbers = #tpu.dot_dimension_numbers<[1], [1], [0], [0], [0, 0, 1, 0], [], []>} : vector<8x8xf32>, vector<8x8xf32>, vector<8x8xf32> -> vector<8x8xf32>
    %cst_65 = arith.constant 0.353553385 : f32
    %170 = vector.broadcast %cst_65 : f32 to vector<8x8xf32>
    %171 = arith.mulf %169, %170 : vector<8x8xf32>
    %172 = arith.addf %171, %16 : vector<8x8xf32>
    %cst_66 = arith.constant dense<0xFF800000> : vector<8xf32>
    %173 = vector.multi_reduction <maximumf>, %172, %cst_66 [1] : vector<8x8xf32> to vector<8xf32>
    %174 = vector.shape_cast %173 : vector<8xf32> to vector<8x1xf32>
    %175 = vector.broadcast %174 : vector<8x1xf32> to vector<8x8xf32>
    %176 = arith.subf %172, %175 : vector<8x8xf32>
    %177 = math.exp %176 : vector<8x8xf32>
    %cst_67 = arith.constant dense<0.000000e+00> : vector<8xf32>
    %178 = vector.multi_reduction <add>, %177, %cst_67 [1] : vector<8x8xf32> to vector<8xf32>
    %179 = vector.shape_cast %178 : vector<8xf32> to vector<8x1xf32>
    %180 = vector.broadcast %179 : vector<8x1xf32> to vector<8x8xf32>
    %181 = arith.divf %177, %180 : vector<8x8xf32>
    %cst_68 = arith.constant dense<0.000000e+00> : vector<8x8xf32>
    %182 = tpu.matmul %181, %168, %cst_68 {dimension_numbers = #tpu.dot_dimension_numbers<[1], [0], [0], [1], [0, 0, 1, 1], [], []>} : vector<8x8xf32>, vector<8x8xf32>, vector<8x8xf32> -> vector<8x8xf32>
    %183 = vector.extract_strided_slice %163 {offsets = [8, 0], sizes = [8, 8], strides = [1, 1]} : vector<16x8xf32> to vector<8x8xf32>
    %184 = vector.extract_strided_slice %164 {offsets = [8, 0], sizes = [8, 8], strides = [1, 1]} : vector<16x8xf32> to vector<8x8xf32>
    %185 = vector.extract_strided_slice %165 {offsets = [8, 0], sizes = [8, 8], strides = [1, 1]} : vector<16x8xf32> to vector<8x8xf32>
    %cst_69 = arith.constant dense<0.000000e+00> : vector<8x8xf32>
    %186 = tpu.matmul %183, %184, %cst_69 {dimension_numbers = #tpu.dot_dimension_numbers<[1], [1], [0], [0], [0, 0, 1, 0], [], []>} : vector<8x8xf32>, vector<8x8xf32>, vector<8x8xf32> -> vector<8x8xf32>
    %cst_70 = arith.constant 0.353553385 : f32
    %187 = vector.broadcast %cst_70 : f32 to vector<8x8xf32>
    %188 = arith.mulf %186, %187 : vector<8x8xf32>
    %189 = arith.addf %188, %16 : vector<8x8xf32>
    %cst_71 = arith.constant dense<0xFF800000> : vector<8xf32>
    %190 = vector.multi_reduction <maximumf>, %189, %cst_71 [1] : vector<8x8xf32> to vector<8xf32>
    %191 = vector.shape_cast %190 : vector<8xf32> to vector<8x1xf32>
    %192 = vector.broadcast %191 : vector<8x1xf32> to vector<8x8xf32>
    %193 = arith.subf %189, %192 : vector<8x8xf32>
    %194 = math.exp %193 : vector<8x8xf32>
    %cst_72 = arith.constant dense<0.000000e+00> : vector<8xf32>
    %195 = vector.multi_reduction <add>, %194, %cst_72 [1] : vector<8x8xf32> to vector<8xf32>
    %196 = vector.shape_cast %195 : vector<8xf32> to vector<8x1xf32>
    %197 = vector.broadcast %196 : vector<8x1xf32> to vector<8x8xf32>
    %198 = arith.divf %194, %197 : vector<8x8xf32>
    %cst_73 = arith.constant dense<0.000000e+00> : vector<8x8xf32>
    %199 = tpu.matmul %198, %185, %cst_73 {dimension_numbers = #tpu.dot_dimension_numbers<[1], [0], [0], [1], [0, 0, 1, 1], [], []>} : vector<8x8xf32>, vector<8x8xf32>, vector<8x8xf32> -> vector<8x8xf32>
    %200 = tpu.concatenate %182, %199 in 0 : vector<8x8xf32>, vector<8x8xf32> -> vector<16x8xf32>
    %201 = vector.extract_strided_slice %36 {offsets = [24, 0], sizes = [8, 32], strides = [1, 1]} : vector<32x32xf32> to vector<8x32xf32>
    %cst_74 = arith.constant dense<0.000000e+00> : vector<16x32xf32>
    %202 = tpu.matmul %200, %201, %cst_74 {dimension_numbers = #tpu.dot_dimension_numbers<[1], [0], [0], [1], [0, 0, 1, 1], [], []>} : vector<16x8xf32>, vector<8x32xf32>, vector<16x32xf32> -> vector<16x32xf32>
    %203 = arith.addf %162, %202 : vector<16x32xf32>
    %204 = vector.broadcast %38 : vector<1x32xf32> to vector<16x32xf32>
    %205 = arith.addf %203, %204 : vector<16x32xf32>
    %206 = arith.addf %205, %10 : vector<16x32xf32>
    %c0_75 = arith.constant 0 : index
    %c0_76 = arith.constant 0 : index
    %c0_77 = arith.constant 0 : index
    %207 = vector.load %arg21[%c0_75, %c0_76, %c0_77] : memref<2x1x32xf32, #tpu.memory_space<vmem>>, vector<1x1x32xf32>
    %208 = vector.shape_cast %207 : vector<1x1x32xf32> to vector<1x32xf32>
    %c0_78 = arith.constant 0 : index
    %c0_79 = arith.constant 0 : index
    %c0_80 = arith.constant 0 : index
    %209 = vector.load %arg22[%c0_78, %c0_79, %c0_80] : memref<2x1x32xf32, #tpu.memory_space<vmem>>, vector<1x1x32xf32>
    %210 = vector.shape_cast %209 : vector<1x1x32xf32> to vector<1x32xf32>
    %cst_81 = arith.constant dense<0.000000e+00> : vector<16xf32>
    %211 = vector.multi_reduction <add>, %206, %cst_81 [1] : vector<16x32xf32> to vector<16xf32>
    %212 = vector.shape_cast %211 : vector<16xf32> to vector<16x1xf32>
    %cst_82 = arith.constant 3.200000e+01 : f32
    %213 = vector.broadcast %cst_82 : f32 to vector<16x1xf32>
    %214 = arith.divf %212, %213 : vector<16x1xf32>
    %215 = vector.broadcast %214 : vector<16x1xf32> to vector<16x32xf32>
    %216 = arith.subf %206, %215 : vector<16x32xf32>
    %217 = arith.mulf %216, %216 : vector<16x32xf32>
    %cst_83 = arith.constant dense<0.000000e+00> : vector<16xf32>
    %218 = vector.multi_reduction <add>, %217, %cst_83 [1] : vector<16x32xf32> to vector<16xf32>
    %219 = vector.shape_cast %218 : vector<16xf32> to vector<16x1xf32>
    %cst_84 = arith.constant 3.200000e+01 : f32
    %220 = vector.broadcast %cst_84 : f32 to vector<16x1xf32>
    %221 = arith.divf %219, %220 : vector<16x1xf32>
    %cst_85 = arith.constant 9.99999974E-6 : f32
    %222 = vector.broadcast %cst_85 : f32 to vector<16x1xf32>
    %223 = arith.addf %221, %222 : vector<16x1xf32>
    %224 = math.rsqrt %223 : vector<16x1xf32>
    %225 = vector.broadcast %224 : vector<16x1xf32> to vector<16x32xf32>
    %226 = arith.mulf %216, %225 : vector<16x32xf32>
    %227 = vector.broadcast %208 : vector<1x32xf32> to vector<16x32xf32>
    %228 = arith.mulf %226, %227 : vector<16x32xf32>
    %229 = vector.broadcast %210 : vector<1x32xf32> to vector<16x32xf32>
    %230 = arith.addf %228, %229 : vector<16x32xf32>
    %231 = arith.truncf %230 : vector<16x32xf32> to vector<16x32xbf16>
    %c0_86 = arith.constant 0 : index
    %c0_87 = arith.constant 0 : index
    %c0_88 = arith.constant 0 : index
    %232 = vector.load %arg11[%c0_86, %c0_87, %c0_88] : memref<2x32x32xbf16, #tpu.memory_space<vmem>>, vector<1x32x32xbf16>
    %233 = vector.shape_cast %232 : vector<1x32x32xbf16> to vector<32x32xbf16>
    %cst_89 = arith.constant dense<0.000000e+00> : vector<16x32xf32>
    %234 = tpu.matmul %231, %233, %cst_89 {dimension_numbers = #tpu.dot_dimension_numbers<[1], [0], [0], [1], [0, 0, 1, 1], [], []>} : vector<16x32xbf16>, vector<32x32xbf16>, vector<16x32xf32> -> vector<16x32xf32>
    %c0_90 = arith.constant 0 : index
    %c0_91 = arith.constant 0 : index
    %c0_92 = arith.constant 0 : index
    %235 = vector.load %arg12[%c0_90, %c0_91, %c0_92] : memref<2x1x32xf32, #tpu.memory_space<vmem>>, vector<1x1x32xf32>
    %236 = vector.shape_cast %235 : vector<1x1x32xf32> to vector<1x32xf32>
    %237 = vector.broadcast %236 : vector<1x32xf32> to vector<16x32xf32>
    %238 = arith.addf %234, %237 : vector<16x32xf32>
    %239 = arith.truncf %17 : vector<16x32xf32> to vector<16x32xbf16>
    %c0_93 = arith.constant 0 : index
    %c0_94 = arith.constant 0 : index
    %c0_95 = arith.constant 0 : index
    %240 = vector.load %arg13[%c0_93, %c0_94, %c0_95] : memref<2x32x64xbf16, #tpu.memory_space<vmem>>, vector<1x32x64xbf16>
    %241 = vector.shape_cast %240 : vector<1x32x64xbf16> to vector<32x64xbf16>
    %cst_96 = arith.constant dense<0.000000e+00> : vector<16x64xf32>
    %242 = tpu.matmul %239, %241, %cst_96 {dimension_numbers = #tpu.dot_dimension_numbers<[1], [0], [0], [1], [0, 0, 1, 1], [], []>} : vector<16x32xbf16>, vector<32x64xbf16>, vector<16x64xf32> -> vector<16x64xf32>
    %c0_97 = arith.constant 0 : index
    %c0_98 = arith.constant 0 : index
    %c0_99 = arith.constant 0 : index
    %243 = vector.load %arg14[%c0_97, %c0_98, %c0_99] : memref<2x1x64xf32, #tpu.memory_space<vmem>>, vector<1x1x64xf32>
    %244 = vector.shape_cast %243 : vector<1x1x64xf32> to vector<1x64xf32>
    %245 = vector.broadcast %244 : vector<1x64xf32> to vector<16x64xf32>
    %246 = arith.addf %242, %245 : vector<16x64xf32>
    %247 = vector.extract_strided_slice %246 {offsets = [0, 0], sizes = [16, 32], strides = [1, 1]} : vector<16x64xf32> to vector<16x32xf32>
    %248 = vector.extract_strided_slice %246 {offsets = [0, 32], sizes = [16, 32], strides = [1, 1]} : vector<16x64xf32> to vector<16x32xf32>
    %c0_100 = arith.constant 0 : index
    %c0_101 = arith.constant 0 : index
    %c0_102 = arith.constant 0 : index
    %249 = vector.load %arg15[%c0_100, %c0_101, %c0_102] : memref<2x32x32xf32, #tpu.memory_space<vmem>>, vector<1x32x32xf32>
    %250 = vector.shape_cast %249 : vector<1x32x32xf32> to vector<32x32xf32>
    %c0_103 = arith.constant 0 : index
    %c0_104 = arith.constant 0 : index
    %c0_105 = arith.constant 0 : index
    %251 = vector.load %arg16[%c0_103, %c0_104, %c0_105] : memref<2x1x32xf32, #tpu.memory_space<vmem>>, vector<1x1x32xf32>
    %252 = vector.shape_cast %251 : vector<1x1x32xf32> to vector<1x32xf32>
    %cst_106 = arith.constant 0.000000e+00 : f32
    %253 = vector.broadcast %cst_106 : f32 to vector<16x32xf32>
    %254 = vector.extract_strided_slice %238 {offsets = [0, 0], sizes = [16, 8], strides = [1, 1]} : vector<16x32xf32> to vector<16x8xf32>
    %255 = vector.extract_strided_slice %247 {offsets = [0, 0], sizes = [16, 8], strides = [1, 1]} : vector<16x32xf32> to vector<16x8xf32>
    %256 = vector.extract_strided_slice %248 {offsets = [0, 0], sizes = [16, 8], strides = [1, 1]} : vector<16x32xf32> to vector<16x8xf32>
    %257 = vector.extract_strided_slice %254 {offsets = [0, 0], sizes = [8, 8], strides = [1, 1]} : vector<16x8xf32> to vector<8x8xf32>
    %258 = vector.extract_strided_slice %255 {offsets = [0, 0], sizes = [8, 8], strides = [1, 1]} : vector<16x8xf32> to vector<8x8xf32>
    %259 = vector.extract_strided_slice %256 {offsets = [0, 0], sizes = [8, 8], strides = [1, 1]} : vector<16x8xf32> to vector<8x8xf32>
    %cst_107 = arith.constant dense<0.000000e+00> : vector<8x8xf32>
    %260 = tpu.matmul %257, %258, %cst_107 {dimension_numbers = #tpu.dot_dimension_numbers<[1], [1], [0], [0], [0, 0, 1, 0], [], []>} : vector<8x8xf32>, vector<8x8xf32>, vector<8x8xf32> -> vector<8x8xf32>
    %cst_108 = arith.constant 0.353553385 : f32
    %261 = vector.broadcast %cst_108 : f32 to vector<8x8xf32>
    %262 = arith.mulf %260, %261 : vector<8x8xf32>
    %263 = arith.addf %262, %23 : vector<8x8xf32>
    %cst_109 = arith.constant dense<0xFF800000> : vector<8xf32>
    %264 = vector.multi_reduction <maximumf>, %263, %cst_109 [1] : vector<8x8xf32> to vector<8xf32>
    %265 = vector.shape_cast %264 : vector<8xf32> to vector<8x1xf32>
    %266 = vector.broadcast %265 : vector<8x1xf32> to vector<8x8xf32>
    %267 = arith.subf %263, %266 : vector<8x8xf32>
    %268 = math.exp %267 : vector<8x8xf32>
    %cst_110 = arith.constant dense<0.000000e+00> : vector<8xf32>
    %269 = vector.multi_reduction <add>, %268, %cst_110 [1] : vector<8x8xf32> to vector<8xf32>
    %270 = vector.shape_cast %269 : vector<8xf32> to vector<8x1xf32>
    %271 = vector.broadcast %270 : vector<8x1xf32> to vector<8x8xf32>
    %272 = arith.divf %268, %271 : vector<8x8xf32>
    %cst_111 = arith.constant dense<0.000000e+00> : vector<8x8xf32>
    %273 = tpu.matmul %272, %259, %cst_111 {dimension_numbers = #tpu.dot_dimension_numbers<[1], [0], [0], [1], [0, 0, 1, 1], [], []>} : vector<8x8xf32>, vector<8x8xf32>, vector<8x8xf32> -> vector<8x8xf32>
    %274 = vector.extract_strided_slice %254 {offsets = [8, 0], sizes = [8, 8], strides = [1, 1]} : vector<16x8xf32> to vector<8x8xf32>
    %275 = vector.extract_strided_slice %255 {offsets = [8, 0], sizes = [8, 8], strides = [1, 1]} : vector<16x8xf32> to vector<8x8xf32>
    %276 = vector.extract_strided_slice %256 {offsets = [8, 0], sizes = [8, 8], strides = [1, 1]} : vector<16x8xf32> to vector<8x8xf32>
    %cst_112 = arith.constant dense<0.000000e+00> : vector<8x8xf32>
    %277 = tpu.matmul %274, %275, %cst_112 {dimension_numbers = #tpu.dot_dimension_numbers<[1], [1], [0], [0], [0, 0, 1, 0], [], []>} : vector<8x8xf32>, vector<8x8xf32>, vector<8x8xf32> -> vector<8x8xf32>
    %cst_113 = arith.constant 0.353553385 : f32
    %278 = vector.broadcast %cst_113 : f32 to vector<8x8xf32>
    %279 = arith.mulf %277, %278 : vector<8x8xf32>
    %280 = arith.addf %279, %23 : vector<8x8xf32>
    %cst_114 = arith.constant dense<0xFF800000> : vector<8xf32>
    %281 = vector.multi_reduction <maximumf>, %280, %cst_114 [1] : vector<8x8xf32> to vector<8xf32>
    %282 = vector.shape_cast %281 : vector<8xf32> to vector<8x1xf32>
    %283 = vector.broadcast %282 : vector<8x1xf32> to vector<8x8xf32>
    %284 = arith.subf %280, %283 : vector<8x8xf32>
    %285 = math.exp %284 : vector<8x8xf32>
    %cst_115 = arith.constant dense<0.000000e+00> : vector<8xf32>
    %286 = vector.multi_reduction <add>, %285, %cst_115 [1] : vector<8x8xf32> to vector<8xf32>
    %287 = vector.shape_cast %286 : vector<8xf32> to vector<8x1xf32>
    %288 = vector.broadcast %287 : vector<8x1xf32> to vector<8x8xf32>
    %289 = arith.divf %285, %288 : vector<8x8xf32>
    %cst_116 = arith.constant dense<0.000000e+00> : vector<8x8xf32>
    %290 = tpu.matmul %289, %276, %cst_116 {dimension_numbers = #tpu.dot_dimension_numbers<[1], [0], [0], [1], [0, 0, 1, 1], [], []>} : vector<8x8xf32>, vector<8x8xf32>, vector<8x8xf32> -> vector<8x8xf32>
    %291 = tpu.concatenate %273, %290 in 0 : vector<8x8xf32>, vector<8x8xf32> -> vector<16x8xf32>
    %292 = vector.extract_strided_slice %250 {offsets = [0, 0], sizes = [8, 32], strides = [1, 1]} : vector<32x32xf32> to vector<8x32xf32>
    %cst_117 = arith.constant dense<0.000000e+00> : vector<16x32xf32>
    %293 = tpu.matmul %291, %292, %cst_117 {dimension_numbers = #tpu.dot_dimension_numbers<[1], [0], [0], [1], [0, 0, 1, 1], [], []>} : vector<16x8xf32>, vector<8x32xf32>, vector<16x32xf32> -> vector<16x32xf32>
    %294 = arith.addf %253, %293 : vector<16x32xf32>
    %295 = vector.extract_strided_slice %238 {offsets = [0, 8], sizes = [16, 8], strides = [1, 1]} : vector<16x32xf32> to vector<16x8xf32>
    %296 = vector.extract_strided_slice %247 {offsets = [0, 8], sizes = [16, 8], strides = [1, 1]} : vector<16x32xf32> to vector<16x8xf32>
    %297 = vector.extract_strided_slice %248 {offsets = [0, 8], sizes = [16, 8], strides = [1, 1]} : vector<16x32xf32> to vector<16x8xf32>
    %298 = vector.extract_strided_slice %295 {offsets = [0, 0], sizes = [8, 8], strides = [1, 1]} : vector<16x8xf32> to vector<8x8xf32>
    %299 = vector.extract_strided_slice %296 {offsets = [0, 0], sizes = [8, 8], strides = [1, 1]} : vector<16x8xf32> to vector<8x8xf32>
    %300 = vector.extract_strided_slice %297 {offsets = [0, 0], sizes = [8, 8], strides = [1, 1]} : vector<16x8xf32> to vector<8x8xf32>
    %cst_118 = arith.constant dense<0.000000e+00> : vector<8x8xf32>
    %301 = tpu.matmul %298, %299, %cst_118 {dimension_numbers = #tpu.dot_dimension_numbers<[1], [1], [0], [0], [0, 0, 1, 0], [], []>} : vector<8x8xf32>, vector<8x8xf32>, vector<8x8xf32> -> vector<8x8xf32>
    %cst_119 = arith.constant 0.353553385 : f32
    %302 = vector.broadcast %cst_119 : f32 to vector<8x8xf32>
    %303 = arith.mulf %301, %302 : vector<8x8xf32>
    %304 = arith.addf %303, %23 : vector<8x8xf32>
    %cst_120 = arith.constant dense<0xFF800000> : vector<8xf32>
    %305 = vector.multi_reduction <maximumf>, %304, %cst_120 [1] : vector<8x8xf32> to vector<8xf32>
    %306 = vector.shape_cast %305 : vector<8xf32> to vector<8x1xf32>
    %307 = vector.broadcast %306 : vector<8x1xf32> to vector<8x8xf32>
    %308 = arith.subf %304, %307 : vector<8x8xf32>
    %309 = math.exp %308 : vector<8x8xf32>
    %cst_121 = arith.constant dense<0.000000e+00> : vector<8xf32>
    %310 = vector.multi_reduction <add>, %309, %cst_121 [1] : vector<8x8xf32> to vector<8xf32>
    %311 = vector.shape_cast %310 : vector<8xf32> to vector<8x1xf32>
    %312 = vector.broadcast %311 : vector<8x1xf32> to vector<8x8xf32>
    %313 = arith.divf %309, %312 : vector<8x8xf32>
    %cst_122 = arith.constant dense<0.000000e+00> : vector<8x8xf32>
    %314 = tpu.matmul %313, %300, %cst_122 {dimension_numbers = #tpu.dot_dimension_numbers<[1], [0], [0], [1], [0, 0, 1, 1], [], []>} : vector<8x8xf32>, vector<8x8xf32>, vector<8x8xf32> -> vector<8x8xf32>
    %315 = vector.extract_strided_slice %295 {offsets = [8, 0], sizes = [8, 8], strides = [1, 1]} : vector<16x8xf32> to vector<8x8xf32>
    %316 = vector.extract_strided_slice %296 {offsets = [8, 0], sizes = [8, 8], strides = [1, 1]} : vector<16x8xf32> to vector<8x8xf32>
    %317 = vector.extract_strided_slice %297 {offsets = [8, 0], sizes = [8, 8], strides = [1, 1]} : vector<16x8xf32> to vector<8x8xf32>
    %cst_123 = arith.constant dense<0.000000e+00> : vector<8x8xf32>
    %318 = tpu.matmul %315, %316, %cst_123 {dimension_numbers = #tpu.dot_dimension_numbers<[1], [1], [0], [0], [0, 0, 1, 0], [], []>} : vector<8x8xf32>, vector<8x8xf32>, vector<8x8xf32> -> vector<8x8xf32>
    %cst_124 = arith.constant 0.353553385 : f32
    %319 = vector.broadcast %cst_124 : f32 to vector<8x8xf32>
    %320 = arith.mulf %318, %319 : vector<8x8xf32>
    %321 = arith.addf %320, %23 : vector<8x8xf32>
    %cst_125 = arith.constant dense<0xFF800000> : vector<8xf32>
    %322 = vector.multi_reduction <maximumf>, %321, %cst_125 [1] : vector<8x8xf32> to vector<8xf32>
    %323 = vector.shape_cast %322 : vector<8xf32> to vector<8x1xf32>
    %324 = vector.broadcast %323 : vector<8x1xf32> to vector<8x8xf32>
    %325 = arith.subf %321, %324 : vector<8x8xf32>
    %326 = math.exp %325 : vector<8x8xf32>
    %cst_126 = arith.constant dense<0.000000e+00> : vector<8xf32>
    %327 = vector.multi_reduction <add>, %326, %cst_126 [1] : vector<8x8xf32> to vector<8xf32>
    %328 = vector.shape_cast %327 : vector<8xf32> to vector<8x1xf32>
    %329 = vector.broadcast %328 : vector<8x1xf32> to vector<8x8xf32>
    %330 = arith.divf %326, %329 : vector<8x8xf32>
    %cst_127 = arith.constant dense<0.000000e+00> : vector<8x8xf32>
    %331 = tpu.matmul %330, %317, %cst_127 {dimension_numbers = #tpu.dot_dimension_numbers<[1], [0], [0], [1], [0, 0, 1, 1], [], []>} : vector<8x8xf32>, vector<8x8xf32>, vector<8x8xf32> -> vector<8x8xf32>
    %332 = tpu.concatenate %314, %331 in 0 : vector<8x8xf32>, vector<8x8xf32> -> vector<16x8xf32>
    %333 = vector.extract_strided_slice %250 {offsets = [8, 0], sizes = [8, 32], strides = [1, 1]} : vector<32x32xf32> to vector<8x32xf32>
    %cst_128 = arith.constant dense<0.000000e+00> : vector<16x32xf32>
    %334 = tpu.matmul %332, %333, %cst_128 {dimension_numbers = #tpu.dot_dimension_numbers<[1], [0], [0], [1], [0, 0, 1, 1], [], []>} : vector<16x8xf32>, vector<8x32xf32>, vector<16x32xf32> -> vector<16x32xf32>
    %335 = arith.addf %294, %334 : vector<16x32xf32>
    %336 = vector.extract_strided_slice %238 {offsets = [0, 16], sizes = [16, 8], strides = [1, 1]} : vector<16x32xf32> to vector<16x8xf32>
    %337 = vector.extract_strided_slice %247 {offsets = [0, 16], sizes = [16, 8], strides = [1, 1]} : vector<16x32xf32> to vector<16x8xf32>
    %338 = vector.extract_strided_slice %248 {offsets = [0, 16], sizes = [16, 8], strides = [1, 1]} : vector<16x32xf32> to vector<16x8xf32>
    %339 = vector.extract_strided_slice %336 {offsets = [0, 0], sizes = [8, 8], strides = [1, 1]} : vector<16x8xf32> to vector<8x8xf32>
    %340 = vector.extract_strided_slice %337 {offsets = [0, 0], sizes = [8, 8], strides = [1, 1]} : vector<16x8xf32> to vector<8x8xf32>
    %341 = vector.extract_strided_slice %338 {offsets = [0, 0], sizes = [8, 8], strides = [1, 1]} : vector<16x8xf32> to vector<8x8xf32>
    %cst_129 = arith.constant dense<0.000000e+00> : vector<8x8xf32>
    %342 = tpu.matmul %339, %340, %cst_129 {dimension_numbers = #tpu.dot_dimension_numbers<[1], [1], [0], [0], [0, 0, 1, 0], [], []>} : vector<8x8xf32>, vector<8x8xf32>, vector<8x8xf32> -> vector<8x8xf32>
    %cst_130 = arith.constant 0.353553385 : f32
    %343 = vector.broadcast %cst_130 : f32 to vector<8x8xf32>
    %344 = arith.mulf %342, %343 : vector<8x8xf32>
    %345 = arith.addf %344, %23 : vector<8x8xf32>
    %cst_131 = arith.constant dense<0xFF800000> : vector<8xf32>
    %346 = vector.multi_reduction <maximumf>, %345, %cst_131 [1] : vector<8x8xf32> to vector<8xf32>
    %347 = vector.shape_cast %346 : vector<8xf32> to vector<8x1xf32>
    %348 = vector.broadcast %347 : vector<8x1xf32> to vector<8x8xf32>
    %349 = arith.subf %345, %348 : vector<8x8xf32>
    %350 = math.exp %349 : vector<8x8xf32>
    %cst_132 = arith.constant dense<0.000000e+00> : vector<8xf32>
    %351 = vector.multi_reduction <add>, %350, %cst_132 [1] : vector<8x8xf32> to vector<8xf32>
    %352 = vector.shape_cast %351 : vector<8xf32> to vector<8x1xf32>
    %353 = vector.broadcast %352 : vector<8x1xf32> to vector<8x8xf32>
    %354 = arith.divf %350, %353 : vector<8x8xf32>
    %cst_133 = arith.constant dense<0.000000e+00> : vector<8x8xf32>
    %355 = tpu.matmul %354, %341, %cst_133 {dimension_numbers = #tpu.dot_dimension_numbers<[1], [0], [0], [1], [0, 0, 1, 1], [], []>} : vector<8x8xf32>, vector<8x8xf32>, vector<8x8xf32> -> vector<8x8xf32>
    %356 = vector.extract_strided_slice %336 {offsets = [8, 0], sizes = [8, 8], strides = [1, 1]} : vector<16x8xf32> to vector<8x8xf32>
    %357 = vector.extract_strided_slice %337 {offsets = [8, 0], sizes = [8, 8], strides = [1, 1]} : vector<16x8xf32> to vector<8x8xf32>
    %358 = vector.extract_strided_slice %338 {offsets = [8, 0], sizes = [8, 8], strides = [1, 1]} : vector<16x8xf32> to vector<8x8xf32>
    %cst_134 = arith.constant dense<0.000000e+00> : vector<8x8xf32>
    %359 = tpu.matmul %356, %357, %cst_134 {dimension_numbers = #tpu.dot_dimension_numbers<[1], [1], [0], [0], [0, 0, 1, 0], [], []>} : vector<8x8xf32>, vector<8x8xf32>, vector<8x8xf32> -> vector<8x8xf32>
    %cst_135 = arith.constant 0.353553385 : f32
    %360 = vector.broadcast %cst_135 : f32 to vector<8x8xf32>
    %361 = arith.mulf %359, %360 : vector<8x8xf32>
    %362 = arith.addf %361, %23 : vector<8x8xf32>
    %cst_136 = arith.constant dense<0xFF800000> : vector<8xf32>
    %363 = vector.multi_reduction <maximumf>, %362, %cst_136 [1] : vector<8x8xf32> to vector<8xf32>
    %364 = vector.shape_cast %363 : vector<8xf32> to vector<8x1xf32>
    %365 = vector.broadcast %364 : vector<8x1xf32> to vector<8x8xf32>
    %366 = arith.subf %362, %365 : vector<8x8xf32>
    %367 = math.exp %366 : vector<8x8xf32>
    %cst_137 = arith.constant dense<0.000000e+00> : vector<8xf32>
    %368 = vector.multi_reduction <add>, %367, %cst_137 [1] : vector<8x8xf32> to vector<8xf32>
    %369 = vector.shape_cast %368 : vector<8xf32> to vector<8x1xf32>
    %370 = vector.broadcast %369 : vector<8x1xf32> to vector<8x8xf32>
    %371 = arith.divf %367, %370 : vector<8x8xf32>
    %cst_138 = arith.constant dense<0.000000e+00> : vector<8x8xf32>
    %372 = tpu.matmul %371, %358, %cst_138 {dimension_numbers = #tpu.dot_dimension_numbers<[1], [0], [0], [1], [0, 0, 1, 1], [], []>} : vector<8x8xf32>, vector<8x8xf32>, vector<8x8xf32> -> vector<8x8xf32>
    %373 = tpu.concatenate %355, %372 in 0 : vector<8x8xf32>, vector<8x8xf32> -> vector<16x8xf32>
    %374 = vector.extract_strided_slice %250 {offsets = [16, 0], sizes = [8, 32], strides = [1, 1]} : vector<32x32xf32> to vector<8x32xf32>
    %cst_139 = arith.constant dense<0.000000e+00> : vector<16x32xf32>
    %375 = tpu.matmul %373, %374, %cst_139 {dimension_numbers = #tpu.dot_dimension_numbers<[1], [0], [0], [1], [0, 0, 1, 1], [], []>} : vector<16x8xf32>, vector<8x32xf32>, vector<16x32xf32> -> vector<16x32xf32>
    %376 = arith.addf %335, %375 : vector<16x32xf32>
    %377 = vector.extract_strided_slice %238 {offsets = [0, 24], sizes = [16, 8], strides = [1, 1]} : vector<16x32xf32> to vector<16x8xf32>
    %378 = vector.extract_strided_slice %247 {offsets = [0, 24], sizes = [16, 8], strides = [1, 1]} : vector<16x32xf32> to vector<16x8xf32>
    %379 = vector.extract_strided_slice %248 {offsets = [0, 24], sizes = [16, 8], strides = [1, 1]} : vector<16x32xf32> to vector<16x8xf32>
    %380 = vector.extract_strided_slice %377 {offsets = [0, 0], sizes = [8, 8], strides = [1, 1]} : vector<16x8xf32> to vector<8x8xf32>
    %381 = vector.extract_strided_slice %378 {offsets = [0, 0], sizes = [8, 8], strides = [1, 1]} : vector<16x8xf32> to vector<8x8xf32>
    %382 = vector.extract_strided_slice %379 {offsets = [0, 0], sizes = [8, 8], strides = [1, 1]} : vector<16x8xf32> to vector<8x8xf32>
    %cst_140 = arith.constant dense<0.000000e+00> : vector<8x8xf32>
    %383 = tpu.matmul %380, %381, %cst_140 {dimension_numbers = #tpu.dot_dimension_numbers<[1], [1], [0], [0], [0, 0, 1, 0], [], []>} : vector<8x8xf32>, vector<8x8xf32>, vector<8x8xf32> -> vector<8x8xf32>
    %cst_141 = arith.constant 0.353553385 : f32
    %384 = vector.broadcast %cst_141 : f32 to vector<8x8xf32>
    %385 = arith.mulf %383, %384 : vector<8x8xf32>
    %386 = arith.addf %385, %23 : vector<8x8xf32>
    %cst_142 = arith.constant dense<0xFF800000> : vector<8xf32>
    %387 = vector.multi_reduction <maximumf>, %386, %cst_142 [1] : vector<8x8xf32> to vector<8xf32>
    %388 = vector.shape_cast %387 : vector<8xf32> to vector<8x1xf32>
    %389 = vector.broadcast %388 : vector<8x1xf32> to vector<8x8xf32>
    %390 = arith.subf %386, %389 : vector<8x8xf32>
    %391 = math.exp %390 : vector<8x8xf32>
    %cst_143 = arith.constant dense<0.000000e+00> : vector<8xf32>
    %392 = vector.multi_reduction <add>, %391, %cst_143 [1] : vector<8x8xf32> to vector<8xf32>
    %393 = vector.shape_cast %392 : vector<8xf32> to vector<8x1xf32>
    %394 = vector.broadcast %393 : vector<8x1xf32> to vector<8x8xf32>
    %395 = arith.divf %391, %394 : vector<8x8xf32>
    %cst_144 = arith.constant dense<0.000000e+00> : vector<8x8xf32>
    %396 = tpu.matmul %395, %382, %cst_144 {dimension_numbers = #tpu.dot_dimension_numbers<[1], [0], [0], [1], [0, 0, 1, 1], [], []>} : vector<8x8xf32>, vector<8x8xf32>, vector<8x8xf32> -> vector<8x8xf32>
    %397 = vector.extract_strided_slice %377 {offsets = [8, 0], sizes = [8, 8], strides = [1, 1]} : vector<16x8xf32> to vector<8x8xf32>
    %398 = vector.extract_strided_slice %378 {offsets = [8, 0], sizes = [8, 8], strides = [1, 1]} : vector<16x8xf32> to vector<8x8xf32>
    %399 = vector.extract_strided_slice %379 {offsets = [8, 0], sizes = [8, 8], strides = [1, 1]} : vector<16x8xf32> to vector<8x8xf32>
    %cst_145 = arith.constant dense<0.000000e+00> : vector<8x8xf32>
    %400 = tpu.matmul %397, %398, %cst_145 {dimension_numbers = #tpu.dot_dimension_numbers<[1], [1], [0], [0], [0, 0, 1, 0], [], []>} : vector<8x8xf32>, vector<8x8xf32>, vector<8x8xf32> -> vector<8x8xf32>
    %cst_146 = arith.constant 0.353553385 : f32
    %401 = vector.broadcast %cst_146 : f32 to vector<8x8xf32>
    %402 = arith.mulf %400, %401 : vector<8x8xf32>
    %403 = arith.addf %402, %23 : vector<8x8xf32>
    %cst_147 = arith.constant dense<0xFF800000> : vector<8xf32>
    %404 = vector.multi_reduction <maximumf>, %403, %cst_147 [1] : vector<8x8xf32> to vector<8xf32>
    %405 = vector.shape_cast %404 : vector<8xf32> to vector<8x1xf32>
    %406 = vector.broadcast %405 : vector<8x1xf32> to vector<8x8xf32>
    %407 = arith.subf %403, %406 : vector<8x8xf32>
    %408 = math.exp %407 : vector<8x8xf32>
    %cst_148 = arith.constant dense<0.000000e+00> : vector<8xf32>
    %409 = vector.multi_reduction <add>, %408, %cst_148 [1] : vector<8x8xf32> to vector<8xf32>
    %410 = vector.shape_cast %409 : vector<8xf32> to vector<8x1xf32>
    %411 = vector.broadcast %410 : vector<8x1xf32> to vector<8x8xf32>
    %412 = arith.divf %408, %411 : vector<8x8xf32>
    %cst_149 = arith.constant dense<0.000000e+00> : vector<8x8xf32>
    %413 = tpu.matmul %412, %399, %cst_149 {dimension_numbers = #tpu.dot_dimension_numbers<[1], [0], [0], [1], [0, 0, 1, 1], [], []>} : vector<8x8xf32>, vector<8x8xf32>, vector<8x8xf32> -> vector<8x8xf32>
    %414 = tpu.concatenate %396, %413 in 0 : vector<8x8xf32>, vector<8x8xf32> -> vector<16x8xf32>
    %415 = vector.extract_strided_slice %250 {offsets = [24, 0], sizes = [8, 32], strides = [1, 1]} : vector<32x32xf32> to vector<8x32xf32>
    %cst_150 = arith.constant dense<0.000000e+00> : vector<16x32xf32>
    %416 = tpu.matmul %414, %415, %cst_150 {dimension_numbers = #tpu.dot_dimension_numbers<[1], [0], [0], [1], [0, 0, 1, 1], [], []>} : vector<16x8xf32>, vector<8x32xf32>, vector<16x32xf32> -> vector<16x32xf32>
    %417 = arith.addf %376, %416 : vector<16x32xf32>
    %418 = vector.broadcast %252 : vector<1x32xf32> to vector<16x32xf32>
    %419 = arith.addf %417, %418 : vector<16x32xf32>
    %420 = arith.addf %419, %230 : vector<16x32xf32>
    %c0_151 = arith.constant 0 : index
    %c0_152 = arith.constant 0 : index
    %c0_153 = arith.constant 0 : index
    %421 = vector.load %arg23[%c0_151, %c0_152, %c0_153] : memref<2x1x32xf32, #tpu.memory_space<vmem>>, vector<1x1x32xf32>
    %422 = vector.shape_cast %421 : vector<1x1x32xf32> to vector<1x32xf32>
    %c0_154 = arith.constant 0 : index
    %c0_155 = arith.constant 0 : index
    %c0_156 = arith.constant 0 : index
    %423 = vector.load %arg24[%c0_154, %c0_155, %c0_156] : memref<2x1x32xf32, #tpu.memory_space<vmem>>, vector<1x1x32xf32>
    %424 = vector.shape_cast %423 : vector<1x1x32xf32> to vector<1x32xf32>
    %cst_157 = arith.constant dense<0.000000e+00> : vector<16xf32>
    %425 = vector.multi_reduction <add>, %420, %cst_157 [1] : vector<16x32xf32> to vector<16xf32>
    %426 = vector.shape_cast %425 : vector<16xf32> to vector<16x1xf32>
    %cst_158 = arith.constant 3.200000e+01 : f32
    %427 = vector.broadcast %cst_158 : f32 to vector<16x1xf32>
    %428 = arith.divf %426, %427 : vector<16x1xf32>
    %429 = vector.broadcast %428 : vector<16x1xf32> to vector<16x32xf32>
    %430 = arith.subf %420, %429 : vector<16x32xf32>
    %431 = arith.mulf %430, %430 : vector<16x32xf32>
    %cst_159 = arith.constant dense<0.000000e+00> : vector<16xf32>
    %432 = vector.multi_reduction <add>, %431, %cst_159 [1] : vector<16x32xf32> to vector<16xf32>
    %433 = vector.shape_cast %432 : vector<16xf32> to vector<16x1xf32>
    %cst_160 = arith.constant 3.200000e+01 : f32
    %434 = vector.broadcast %cst_160 : f32 to vector<16x1xf32>
    %435 = arith.divf %433, %434 : vector<16x1xf32>
    %cst_161 = arith.constant 9.99999974E-6 : f32
    %436 = vector.broadcast %cst_161 : f32 to vector<16x1xf32>
    %437 = arith.addf %435, %436 : vector<16x1xf32>
    %438 = math.rsqrt %437 : vector<16x1xf32>
    %439 = vector.broadcast %438 : vector<16x1xf32> to vector<16x32xf32>
    %440 = arith.mulf %430, %439 : vector<16x32xf32>
    %441 = vector.broadcast %422 : vector<1x32xf32> to vector<16x32xf32>
    %442 = arith.mulf %440, %441 : vector<16x32xf32>
    %443 = vector.broadcast %424 : vector<1x32xf32> to vector<16x32xf32>
    %444 = arith.addf %442, %443 : vector<16x32xf32>
    %445 = arith.truncf %444 : vector<16x32xf32> to vector<16x32xbf16>
    %c0_162 = arith.constant 0 : index
    %c0_163 = arith.constant 0 : index
    %c0_164 = arith.constant 0 : index
    %446 = vector.load %arg17[%c0_162, %c0_163, %c0_164] : memref<2x32x64xbf16, #tpu.memory_space<vmem>>, vector<1x32x64xbf16>
    %447 = vector.shape_cast %446 : vector<1x32x64xbf16> to vector<32x64xbf16>
    %cst_165 = arith.constant dense<0.000000e+00> : vector<16x64xf32>
    %448 = tpu.matmul %445, %447, %cst_165 {dimension_numbers = #tpu.dot_dimension_numbers<[1], [0], [0], [1], [0, 0, 1, 1], [], []>} : vector<16x32xbf16>, vector<32x64xbf16>, vector<16x64xf32> -> vector<16x64xf32>
    %c0_166 = arith.constant 0 : index
    %c0_167 = arith.constant 0 : index
    %c0_168 = arith.constant 0 : index
    %449 = vector.load %arg18[%c0_166, %c0_167, %c0_168] : memref<2x1x64xf32, #tpu.memory_space<vmem>>, vector<1x1x64xf32>
    %450 = vector.shape_cast %449 : vector<1x1x64xf32> to vector<1x64xf32>
    %451 = vector.broadcast %450 : vector<1x64xf32> to vector<16x64xf32>
    %452 = arith.addf %448, %451 : vector<16x64xf32>
    %cst_169 = arith.constant 0.000000e+00 : f32
    %453 = vector.broadcast %cst_169 : f32 to vector<16x64xf32>
    %454 = arith.maximumf %452, %453 : vector<16x64xf32>
    %455 = arith.truncf %454 : vector<16x64xf32> to vector<16x64xbf16>
    %c0_170 = arith.constant 0 : index
    %c0_171 = arith.constant 0 : index
    %c0_172 = arith.constant 0 : index
    %456 = vector.load %arg19[%c0_170, %c0_171, %c0_172] : memref<2x64x32xbf16, #tpu.memory_space<vmem>>, vector<1x64x32xbf16>
    %457 = vector.shape_cast %456 : vector<1x64x32xbf16> to vector<64x32xbf16>
    %cst_173 = arith.constant dense<0.000000e+00> : vector<16x32xf32>
    %458 = tpu.matmul %455, %457, %cst_173 {dimension_numbers = #tpu.dot_dimension_numbers<[1], [0], [0], [1], [0, 0, 1, 1], [], []>} : vector<16x64xbf16>, vector<64x32xbf16>, vector<16x32xf32> -> vector<16x32xf32>
    %c0_174 = arith.constant 0 : index
    %c0_175 = arith.constant 0 : index
    %c0_176 = arith.constant 0 : index
    %459 = vector.load %arg20[%c0_174, %c0_175, %c0_176] : memref<2x1x32xf32, #tpu.memory_space<vmem>>, vector<1x1x32xf32>
    %460 = vector.shape_cast %459 : vector<1x1x32xf32> to vector<1x32xf32>
    %461 = vector.broadcast %460 : vector<1x32xf32> to vector<16x32xf32>
    %462 = arith.addf %458, %461 : vector<16x32xf32>
    %463 = arith.addf %462, %444 : vector<16x32xf32>
    %c0_177 = arith.constant 0 : index
    %c0_178 = arith.constant 0 : index
    %c0_179 = arith.constant 0 : index
    %464 = vector.load %arg25[%c0_177, %c0_178, %c0_179] : memref<2x1x32xf32, #tpu.memory_space<vmem>>, vector<1x1x32xf32>
    %465 = vector.shape_cast %464 : vector<1x1x32xf32> to vector<1x32xf32>
    %c0_180 = arith.constant 0 : index
    %c0_181 = arith.constant 0 : index
    %c0_182 = arith.constant 0 : index
    %466 = vector.load %arg26[%c0_180, %c0_181, %c0_182] : memref<2x1x32xf32, #tpu.memory_space<vmem>>, vector<1x1x32xf32>
    %467 = vector.shape_cast %466 : vector<1x1x32xf32> to vector<1x32xf32>
    %cst_183 = arith.constant dense<0.000000e+00> : vector<16xf32>
    %468 = vector.multi_reduction <add>, %463, %cst_183 [1] : vector<16x32xf32> to vector<16xf32>
    %469 = vector.shape_cast %468 : vector<16xf32> to vector<16x1xf32>
    %cst_184 = arith.constant 3.200000e+01 : f32
    %470 = vector.broadcast %cst_184 : f32 to vector<16x1xf32>
    %471 = arith.divf %469, %470 : vector<16x1xf32>
    %472 = vector.broadcast %471 : vector<16x1xf32> to vector<16x32xf32>
    %473 = arith.subf %463, %472 : vector<16x32xf32>
    %474 = arith.mulf %473, %473 : vector<16x32xf32>
    %cst_185 = arith.constant dense<0.000000e+00> : vector<16xf32>
    %475 = vector.multi_reduction <add>, %474, %cst_185 [1] : vector<16x32xf32> to vector<16xf32>
    %476 = vector.shape_cast %475 : vector<16xf32> to vector<16x1xf32>
    %cst_186 = arith.constant 3.200000e+01 : f32
    %477 = vector.broadcast %cst_186 : f32 to vector<16x1xf32>
    %478 = arith.divf %476, %477 : vector<16x1xf32>
    %cst_187 = arith.constant 9.99999974E-6 : f32
    %479 = vector.broadcast %cst_187 : f32 to vector<16x1xf32>
    %480 = arith.addf %478, %479 : vector<16x1xf32>
    %481 = math.rsqrt %480 : vector<16x1xf32>
    %482 = vector.broadcast %481 : vector<16x1xf32> to vector<16x32xf32>
    %483 = arith.mulf %473, %482 : vector<16x32xf32>
    %484 = vector.broadcast %465 : vector<1x32xf32> to vector<16x32xf32>
    %485 = arith.mulf %483, %484 : vector<16x32xf32>
    %486 = vector.broadcast %467 : vector<1x32xf32> to vector<16x32xf32>
    %487 = arith.addf %485, %486 : vector<16x32xf32>
    %488 = arith.truncf %487 : vector<16x32xf32> to vector<16x32xbf16>
    %c1 = arith.constant 1 : index
    %c0_188 = arith.constant 0 : index
    %c0_189 = arith.constant 0 : index
    %489 = vector.load %arg7[%c1, %c0_188, %c0_189] : memref<2x32x96xbf16, #tpu.memory_space<vmem>>, vector<1x32x96xbf16>
    %490 = vector.shape_cast %489 : vector<1x32x96xbf16> to vector<32x96xbf16>
    %cst_190 = arith.constant dense<0.000000e+00> : vector<16x96xf32>
    %491 = tpu.matmul %488, %490, %cst_190 {dimension_numbers = #tpu.dot_dimension_numbers<[1], [0], [0], [1], [0, 0, 1, 1], [], []>} : vector<16x32xbf16>, vector<32x96xbf16>, vector<16x96xf32> -> vector<16x96xf32>
    %c1_191 = arith.constant 1 : index
    %c0_192 = arith.constant 0 : index
    %c0_193 = arith.constant 0 : index
    %492 = vector.load %arg8[%c1_191, %c0_192, %c0_193] : memref<2x1x96xf32, #tpu.memory_space<vmem>>, vector<1x1x96xf32>
    %493 = vector.shape_cast %492 : vector<1x1x96xf32> to vector<1x96xf32>
    %494 = vector.broadcast %493 : vector<1x96xf32> to vector<16x96xf32>
    %495 = arith.addf %491, %494 : vector<16x96xf32>
    %496 = vector.extract_strided_slice %495 {offsets = [0, 0], sizes = [16, 32], strides = [1, 1]} : vector<16x96xf32> to vector<16x32xf32>
    %497 = vector.extract_strided_slice %495 {offsets = [0, 32], sizes = [16, 32], strides = [1, 1]} : vector<16x96xf32> to vector<16x32xf32>
    %498 = vector.extract_strided_slice %495 {offsets = [0, 64], sizes = [16, 32], strides = [1, 1]} : vector<16x96xf32> to vector<16x32xf32>
    %c1_194 = arith.constant 1 : index
    %c0_195 = arith.constant 0 : index
    %c0_196 = arith.constant 0 : index
    %499 = vector.load %arg9[%c1_194, %c0_195, %c0_196] : memref<2x32x32xf32, #tpu.memory_space<vmem>>, vector<1x32x32xf32>
    %500 = vector.shape_cast %499 : vector<1x32x32xf32> to vector<32x32xf32>
    %c1_197 = arith.constant 1 : index
    %c0_198 = arith.constant 0 : index
    %c0_199 = arith.constant 0 : index
    %501 = vector.load %arg10[%c1_197, %c0_198, %c0_199] : memref<2x1x32xf32, #tpu.memory_space<vmem>>, vector<1x1x32xf32>
    %502 = vector.shape_cast %501 : vector<1x1x32xf32> to vector<1x32xf32>
    %cst_200 = arith.constant 0.000000e+00 : f32
    %503 = vector.broadcast %cst_200 : f32 to vector<16x32xf32>
    %504 = vector.extract_strided_slice %496 {offsets = [0, 0], sizes = [16, 8], strides = [1, 1]} : vector<16x32xf32> to vector<16x8xf32>
    %505 = vector.extract_strided_slice %497 {offsets = [0, 0], sizes = [16, 8], strides = [1, 1]} : vector<16x32xf32> to vector<16x8xf32>
    %506 = vector.extract_strided_slice %498 {offsets = [0, 0], sizes = [16, 8], strides = [1, 1]} : vector<16x32xf32> to vector<16x8xf32>
    %507 = vector.extract_strided_slice %504 {offsets = [0, 0], sizes = [8, 8], strides = [1, 1]} : vector<16x8xf32> to vector<8x8xf32>
    %508 = vector.extract_strided_slice %505 {offsets = [0, 0], sizes = [8, 8], strides = [1, 1]} : vector<16x8xf32> to vector<8x8xf32>
    %509 = vector.extract_strided_slice %506 {offsets = [0, 0], sizes = [8, 8], strides = [1, 1]} : vector<16x8xf32> to vector<8x8xf32>
    %cst_201 = arith.constant dense<0.000000e+00> : vector<8x8xf32>
    %510 = tpu.matmul %507, %508, %cst_201 {dimension_numbers = #tpu.dot_dimension_numbers<[1], [1], [0], [0], [0, 0, 1, 0], [], []>} : vector<8x8xf32>, vector<8x8xf32>, vector<8x8xf32> -> vector<8x8xf32>
    %cst_202 = arith.constant 0.353553385 : f32
    %511 = vector.broadcast %cst_202 : f32 to vector<8x8xf32>
    %512 = arith.mulf %510, %511 : vector<8x8xf32>
    %513 = arith.addf %512, %16 : vector<8x8xf32>
    %cst_203 = arith.constant dense<0xFF800000> : vector<8xf32>
    %514 = vector.multi_reduction <maximumf>, %513, %cst_203 [1] : vector<8x8xf32> to vector<8xf32>
    %515 = vector.shape_cast %514 : vector<8xf32> to vector<8x1xf32>
    %516 = vector.broadcast %515 : vector<8x1xf32> to vector<8x8xf32>
    %517 = arith.subf %513, %516 : vector<8x8xf32>
    %518 = math.exp %517 : vector<8x8xf32>
    %cst_204 = arith.constant dense<0.000000e+00> : vector<8xf32>
    %519 = vector.multi_reduction <add>, %518, %cst_204 [1] : vector<8x8xf32> to vector<8xf32>
    %520 = vector.shape_cast %519 : vector<8xf32> to vector<8x1xf32>
    %521 = vector.broadcast %520 : vector<8x1xf32> to vector<8x8xf32>
    %522 = arith.divf %518, %521 : vector<8x8xf32>
    %cst_205 = arith.constant dense<0.000000e+00> : vector<8x8xf32>
    %523 = tpu.matmul %522, %509, %cst_205 {dimension_numbers = #tpu.dot_dimension_numbers<[1], [0], [0], [1], [0, 0, 1, 1], [], []>} : vector<8x8xf32>, vector<8x8xf32>, vector<8x8xf32> -> vector<8x8xf32>
    %524 = vector.extract_strided_slice %504 {offsets = [8, 0], sizes = [8, 8], strides = [1, 1]} : vector<16x8xf32> to vector<8x8xf32>
    %525 = vector.extract_strided_slice %505 {offsets = [8, 0], sizes = [8, 8], strides = [1, 1]} : vector<16x8xf32> to vector<8x8xf32>
    %526 = vector.extract_strided_slice %506 {offsets = [8, 0], sizes = [8, 8], strides = [1, 1]} : vector<16x8xf32> to vector<8x8xf32>
    %cst_206 = arith.constant dense<0.000000e+00> : vector<8x8xf32>
    %527 = tpu.matmul %524, %525, %cst_206 {dimension_numbers = #tpu.dot_dimension_numbers<[1], [1], [0], [0], [0, 0, 1, 0], [], []>} : vector<8x8xf32>, vector<8x8xf32>, vector<8x8xf32> -> vector<8x8xf32>
    %cst_207 = arith.constant 0.353553385 : f32
    %528 = vector.broadcast %cst_207 : f32 to vector<8x8xf32>
    %529 = arith.mulf %527, %528 : vector<8x8xf32>
    %530 = arith.addf %529, %16 : vector<8x8xf32>
    %cst_208 = arith.constant dense<0xFF800000> : vector<8xf32>
    %531 = vector.multi_reduction <maximumf>, %530, %cst_208 [1] : vector<8x8xf32> to vector<8xf32>
    %532 = vector.shape_cast %531 : vector<8xf32> to vector<8x1xf32>
    %533 = vector.broadcast %532 : vector<8x1xf32> to vector<8x8xf32>
    %534 = arith.subf %530, %533 : vector<8x8xf32>
    %535 = math.exp %534 : vector<8x8xf32>
    %cst_209 = arith.constant dense<0.000000e+00> : vector<8xf32>
    %536 = vector.multi_reduction <add>, %535, %cst_209 [1] : vector<8x8xf32> to vector<8xf32>
    %537 = vector.shape_cast %536 : vector<8xf32> to vector<8x1xf32>
    %538 = vector.broadcast %537 : vector<8x1xf32> to vector<8x8xf32>
    %539 = arith.divf %535, %538 : vector<8x8xf32>
    %cst_210 = arith.constant dense<0.000000e+00> : vector<8x8xf32>
    %540 = tpu.matmul %539, %526, %cst_210 {dimension_numbers = #tpu.dot_dimension_numbers<[1], [0], [0], [1], [0, 0, 1, 1], [], []>} : vector<8x8xf32>, vector<8x8xf32>, vector<8x8xf32> -> vector<8x8xf32>
    %541 = tpu.concatenate %523, %540 in 0 : vector<8x8xf32>, vector<8x8xf32> -> vector<16x8xf32>
    %542 = vector.extract_strided_slice %500 {offsets = [0, 0], sizes = [8, 32], strides = [1, 1]} : vector<32x32xf32> to vector<8x32xf32>
    %cst_211 = arith.constant dense<0.000000e+00> : vector<16x32xf32>
    %543 = tpu.matmul %541, %542, %cst_211 {dimension_numbers = #tpu.dot_dimension_numbers<[1], [0], [0], [1], [0, 0, 1, 1], [], []>} : vector<16x8xf32>, vector<8x32xf32>, vector<16x32xf32> -> vector<16x32xf32>
    %544 = arith.addf %503, %543 : vector<16x32xf32>
    %545 = vector.extract_strided_slice %496 {offsets = [0, 8], sizes = [16, 8], strides = [1, 1]} : vector<16x32xf32> to vector<16x8xf32>
    %546 = vector.extract_strided_slice %497 {offsets = [0, 8], sizes = [16, 8], strides = [1, 1]} : vector<16x32xf32> to vector<16x8xf32>
    %547 = vector.extract_strided_slice %498 {offsets = [0, 8], sizes = [16, 8], strides = [1, 1]} : vector<16x32xf32> to vector<16x8xf32>
    %548 = vector.extract_strided_slice %545 {offsets = [0, 0], sizes = [8, 8], strides = [1, 1]} : vector<16x8xf32> to vector<8x8xf32>
    %549 = vector.extract_strided_slice %546 {offsets = [0, 0], sizes = [8, 8], strides = [1, 1]} : vector<16x8xf32> to vector<8x8xf32>
    %550 = vector.extract_strided_slice %547 {offsets = [0, 0], sizes = [8, 8], strides = [1, 1]} : vector<16x8xf32> to vector<8x8xf32>
    %cst_212 = arith.constant dense<0.000000e+00> : vector<8x8xf32>
    %551 = tpu.matmul %548, %549, %cst_212 {dimension_numbers = #tpu.dot_dimension_numbers<[1], [1], [0], [0], [0, 0, 1, 0], [], []>} : vector<8x8xf32>, vector<8x8xf32>, vector<8x8xf32> -> vector<8x8xf32>
    %cst_213 = arith.constant 0.353553385 : f32
    %552 = vector.broadcast %cst_213 : f32 to vector<8x8xf32>
    %553 = arith.mulf %551, %552 : vector<8x8xf32>
    %554 = arith.addf %553, %16 : vector<8x8xf32>
    %cst_214 = arith.constant dense<0xFF800000> : vector<8xf32>
    %555 = vector.multi_reduction <maximumf>, %554, %cst_214 [1] : vector<8x8xf32> to vector<8xf32>
    %556 = vector.shape_cast %555 : vector<8xf32> to vector<8x1xf32>
    %557 = vector.broadcast %556 : vector<8x1xf32> to vector<8x8xf32>
    %558 = arith.subf %554, %557 : vector<8x8xf32>
    %559 = math.exp %558 : vector<8x8xf32>
    %cst_215 = arith.constant dense<0.000000e+00> : vector<8xf32>
    %560 = vector.multi_reduction <add>, %559, %cst_215 [1] : vector<8x8xf32> to vector<8xf32>
    %561 = vector.shape_cast %560 : vector<8xf32> to vector<8x1xf32>
    %562 = vector.broadcast %561 : vector<8x1xf32> to vector<8x8xf32>
    %563 = arith.divf %559, %562 : vector<8x8xf32>
    %cst_216 = arith.constant dense<0.000000e+00> : vector<8x8xf32>
    %564 = tpu.matmul %563, %550, %cst_216 {dimension_numbers = #tpu.dot_dimension_numbers<[1], [0], [0], [1], [0, 0, 1, 1], [], []>} : vector<8x8xf32>, vector<8x8xf32>, vector<8x8xf32> -> vector<8x8xf32>
    %565 = vector.extract_strided_slice %545 {offsets = [8, 0], sizes = [8, 8], strides = [1, 1]} : vector<16x8xf32> to vector<8x8xf32>
    %566 = vector.extract_strided_slice %546 {offsets = [8, 0], sizes = [8, 8], strides = [1, 1]} : vector<16x8xf32> to vector<8x8xf32>
    %567 = vector.extract_strided_slice %547 {offsets = [8, 0], sizes = [8, 8], strides = [1, 1]} : vector<16x8xf32> to vector<8x8xf32>
    %cst_217 = arith.constant dense<0.000000e+00> : vector<8x8xf32>
    %568 = tpu.matmul %565, %566, %cst_217 {dimension_numbers = #tpu.dot_dimension_numbers<[1], [1], [0], [0], [0, 0, 1, 0], [], []>} : vector<8x8xf32>, vector<8x8xf32>, vector<8x8xf32> -> vector<8x8xf32>
    %cst_218 = arith.constant 0.353553385 : f32
    %569 = vector.broadcast %cst_218 : f32 to vector<8x8xf32>
    %570 = arith.mulf %568, %569 : vector<8x8xf32>
    %571 = arith.addf %570, %16 : vector<8x8xf32>
    %cst_219 = arith.constant dense<0xFF800000> : vector<8xf32>
    %572 = vector.multi_reduction <maximumf>, %571, %cst_219 [1] : vector<8x8xf32> to vector<8xf32>
    %573 = vector.shape_cast %572 : vector<8xf32> to vector<8x1xf32>
    %574 = vector.broadcast %573 : vector<8x1xf32> to vector<8x8xf32>
    %575 = arith.subf %571, %574 : vector<8x8xf32>
    %576 = math.exp %575 : vector<8x8xf32>
    %cst_220 = arith.constant dense<0.000000e+00> : vector<8xf32>
    %577 = vector.multi_reduction <add>, %576, %cst_220 [1] : vector<8x8xf32> to vector<8xf32>
    %578 = vector.shape_cast %577 : vector<8xf32> to vector<8x1xf32>
    %579 = vector.broadcast %578 : vector<8x1xf32> to vector<8x8xf32>
    %580 = arith.divf %576, %579 : vector<8x8xf32>
    %cst_221 = arith.constant dense<0.000000e+00> : vector<8x8xf32>
    %581 = tpu.matmul %580, %567, %cst_221 {dimension_numbers = #tpu.dot_dimension_numbers<[1], [0], [0], [1], [0, 0, 1, 1], [], []>} : vector<8x8xf32>, vector<8x8xf32>, vector<8x8xf32> -> vector<8x8xf32>
    %582 = tpu.concatenate %564, %581 in 0 : vector<8x8xf32>, vector<8x8xf32> -> vector<16x8xf32>
    %583 = vector.extract_strided_slice %500 {offsets = [8, 0], sizes = [8, 32], strides = [1, 1]} : vector<32x32xf32> to vector<8x32xf32>
    %cst_222 = arith.constant dense<0.000000e+00> : vector<16x32xf32>
    %584 = tpu.matmul %582, %583, %cst_222 {dimension_numbers = #tpu.dot_dimension_numbers<[1], [0], [0], [1], [0, 0, 1, 1], [], []>} : vector<16x8xf32>, vector<8x32xf32>, vector<16x32xf32> -> vector<16x32xf32>
    %585 = arith.addf %544, %584 : vector<16x32xf32>
    %586 = vector.extract_strided_slice %496 {offsets = [0, 16], sizes = [16, 8], strides = [1, 1]} : vector<16x32xf32> to vector<16x8xf32>
    %587 = vector.extract_strided_slice %497 {offsets = [0, 16], sizes = [16, 8], strides = [1, 1]} : vector<16x32xf32> to vector<16x8xf32>
    %588 = vector.extract_strided_slice %498 {offsets = [0, 16], sizes = [16, 8], strides = [1, 1]} : vector<16x32xf32> to vector<16x8xf32>
    %589 = vector.extract_strided_slice %586 {offsets = [0, 0], sizes = [8, 8], strides = [1, 1]} : vector<16x8xf32> to vector<8x8xf32>
    %590 = vector.extract_strided_slice %587 {offsets = [0, 0], sizes = [8, 8], strides = [1, 1]} : vector<16x8xf32> to vector<8x8xf32>
    %591 = vector.extract_strided_slice %588 {offsets = [0, 0], sizes = [8, 8], strides = [1, 1]} : vector<16x8xf32> to vector<8x8xf32>
    %cst_223 = arith.constant dense<0.000000e+00> : vector<8x8xf32>
    %592 = tpu.matmul %589, %590, %cst_223 {dimension_numbers = #tpu.dot_dimension_numbers<[1], [1], [0], [0], [0, 0, 1, 0], [], []>} : vector<8x8xf32>, vector<8x8xf32>, vector<8x8xf32> -> vector<8x8xf32>
    %cst_224 = arith.constant 0.353553385 : f32
    %593 = vector.broadcast %cst_224 : f32 to vector<8x8xf32>
    %594 = arith.mulf %592, %593 : vector<8x8xf32>
    %595 = arith.addf %594, %16 : vector<8x8xf32>
    %cst_225 = arith.constant dense<0xFF800000> : vector<8xf32>
    %596 = vector.multi_reduction <maximumf>, %595, %cst_225 [1] : vector<8x8xf32> to vector<8xf32>
    %597 = vector.shape_cast %596 : vector<8xf32> to vector<8x1xf32>
    %598 = vector.broadcast %597 : vector<8x1xf32> to vector<8x8xf32>
    %599 = arith.subf %595, %598 : vector<8x8xf32>
    %600 = math.exp %599 : vector<8x8xf32>
    %cst_226 = arith.constant dense<0.000000e+00> : vector<8xf32>
    %601 = vector.multi_reduction <add>, %600, %cst_226 [1] : vector<8x8xf32> to vector<8xf32>
    %602 = vector.shape_cast %601 : vector<8xf32> to vector<8x1xf32>
    %603 = vector.broadcast %602 : vector<8x1xf32> to vector<8x8xf32>
    %604 = arith.divf %600, %603 : vector<8x8xf32>
    %cst_227 = arith.constant dense<0.000000e+00> : vector<8x8xf32>
    %605 = tpu.matmul %604, %591, %cst_227 {dimension_numbers = #tpu.dot_dimension_numbers<[1], [0], [0], [1], [0, 0, 1, 1], [], []>} : vector<8x8xf32>, vector<8x8xf32>, vector<8x8xf32> -> vector<8x8xf32>
    %606 = vector.extract_strided_slice %586 {offsets = [8, 0], sizes = [8, 8], strides = [1, 1]} : vector<16x8xf32> to vector<8x8xf32>
    %607 = vector.extract_strided_slice %587 {offsets = [8, 0], sizes = [8, 8], strides = [1, 1]} : vector<16x8xf32> to vector<8x8xf32>
    %608 = vector.extract_strided_slice %588 {offsets = [8, 0], sizes = [8, 8], strides = [1, 1]} : vector<16x8xf32> to vector<8x8xf32>
    %cst_228 = arith.constant dense<0.000000e+00> : vector<8x8xf32>
    %609 = tpu.matmul %606, %607, %cst_228 {dimension_numbers = #tpu.dot_dimension_numbers<[1], [1], [0], [0], [0, 0, 1, 0], [], []>} : vector<8x8xf32>, vector<8x8xf32>, vector<8x8xf32> -> vector<8x8xf32>
    %cst_229 = arith.constant 0.353553385 : f32
    %610 = vector.broadcast %cst_229 : f32 to vector<8x8xf32>
    %611 = arith.mulf %609, %610 : vector<8x8xf32>
    %612 = arith.addf %611, %16 : vector<8x8xf32>
    %cst_230 = arith.constant dense<0xFF800000> : vector<8xf32>
    %613 = vector.multi_reduction <maximumf>, %612, %cst_230 [1] : vector<8x8xf32> to vector<8xf32>
    %614 = vector.shape_cast %613 : vector<8xf32> to vector<8x1xf32>
    %615 = vector.broadcast %614 : vector<8x1xf32> to vector<8x8xf32>
    %616 = arith.subf %612, %615 : vector<8x8xf32>
    %617 = math.exp %616 : vector<8x8xf32>
    %cst_231 = arith.constant dense<0.000000e+00> : vector<8xf32>
    %618 = vector.multi_reduction <add>, %617, %cst_231 [1] : vector<8x8xf32> to vector<8xf32>
    %619 = vector.shape_cast %618 : vector<8xf32> to vector<8x1xf32>
    %620 = vector.broadcast %619 : vector<8x1xf32> to vector<8x8xf32>
    %621 = arith.divf %617, %620 : vector<8x8xf32>
    %cst_232 = arith.constant dense<0.000000e+00> : vector<8x8xf32>
    %622 = tpu.matmul %621, %608, %cst_232 {dimension_numbers = #tpu.dot_dimension_numbers<[1], [0], [0], [1], [0, 0, 1, 1], [], []>} : vector<8x8xf32>, vector<8x8xf32>, vector<8x8xf32> -> vector<8x8xf32>
    %623 = tpu.concatenate %605, %622 in 0 : vector<8x8xf32>, vector<8x8xf32> -> vector<16x8xf32>
    %624 = vector.extract_strided_slice %500 {offsets = [16, 0], sizes = [8, 32], strides = [1, 1]} : vector<32x32xf32> to vector<8x32xf32>
    %cst_233 = arith.constant dense<0.000000e+00> : vector<16x32xf32>
    %625 = tpu.matmul %623, %624, %cst_233 {dimension_numbers = #tpu.dot_dimension_numbers<[1], [0], [0], [1], [0, 0, 1, 1], [], []>} : vector<16x8xf32>, vector<8x32xf32>, vector<16x32xf32> -> vector<16x32xf32>
    %626 = arith.addf %585, %625 : vector<16x32xf32>
    %627 = vector.extract_strided_slice %496 {offsets = [0, 24], sizes = [16, 8], strides = [1, 1]} : vector<16x32xf32> to vector<16x8xf32>
    %628 = vector.extract_strided_slice %497 {offsets = [0, 24], sizes = [16, 8], strides = [1, 1]} : vector<16x32xf32> to vector<16x8xf32>
    %629 = vector.extract_strided_slice %498 {offsets = [0, 24], sizes = [16, 8], strides = [1, 1]} : vector<16x32xf32> to vector<16x8xf32>
    %630 = vector.extract_strided_slice %627 {offsets = [0, 0], sizes = [8, 8], strides = [1, 1]} : vector<16x8xf32> to vector<8x8xf32>
    %631 = vector.extract_strided_slice %628 {offsets = [0, 0], sizes = [8, 8], strides = [1, 1]} : vector<16x8xf32> to vector<8x8xf32>
    %632 = vector.extract_strided_slice %629 {offsets = [0, 0], sizes = [8, 8], strides = [1, 1]} : vector<16x8xf32> to vector<8x8xf32>
    %cst_234 = arith.constant dense<0.000000e+00> : vector<8x8xf32>
    %633 = tpu.matmul %630, %631, %cst_234 {dimension_numbers = #tpu.dot_dimension_numbers<[1], [1], [0], [0], [0, 0, 1, 0], [], []>} : vector<8x8xf32>, vector<8x8xf32>, vector<8x8xf32> -> vector<8x8xf32>
    %cst_235 = arith.constant 0.353553385 : f32
    %634 = vector.broadcast %cst_235 : f32 to vector<8x8xf32>
    %635 = arith.mulf %633, %634 : vector<8x8xf32>
    %636 = arith.addf %635, %16 : vector<8x8xf32>
    %cst_236 = arith.constant dense<0xFF800000> : vector<8xf32>
    %637 = vector.multi_reduction <maximumf>, %636, %cst_236 [1] : vector<8x8xf32> to vector<8xf32>
    %638 = vector.shape_cast %637 : vector<8xf32> to vector<8x1xf32>
    %639 = vector.broadcast %638 : vector<8x1xf32> to vector<8x8xf32>
    %640 = arith.subf %636, %639 : vector<8x8xf32>
    %641 = math.exp %640 : vector<8x8xf32>
    %cst_237 = arith.constant dense<0.000000e+00> : vector<8xf32>
    %642 = vector.multi_reduction <add>, %641, %cst_237 [1] : vector<8x8xf32> to vector<8xf32>
    %643 = vector.shape_cast %642 : vector<8xf32> to vector<8x1xf32>
    %644 = vector.broadcast %643 : vector<8x1xf32> to vector<8x8xf32>
    %645 = arith.divf %641, %644 : vector<8x8xf32>
    %cst_238 = arith.constant dense<0.000000e+00> : vector<8x8xf32>
    %646 = tpu.matmul %645, %632, %cst_238 {dimension_numbers = #tpu.dot_dimension_numbers<[1], [0], [0], [1], [0, 0, 1, 1], [], []>} : vector<8x8xf32>, vector<8x8xf32>, vector<8x8xf32> -> vector<8x8xf32>
    %647 = vector.extract_strided_slice %627 {offsets = [8, 0], sizes = [8, 8], strides = [1, 1]} : vector<16x8xf32> to vector<8x8xf32>
    %648 = vector.extract_strided_slice %628 {offsets = [8, 0], sizes = [8, 8], strides = [1, 1]} : vector<16x8xf32> to vector<8x8xf32>
    %649 = vector.extract_strided_slice %629 {offsets = [8, 0], sizes = [8, 8], strides = [1, 1]} : vector<16x8xf32> to vector<8x8xf32>
    %cst_239 = arith.constant dense<0.000000e+00> : vector<8x8xf32>
    %650 = tpu.matmul %647, %648, %cst_239 {dimension_numbers = #tpu.dot_dimension_numbers<[1], [1], [0], [0], [0, 0, 1, 0], [], []>} : vector<8x8xf32>, vector<8x8xf32>, vector<8x8xf32> -> vector<8x8xf32>
    %cst_240 = arith.constant 0.353553385 : f32
    %651 = vector.broadcast %cst_240 : f32 to vector<8x8xf32>
    %652 = arith.mulf %650, %651 : vector<8x8xf32>
    %653 = arith.addf %652, %16 : vector<8x8xf32>
    %cst_241 = arith.constant dense<0xFF800000> : vector<8xf32>
    %654 = vector.multi_reduction <maximumf>, %653, %cst_241 [1] : vector<8x8xf32> to vector<8xf32>
    %655 = vector.shape_cast %654 : vector<8xf32> to vector<8x1xf32>
    %656 = vector.broadcast %655 : vector<8x1xf32> to vector<8x8xf32>
    %657 = arith.subf %653, %656 : vector<8x8xf32>
    %658 = math.exp %657 : vector<8x8xf32>
    %cst_242 = arith.constant dense<0.000000e+00> : vector<8xf32>
    %659 = vector.multi_reduction <add>, %658, %cst_242 [1] : vector<8x8xf32> to vector<8xf32>
    %660 = vector.shape_cast %659 : vector<8xf32> to vector<8x1xf32>
    %661 = vector.broadcast %660 : vector<8x1xf32> to vector<8x8xf32>
    %662 = arith.divf %658, %661 : vector<8x8xf32>
    %cst_243 = arith.constant dense<0.000000e+00> : vector<8x8xf32>
    %663 = tpu.matmul %662, %649, %cst_243 {dimension_numbers = #tpu.dot_dimension_numbers<[1], [0], [0], [1], [0, 0, 1, 1], [], []>} : vector<8x8xf32>, vector<8x8xf32>, vector<8x8xf32> -> vector<8x8xf32>
    %664 = tpu.concatenate %646, %663 in 0 : vector<8x8xf32>, vector<8x8xf32> -> vector<16x8xf32>
    %665 = vector.extract_strided_slice %500 {offsets = [24, 0], sizes = [8, 32], strides = [1, 1]} : vector<32x32xf32> to vector<8x32xf32>
    %cst_244 = arith.constant dense<0.000000e+00> : vector<16x32xf32>
    %666 = tpu.matmul %664, %665, %cst_244 {dimension_numbers = #tpu.dot_dimension_numbers<[1], [0], [0], [1], [0, 0, 1, 1], [], []>} : vector<16x8xf32>, vector<8x32xf32>, vector<16x32xf32> -> vector<16x32xf32>
    %667 = arith.addf %626, %666 : vector<16x32xf32>
    %668 = vector.broadcast %502 : vector<1x32xf32> to vector<16x32xf32>
    %669 = arith.addf %667, %668 : vector<16x32xf32>
    %670 = arith.addf %669, %487 : vector<16x32xf32>
    %c1_245 = arith.constant 1 : index
    %c0_246 = arith.constant 0 : index
    %c0_247 = arith.constant 0 : index
    %671 = vector.load %arg21[%c1_245, %c0_246, %c0_247] : memref<2x1x32xf32, #tpu.memory_space<vmem>>, vector<1x1x32xf32>
    %672 = vector.shape_cast %671 : vector<1x1x32xf32> to vector<1x32xf32>
    %c1_248 = arith.constant 1 : index
    %c0_249 = arith.constant 0 : index
    %c0_250 = arith.constant 0 : index
    %673 = vector.load %arg22[%c1_248, %c0_249, %c0_250] : memref<2x1x32xf32, #tpu.memory_space<vmem>>, vector<1x1x32xf32>
    %674 = vector.shape_cast %673 : vector<1x1x32xf32> to vector<1x32xf32>
    %cst_251 = arith.constant dense<0.000000e+00> : vector<16xf32>
    %675 = vector.multi_reduction <add>, %670, %cst_251 [1] : vector<16x32xf32> to vector<16xf32>
    %676 = vector.shape_cast %675 : vector<16xf32> to vector<16x1xf32>
    %cst_252 = arith.constant 3.200000e+01 : f32
    %677 = vector.broadcast %cst_252 : f32 to vector<16x1xf32>
    %678 = arith.divf %676, %677 : vector<16x1xf32>
    %679 = vector.broadcast %678 : vector<16x1xf32> to vector<16x32xf32>
    %680 = arith.subf %670, %679 : vector<16x32xf32>
    %681 = arith.mulf %680, %680 : vector<16x32xf32>
    %cst_253 = arith.constant dense<0.000000e+00> : vector<16xf32>
    %682 = vector.multi_reduction <add>, %681, %cst_253 [1] : vector<16x32xf32> to vector<16xf32>
    %683 = vector.shape_cast %682 : vector<16xf32> to vector<16x1xf32>
    %cst_254 = arith.constant 3.200000e+01 : f32
    %684 = vector.broadcast %cst_254 : f32 to vector<16x1xf32>
    %685 = arith.divf %683, %684 : vector<16x1xf32>
    %cst_255 = arith.constant 9.99999974E-6 : f32
    %686 = vector.broadcast %cst_255 : f32 to vector<16x1xf32>
    %687 = arith.addf %685, %686 : vector<16x1xf32>
    %688 = math.rsqrt %687 : vector<16x1xf32>
    %689 = vector.broadcast %688 : vector<16x1xf32> to vector<16x32xf32>
    %690 = arith.mulf %680, %689 : vector<16x32xf32>
    %691 = vector.broadcast %672 : vector<1x32xf32> to vector<16x32xf32>
    %692 = arith.mulf %690, %691 : vector<16x32xf32>
    %693 = vector.broadcast %674 : vector<1x32xf32> to vector<16x32xf32>
    %694 = arith.addf %692, %693 : vector<16x32xf32>
    %695 = arith.truncf %694 : vector<16x32xf32> to vector<16x32xbf16>
    %c1_256 = arith.constant 1 : index
    %c0_257 = arith.constant 0 : index
    %c0_258 = arith.constant 0 : index
    %696 = vector.load %arg11[%c1_256, %c0_257, %c0_258] : memref<2x32x32xbf16, #tpu.memory_space<vmem>>, vector<1x32x32xbf16>
    %697 = vector.shape_cast %696 : vector<1x32x32xbf16> to vector<32x32xbf16>
    %cst_259 = arith.constant dense<0.000000e+00> : vector<16x32xf32>
    %698 = tpu.matmul %695, %697, %cst_259 {dimension_numbers = #tpu.dot_dimension_numbers<[1], [0], [0], [1], [0, 0, 1, 1], [], []>} : vector<16x32xbf16>, vector<32x32xbf16>, vector<16x32xf32> -> vector<16x32xf32>
    %c1_260 = arith.constant 1 : index
    %c0_261 = arith.constant 0 : index
    %c0_262 = arith.constant 0 : index
    %699 = vector.load %arg12[%c1_260, %c0_261, %c0_262] : memref<2x1x32xf32, #tpu.memory_space<vmem>>, vector<1x1x32xf32>
    %700 = vector.shape_cast %699 : vector<1x1x32xf32> to vector<1x32xf32>
    %701 = vector.broadcast %700 : vector<1x32xf32> to vector<16x32xf32>
    %702 = arith.addf %698, %701 : vector<16x32xf32>
    %703 = arith.truncf %17 : vector<16x32xf32> to vector<16x32xbf16>
    %c1_263 = arith.constant 1 : index
    %c0_264 = arith.constant 0 : index
    %c0_265 = arith.constant 0 : index
    %704 = vector.load %arg13[%c1_263, %c0_264, %c0_265] : memref<2x32x64xbf16, #tpu.memory_space<vmem>>, vector<1x32x64xbf16>
    %705 = vector.shape_cast %704 : vector<1x32x64xbf16> to vector<32x64xbf16>
    %cst_266 = arith.constant dense<0.000000e+00> : vector<16x64xf32>
    %706 = tpu.matmul %703, %705, %cst_266 {dimension_numbers = #tpu.dot_dimension_numbers<[1], [0], [0], [1], [0, 0, 1, 1], [], []>} : vector<16x32xbf16>, vector<32x64xbf16>, vector<16x64xf32> -> vector<16x64xf32>
    %c1_267 = arith.constant 1 : index
    %c0_268 = arith.constant 0 : index
    %c0_269 = arith.constant 0 : index
    %707 = vector.load %arg14[%c1_267, %c0_268, %c0_269] : memref<2x1x64xf32, #tpu.memory_space<vmem>>, vector<1x1x64xf32>
    %708 = vector.shape_cast %707 : vector<1x1x64xf32> to vector<1x64xf32>
    %709 = vector.broadcast %708 : vector<1x64xf32> to vector<16x64xf32>
    %710 = arith.addf %706, %709 : vector<16x64xf32>
    %711 = vector.extract_strided_slice %710 {offsets = [0, 0], sizes = [16, 32], strides = [1, 1]} : vector<16x64xf32> to vector<16x32xf32>
    %712 = vector.extract_strided_slice %710 {offsets = [0, 32], sizes = [16, 32], strides = [1, 1]} : vector<16x64xf32> to vector<16x32xf32>
    %c1_270 = arith.constant 1 : index
    %c0_271 = arith.constant 0 : index
    %c0_272 = arith.constant 0 : index
    %713 = vector.load %arg15[%c1_270, %c0_271, %c0_272] : memref<2x32x32xf32, #tpu.memory_space<vmem>>, vector<1x32x32xf32>
    %714 = vector.shape_cast %713 : vector<1x32x32xf32> to vector<32x32xf32>
    %c1_273 = arith.constant 1 : index
    %c0_274 = arith.constant 0 : index
    %c0_275 = arith.constant 0 : index
    %715 = vector.load %arg16[%c1_273, %c0_274, %c0_275] : memref<2x1x32xf32, #tpu.memory_space<vmem>>, vector<1x1x32xf32>
    %716 = vector.shape_cast %715 : vector<1x1x32xf32> to vector<1x32xf32>
    %cst_276 = arith.constant 0.000000e+00 : f32
    %717 = vector.broadcast %cst_276 : f32 to vector<16x32xf32>
    %718 = vector.extract_strided_slice %702 {offsets = [0, 0], sizes = [16, 8], strides = [1, 1]} : vector<16x32xf32> to vector<16x8xf32>
    %719 = vector.extract_strided_slice %711 {offsets = [0, 0], sizes = [16, 8], strides = [1, 1]} : vector<16x32xf32> to vector<16x8xf32>
    %720 = vector.extract_strided_slice %712 {offsets = [0, 0], sizes = [16, 8], strides = [1, 1]} : vector<16x32xf32> to vector<16x8xf32>
    %721 = vector.extract_strided_slice %718 {offsets = [0, 0], sizes = [8, 8], strides = [1, 1]} : vector<16x8xf32> to vector<8x8xf32>
    %722 = vector.extract_strided_slice %719 {offsets = [0, 0], sizes = [8, 8], strides = [1, 1]} : vector<16x8xf32> to vector<8x8xf32>
    %723 = vector.extract_strided_slice %720 {offsets = [0, 0], sizes = [8, 8], strides = [1, 1]} : vector<16x8xf32> to vector<8x8xf32>
    %cst_277 = arith.constant dense<0.000000e+00> : vector<8x8xf32>
    %724 = tpu.matmul %721, %722, %cst_277 {dimension_numbers = #tpu.dot_dimension_numbers<[1], [1], [0], [0], [0, 0, 1, 0], [], []>} : vector<8x8xf32>, vector<8x8xf32>, vector<8x8xf32> -> vector<8x8xf32>
    %cst_278 = arith.constant 0.353553385 : f32
    %725 = vector.broadcast %cst_278 : f32 to vector<8x8xf32>
    %726 = arith.mulf %724, %725 : vector<8x8xf32>
    %727 = arith.addf %726, %23 : vector<8x8xf32>
    %cst_279 = arith.constant dense<0xFF800000> : vector<8xf32>
    %728 = vector.multi_reduction <maximumf>, %727, %cst_279 [1] : vector<8x8xf32> to vector<8xf32>
    %729 = vector.shape_cast %728 : vector<8xf32> to vector<8x1xf32>
    %730 = vector.broadcast %729 : vector<8x1xf32> to vector<8x8xf32>
    %731 = arith.subf %727, %730 : vector<8x8xf32>
    %732 = math.exp %731 : vector<8x8xf32>
    %cst_280 = arith.constant dense<0.000000e+00> : vector<8xf32>
    %733 = vector.multi_reduction <add>, %732, %cst_280 [1] : vector<8x8xf32> to vector<8xf32>
    %734 = vector.shape_cast %733 : vector<8xf32> to vector<8x1xf32>
    %735 = vector.broadcast %734 : vector<8x1xf32> to vector<8x8xf32>
    %736 = arith.divf %732, %735 : vector<8x8xf32>
    %cst_281 = arith.constant dense<0.000000e+00> : vector<8x8xf32>
    %737 = tpu.matmul %736, %723, %cst_281 {dimension_numbers = #tpu.dot_dimension_numbers<[1], [0], [0], [1], [0, 0, 1, 1], [], []>} : vector<8x8xf32>, vector<8x8xf32>, vector<8x8xf32> -> vector<8x8xf32>
    %738 = vector.extract_strided_slice %718 {offsets = [8, 0], sizes = [8, 8], strides = [1, 1]} : vector<16x8xf32> to vector<8x8xf32>
    %739 = vector.extract_strided_slice %719 {offsets = [8, 0], sizes = [8, 8], strides = [1, 1]} : vector<16x8xf32> to vector<8x8xf32>
    %740 = vector.extract_strided_slice %720 {offsets = [8, 0], sizes = [8, 8], strides = [1, 1]} : vector<16x8xf32> to vector<8x8xf32>
    %cst_282 = arith.constant dense<0.000000e+00> : vector<8x8xf32>
    %741 = tpu.matmul %738, %739, %cst_282 {dimension_numbers = #tpu.dot_dimension_numbers<[1], [1], [0], [0], [0, 0, 1, 0], [], []>} : vector<8x8xf32>, vector<8x8xf32>, vector<8x8xf32> -> vector<8x8xf32>
    %cst_283 = arith.constant 0.353553385 : f32
    %742 = vector.broadcast %cst_283 : f32 to vector<8x8xf32>
    %743 = arith.mulf %741, %742 : vector<8x8xf32>
    %744 = arith.addf %743, %23 : vector<8x8xf32>
    %cst_284 = arith.constant dense<0xFF800000> : vector<8xf32>
    %745 = vector.multi_reduction <maximumf>, %744, %cst_284 [1] : vector<8x8xf32> to vector<8xf32>
    %746 = vector.shape_cast %745 : vector<8xf32> to vector<8x1xf32>
    %747 = vector.broadcast %746 : vector<8x1xf32> to vector<8x8xf32>
    %748 = arith.subf %744, %747 : vector<8x8xf32>
    %749 = math.exp %748 : vector<8x8xf32>
    %cst_285 = arith.constant dense<0.000000e+00> : vector<8xf32>
    %750 = vector.multi_reduction <add>, %749, %cst_285 [1] : vector<8x8xf32> to vector<8xf32>
    %751 = vector.shape_cast %750 : vector<8xf32> to vector<8x1xf32>
    %752 = vector.broadcast %751 : vector<8x1xf32> to vector<8x8xf32>
    %753 = arith.divf %749, %752 : vector<8x8xf32>
    %cst_286 = arith.constant dense<0.000000e+00> : vector<8x8xf32>
    %754 = tpu.matmul %753, %740, %cst_286 {dimension_numbers = #tpu.dot_dimension_numbers<[1], [0], [0], [1], [0, 0, 1, 1], [], []>} : vector<8x8xf32>, vector<8x8xf32>, vector<8x8xf32> -> vector<8x8xf32>
    %755 = tpu.concatenate %737, %754 in 0 : vector<8x8xf32>, vector<8x8xf32> -> vector<16x8xf32>
    %756 = vector.extract_strided_slice %714 {offsets = [0, 0], sizes = [8, 32], strides = [1, 1]} : vector<32x32xf32> to vector<8x32xf32>
    %cst_287 = arith.constant dense<0.000000e+00> : vector<16x32xf32>
    %757 = tpu.matmul %755, %756, %cst_287 {dimension_numbers = #tpu.dot_dimension_numbers<[1], [0], [0], [1], [0, 0, 1, 1], [], []>} : vector<16x8xf32>, vector<8x32xf32>, vector<16x32xf32> -> vector<16x32xf32>
    %758 = arith.addf %717, %757 : vector<16x32xf32>
    %759 = vector.extract_strided_slice %702 {offsets = [0, 8], sizes = [16, 8], strides = [1, 1]} : vector<16x32xf32> to vector<16x8xf32>
    %760 = vector.extract_strided_slice %711 {offsets = [0, 8], sizes = [16, 8], strides = [1, 1]} : vector<16x32xf32> to vector<16x8xf32>
    %761 = vector.extract_strided_slice %712 {offsets = [0, 8], sizes = [16, 8], strides = [1, 1]} : vector<16x32xf32> to vector<16x8xf32>
    %762 = vector.extract_strided_slice %759 {offsets = [0, 0], sizes = [8, 8], strides = [1, 1]} : vector<16x8xf32> to vector<8x8xf32>
    %763 = vector.extract_strided_slice %760 {offsets = [0, 0], sizes = [8, 8], strides = [1, 1]} : vector<16x8xf32> to vector<8x8xf32>
    %764 = vector.extract_strided_slice %761 {offsets = [0, 0], sizes = [8, 8], strides = [1, 1]} : vector<16x8xf32> to vector<8x8xf32>
    %cst_288 = arith.constant dense<0.000000e+00> : vector<8x8xf32>
    %765 = tpu.matmul %762, %763, %cst_288 {dimension_numbers = #tpu.dot_dimension_numbers<[1], [1], [0], [0], [0, 0, 1, 0], [], []>} : vector<8x8xf32>, vector<8x8xf32>, vector<8x8xf32> -> vector<8x8xf32>
    %cst_289 = arith.constant 0.353553385 : f32
    %766 = vector.broadcast %cst_289 : f32 to vector<8x8xf32>
    %767 = arith.mulf %765, %766 : vector<8x8xf32>
    %768 = arith.addf %767, %23 : vector<8x8xf32>
    %cst_290 = arith.constant dense<0xFF800000> : vector<8xf32>
    %769 = vector.multi_reduction <maximumf>, %768, %cst_290 [1] : vector<8x8xf32> to vector<8xf32>
    %770 = vector.shape_cast %769 : vector<8xf32> to vector<8x1xf32>
    %771 = vector.broadcast %770 : vector<8x1xf32> to vector<8x8xf32>
    %772 = arith.subf %768, %771 : vector<8x8xf32>
    %773 = math.exp %772 : vector<8x8xf32>
    %cst_291 = arith.constant dense<0.000000e+00> : vector<8xf32>
    %774 = vector.multi_reduction <add>, %773, %cst_291 [1] : vector<8x8xf32> to vector<8xf32>
    %775 = vector.shape_cast %774 : vector<8xf32> to vector<8x1xf32>
    %776 = vector.broadcast %775 : vector<8x1xf32> to vector<8x8xf32>
    %777 = arith.divf %773, %776 : vector<8x8xf32>
    %cst_292 = arith.constant dense<0.000000e+00> : vector<8x8xf32>
    %778 = tpu.matmul %777, %764, %cst_292 {dimension_numbers = #tpu.dot_dimension_numbers<[1], [0], [0], [1], [0, 0, 1, 1], [], []>} : vector<8x8xf32>, vector<8x8xf32>, vector<8x8xf32> -> vector<8x8xf32>
    %779 = vector.extract_strided_slice %759 {offsets = [8, 0], sizes = [8, 8], strides = [1, 1]} : vector<16x8xf32> to vector<8x8xf32>
    %780 = vector.extract_strided_slice %760 {offsets = [8, 0], sizes = [8, 8], strides = [1, 1]} : vector<16x8xf32> to vector<8x8xf32>
    %781 = vector.extract_strided_slice %761 {offsets = [8, 0], sizes = [8, 8], strides = [1, 1]} : vector<16x8xf32> to vector<8x8xf32>
    %cst_293 = arith.constant dense<0.000000e+00> : vector<8x8xf32>
    %782 = tpu.matmul %779, %780, %cst_293 {dimension_numbers = #tpu.dot_dimension_numbers<[1], [1], [0], [0], [0, 0, 1, 0], [], []>} : vector<8x8xf32>, vector<8x8xf32>, vector<8x8xf32> -> vector<8x8xf32>
    %cst_294 = arith.constant 0.353553385 : f32
    %783 = vector.broadcast %cst_294 : f32 to vector<8x8xf32>
    %784 = arith.mulf %782, %783 : vector<8x8xf32>
    %785 = arith.addf %784, %23 : vector<8x8xf32>
    %cst_295 = arith.constant dense<0xFF800000> : vector<8xf32>
    %786 = vector.multi_reduction <maximumf>, %785, %cst_295 [1] : vector<8x8xf32> to vector<8xf32>
    %787 = vector.shape_cast %786 : vector<8xf32> to vector<8x1xf32>
    %788 = vector.broadcast %787 : vector<8x1xf32> to vector<8x8xf32>
    %789 = arith.subf %785, %788 : vector<8x8xf32>
    %790 = math.exp %789 : vector<8x8xf32>
    %cst_296 = arith.constant dense<0.000000e+00> : vector<8xf32>
    %791 = vector.multi_reduction <add>, %790, %cst_296 [1] : vector<8x8xf32> to vector<8xf32>
    %792 = vector.shape_cast %791 : vector<8xf32> to vector<8x1xf32>
    %793 = vector.broadcast %792 : vector<8x1xf32> to vector<8x8xf32>
    %794 = arith.divf %790, %793 : vector<8x8xf32>
    %cst_297 = arith.constant dense<0.000000e+00> : vector<8x8xf32>
    %795 = tpu.matmul %794, %781, %cst_297 {dimension_numbers = #tpu.dot_dimension_numbers<[1], [0], [0], [1], [0, 0, 1, 1], [], []>} : vector<8x8xf32>, vector<8x8xf32>, vector<8x8xf32> -> vector<8x8xf32>
    %796 = tpu.concatenate %778, %795 in 0 : vector<8x8xf32>, vector<8x8xf32> -> vector<16x8xf32>
    %797 = vector.extract_strided_slice %714 {offsets = [8, 0], sizes = [8, 32], strides = [1, 1]} : vector<32x32xf32> to vector<8x32xf32>
    %cst_298 = arith.constant dense<0.000000e+00> : vector<16x32xf32>
    %798 = tpu.matmul %796, %797, %cst_298 {dimension_numbers = #tpu.dot_dimension_numbers<[1], [0], [0], [1], [0, 0, 1, 1], [], []>} : vector<16x8xf32>, vector<8x32xf32>, vector<16x32xf32> -> vector<16x32xf32>
    %799 = arith.addf %758, %798 : vector<16x32xf32>
    %800 = vector.extract_strided_slice %702 {offsets = [0, 16], sizes = [16, 8], strides = [1, 1]} : vector<16x32xf32> to vector<16x8xf32>
    %801 = vector.extract_strided_slice %711 {offsets = [0, 16], sizes = [16, 8], strides = [1, 1]} : vector<16x32xf32> to vector<16x8xf32>
    %802 = vector.extract_strided_slice %712 {offsets = [0, 16], sizes = [16, 8], strides = [1, 1]} : vector<16x32xf32> to vector<16x8xf32>
    %803 = vector.extract_strided_slice %800 {offsets = [0, 0], sizes = [8, 8], strides = [1, 1]} : vector<16x8xf32> to vector<8x8xf32>
    %804 = vector.extract_strided_slice %801 {offsets = [0, 0], sizes = [8, 8], strides = [1, 1]} : vector<16x8xf32> to vector<8x8xf32>
    %805 = vector.extract_strided_slice %802 {offsets = [0, 0], sizes = [8, 8], strides = [1, 1]} : vector<16x8xf32> to vector<8x8xf32>
    %cst_299 = arith.constant dense<0.000000e+00> : vector<8x8xf32>
    %806 = tpu.matmul %803, %804, %cst_299 {dimension_numbers = #tpu.dot_dimension_numbers<[1], [1], [0], [0], [0, 0, 1, 0], [], []>} : vector<8x8xf32>, vector<8x8xf32>, vector<8x8xf32> -> vector<8x8xf32>
    %cst_300 = arith.constant 0.353553385 : f32
    %807 = vector.broadcast %cst_300 : f32 to vector<8x8xf32>
    %808 = arith.mulf %806, %807 : vector<8x8xf32>
    %809 = arith.addf %808, %23 : vector<8x8xf32>
    %cst_301 = arith.constant dense<0xFF800000> : vector<8xf32>
    %810 = vector.multi_reduction <maximumf>, %809, %cst_301 [1] : vector<8x8xf32> to vector<8xf32>
    %811 = vector.shape_cast %810 : vector<8xf32> to vector<8x1xf32>
    %812 = vector.broadcast %811 : vector<8x1xf32> to vector<8x8xf32>
    %813 = arith.subf %809, %812 : vector<8x8xf32>
    %814 = math.exp %813 : vector<8x8xf32>
    %cst_302 = arith.constant dense<0.000000e+00> : vector<8xf32>
    %815 = vector.multi_reduction <add>, %814, %cst_302 [1] : vector<8x8xf32> to vector<8xf32>
    %816 = vector.shape_cast %815 : vector<8xf32> to vector<8x1xf32>
    %817 = vector.broadcast %816 : vector<8x1xf32> to vector<8x8xf32>
    %818 = arith.divf %814, %817 : vector<8x8xf32>
    %cst_303 = arith.constant dense<0.000000e+00> : vector<8x8xf32>
    %819 = tpu.matmul %818, %805, %cst_303 {dimension_numbers = #tpu.dot_dimension_numbers<[1], [0], [0], [1], [0, 0, 1, 1], [], []>} : vector<8x8xf32>, vector<8x8xf32>, vector<8x8xf32> -> vector<8x8xf32>
    %820 = vector.extract_strided_slice %800 {offsets = [8, 0], sizes = [8, 8], strides = [1, 1]} : vector<16x8xf32> to vector<8x8xf32>
    %821 = vector.extract_strided_slice %801 {offsets = [8, 0], sizes = [8, 8], strides = [1, 1]} : vector<16x8xf32> to vector<8x8xf32>
    %822 = vector.extract_strided_slice %802 {offsets = [8, 0], sizes = [8, 8], strides = [1, 1]} : vector<16x8xf32> to vector<8x8xf32>
    %cst_304 = arith.constant dense<0.000000e+00> : vector<8x8xf32>
    %823 = tpu.matmul %820, %821, %cst_304 {dimension_numbers = #tpu.dot_dimension_numbers<[1], [1], [0], [0], [0, 0, 1, 0], [], []>} : vector<8x8xf32>, vector<8x8xf32>, vector<8x8xf32> -> vector<8x8xf32>
    %cst_305 = arith.constant 0.353553385 : f32
    %824 = vector.broadcast %cst_305 : f32 to vector<8x8xf32>
    %825 = arith.mulf %823, %824 : vector<8x8xf32>
    %826 = arith.addf %825, %23 : vector<8x8xf32>
    %cst_306 = arith.constant dense<0xFF800000> : vector<8xf32>
    %827 = vector.multi_reduction <maximumf>, %826, %cst_306 [1] : vector<8x8xf32> to vector<8xf32>
    %828 = vector.shape_cast %827 : vector<8xf32> to vector<8x1xf32>
    %829 = vector.broadcast %828 : vector<8x1xf32> to vector<8x8xf32>
    %830 = arith.subf %826, %829 : vector<8x8xf32>
    %831 = math.exp %830 : vector<8x8xf32>
    %cst_307 = arith.constant dense<0.000000e+00> : vector<8xf32>
    %832 = vector.multi_reduction <add>, %831, %cst_307 [1] : vector<8x8xf32> to vector<8xf32>
    %833 = vector.shape_cast %832 : vector<8xf32> to vector<8x1xf32>
    %834 = vector.broadcast %833 : vector<8x1xf32> to vector<8x8xf32>
    %835 = arith.divf %831, %834 : vector<8x8xf32>
    %cst_308 = arith.constant dense<0.000000e+00> : vector<8x8xf32>
    %836 = tpu.matmul %835, %822, %cst_308 {dimension_numbers = #tpu.dot_dimension_numbers<[1], [0], [0], [1], [0, 0, 1, 1], [], []>} : vector<8x8xf32>, vector<8x8xf32>, vector<8x8xf32> -> vector<8x8xf32>
    %837 = tpu.concatenate %819, %836 in 0 : vector<8x8xf32>, vector<8x8xf32> -> vector<16x8xf32>
    %838 = vector.extract_strided_slice %714 {offsets = [16, 0], sizes = [8, 32], strides = [1, 1]} : vector<32x32xf32> to vector<8x32xf32>
    %cst_309 = arith.constant dense<0.000000e+00> : vector<16x32xf32>
    %839 = tpu.matmul %837, %838, %cst_309 {dimension_numbers = #tpu.dot_dimension_numbers<[1], [0], [0], [1], [0, 0, 1, 1], [], []>} : vector<16x8xf32>, vector<8x32xf32>, vector<16x32xf32> -> vector<16x32xf32>
    %840 = arith.addf %799, %839 : vector<16x32xf32>
    %841 = vector.extract_strided_slice %702 {offsets = [0, 24], sizes = [16, 8], strides = [1, 1]} : vector<16x32xf32> to vector<16x8xf32>
    %842 = vector.extract_strided_slice %711 {offsets = [0, 24], sizes = [16, 8], strides = [1, 1]} : vector<16x32xf32> to vector<16x8xf32>
    %843 = vector.extract_strided_slice %712 {offsets = [0, 24], sizes = [16, 8], strides = [1, 1]} : vector<16x32xf32> to vector<16x8xf32>
    %844 = vector.extract_strided_slice %841 {offsets = [0, 0], sizes = [8, 8], strides = [1, 1]} : vector<16x8xf32> to vector<8x8xf32>
    %845 = vector.extract_strided_slice %842 {offsets = [0, 0], sizes = [8, 8], strides = [1, 1]} : vector<16x8xf32> to vector<8x8xf32>
    %846 = vector.extract_strided_slice %843 {offsets = [0, 0], sizes = [8, 8], strides = [1, 1]} : vector<16x8xf32> to vector<8x8xf32>
    %cst_310 = arith.constant dense<0.000000e+00> : vector<8x8xf32>
    %847 = tpu.matmul %844, %845, %cst_310 {dimension_numbers = #tpu.dot_dimension_numbers<[1], [1], [0], [0], [0, 0, 1, 0], [], []>} : vector<8x8xf32>, vector<8x8xf32>, vector<8x8xf32> -> vector<8x8xf32>
    %cst_311 = arith.constant 0.353553385 : f32
    %848 = vector.broadcast %cst_311 : f32 to vector<8x8xf32>
    %849 = arith.mulf %847, %848 : vector<8x8xf32>
    %850 = arith.addf %849, %23 : vector<8x8xf32>
    %cst_312 = arith.constant dense<0xFF800000> : vector<8xf32>
    %851 = vector.multi_reduction <maximumf>, %850, %cst_312 [1] : vector<8x8xf32> to vector<8xf32>
    %852 = vector.shape_cast %851 : vector<8xf32> to vector<8x1xf32>
    %853 = vector.broadcast %852 : vector<8x1xf32> to vector<8x8xf32>
    %854 = arith.subf %850, %853 : vector<8x8xf32>
    %855 = math.exp %854 : vector<8x8xf32>
    %cst_313 = arith.constant dense<0.000000e+00> : vector<8xf32>
    %856 = vector.multi_reduction <add>, %855, %cst_313 [1] : vector<8x8xf32> to vector<8xf32>
    %857 = vector.shape_cast %856 : vector<8xf32> to vector<8x1xf32>
    %858 = vector.broadcast %857 : vector<8x1xf32> to vector<8x8xf32>
    %859 = arith.divf %855, %858 : vector<8x8xf32>
    %cst_314 = arith.constant dense<0.000000e+00> : vector<8x8xf32>
    %860 = tpu.matmul %859, %846, %cst_314 {dimension_numbers = #tpu.dot_dimension_numbers<[1], [0], [0], [1], [0, 0, 1, 1], [], []>} : vector<8x8xf32>, vector<8x8xf32>, vector<8x8xf32> -> vector<8x8xf32>
    %861 = vector.extract_strided_slice %841 {offsets = [8, 0], sizes = [8, 8], strides = [1, 1]} : vector<16x8xf32> to vector<8x8xf32>
    %862 = vector.extract_strided_slice %842 {offsets = [8, 0], sizes = [8, 8], strides = [1, 1]} : vector<16x8xf32> to vector<8x8xf32>
    %863 = vector.extract_strided_slice %843 {offsets = [8, 0], sizes = [8, 8], strides = [1, 1]} : vector<16x8xf32> to vector<8x8xf32>
    %cst_315 = arith.constant dense<0.000000e+00> : vector<8x8xf32>
    %864 = tpu.matmul %861, %862, %cst_315 {dimension_numbers = #tpu.dot_dimension_numbers<[1], [1], [0], [0], [0, 0, 1, 0], [], []>} : vector<8x8xf32>, vector<8x8xf32>, vector<8x8xf32> -> vector<8x8xf32>
    %cst_316 = arith.constant 0.353553385 : f32
    %865 = vector.broadcast %cst_316 : f32 to vector<8x8xf32>
    %866 = arith.mulf %864, %865 : vector<8x8xf32>
    %867 = arith.addf %866, %23 : vector<8x8xf32>
    %cst_317 = arith.constant dense<0xFF800000> : vector<8xf32>
    %868 = vector.multi_reduction <maximumf>, %867, %cst_317 [1] : vector<8x8xf32> to vector<8xf32>
    %869 = vector.shape_cast %868 : vector<8xf32> to vector<8x1xf32>
    %870 = vector.broadcast %869 : vector<8x1xf32> to vector<8x8xf32>
    %871 = arith.subf %867, %870 : vector<8x8xf32>
    %872 = math.exp %871 : vector<8x8xf32>
    %cst_318 = arith.constant dense<0.000000e+00> : vector<8xf32>
    %873 = vector.multi_reduction <add>, %872, %cst_318 [1] : vector<8x8xf32> to vector<8xf32>
    %874 = vector.shape_cast %873 : vector<8xf32> to vector<8x1xf32>
    %875 = vector.broadcast %874 : vector<8x1xf32> to vector<8x8xf32>
    %876 = arith.divf %872, %875 : vector<8x8xf32>
    %cst_319 = arith.constant dense<0.000000e+00> : vector<8x8xf32>
    %877 = tpu.matmul %876, %863, %cst_319 {dimension_numbers = #tpu.dot_dimension_numbers<[1], [0], [0], [1], [0, 0, 1, 1], [], []>} : vector<8x8xf32>, vector<8x8xf32>, vector<8x8xf32> -> vector<8x8xf32>
    %878 = tpu.concatenate %860, %877 in 0 : vector<8x8xf32>, vector<8x8xf32> -> vector<16x8xf32>
    %879 = vector.extract_strided_slice %714 {offsets = [24, 0], sizes = [8, 32], strides = [1, 1]} : vector<32x32xf32> to vector<8x32xf32>
    %cst_320 = arith.constant dense<0.000000e+00> : vector<16x32xf32>
    %880 = tpu.matmul %878, %879, %cst_320 {dimension_numbers = #tpu.dot_dimension_numbers<[1], [0], [0], [1], [0, 0, 1, 1], [], []>} : vector<16x8xf32>, vector<8x32xf32>, vector<16x32xf32> -> vector<16x32xf32>
    %881 = arith.addf %840, %880 : vector<16x32xf32>
    %882 = vector.broadcast %716 : vector<1x32xf32> to vector<16x32xf32>
    %883 = arith.addf %881, %882 : vector<16x32xf32>
    %884 = arith.addf %883, %694 : vector<16x32xf32>
    %c1_321 = arith.constant 1 : index
    %c0_322 = arith.constant 0 : index
    %c0_323 = arith.constant 0 : index
    %885 = vector.load %arg23[%c1_321, %c0_322, %c0_323] : memref<2x1x32xf32, #tpu.memory_space<vmem>>, vector<1x1x32xf32>
    %886 = vector.shape_cast %885 : vector<1x1x32xf32> to vector<1x32xf32>
    %c1_324 = arith.constant 1 : index
    %c0_325 = arith.constant 0 : index
    %c0_326 = arith.constant 0 : index
    %887 = vector.load %arg24[%c1_324, %c0_325, %c0_326] : memref<2x1x32xf32, #tpu.memory_space<vmem>>, vector<1x1x32xf32>
    %888 = vector.shape_cast %887 : vector<1x1x32xf32> to vector<1x32xf32>
    %cst_327 = arith.constant dense<0.000000e+00> : vector<16xf32>
    %889 = vector.multi_reduction <add>, %884, %cst_327 [1] : vector<16x32xf32> to vector<16xf32>
    %890 = vector.shape_cast %889 : vector<16xf32> to vector<16x1xf32>
    %cst_328 = arith.constant 3.200000e+01 : f32
    %891 = vector.broadcast %cst_328 : f32 to vector<16x1xf32>
    %892 = arith.divf %890, %891 : vector<16x1xf32>
    %893 = vector.broadcast %892 : vector<16x1xf32> to vector<16x32xf32>
    %894 = arith.subf %884, %893 : vector<16x32xf32>
    %895 = arith.mulf %894, %894 : vector<16x32xf32>
    %cst_329 = arith.constant dense<0.000000e+00> : vector<16xf32>
    %896 = vector.multi_reduction <add>, %895, %cst_329 [1] : vector<16x32xf32> to vector<16xf32>
    %897 = vector.shape_cast %896 : vector<16xf32> to vector<16x1xf32>
    %cst_330 = arith.constant 3.200000e+01 : f32
    %898 = vector.broadcast %cst_330 : f32 to vector<16x1xf32>
    %899 = arith.divf %897, %898 : vector<16x1xf32>
    %cst_331 = arith.constant 9.99999974E-6 : f32
    %900 = vector.broadcast %cst_331 : f32 to vector<16x1xf32>
    %901 = arith.addf %899, %900 : vector<16x1xf32>
    %902 = math.rsqrt %901 : vector<16x1xf32>
    %903 = vector.broadcast %902 : vector<16x1xf32> to vector<16x32xf32>
    %904 = arith.mulf %894, %903 : vector<16x32xf32>
    %905 = vector.broadcast %886 : vector<1x32xf32> to vector<16x32xf32>
    %906 = arith.mulf %904, %905 : vector<16x32xf32>
    %907 = vector.broadcast %888 : vector<1x32xf32> to vector<16x32xf32>
    %908 = arith.addf %906, %907 : vector<16x32xf32>
    %909 = arith.truncf %908 : vector<16x32xf32> to vector<16x32xbf16>
    %c1_332 = arith.constant 1 : index
    %c0_333 = arith.constant 0 : index
    %c0_334 = arith.constant 0 : index
    %910 = vector.load %arg17[%c1_332, %c0_333, %c0_334] : memref<2x32x64xbf16, #tpu.memory_space<vmem>>, vector<1x32x64xbf16>
    %911 = vector.shape_cast %910 : vector<1x32x64xbf16> to vector<32x64xbf16>
    %cst_335 = arith.constant dense<0.000000e+00> : vector<16x64xf32>
    %912 = tpu.matmul %909, %911, %cst_335 {dimension_numbers = #tpu.dot_dimension_numbers<[1], [0], [0], [1], [0, 0, 1, 1], [], []>} : vector<16x32xbf16>, vector<32x64xbf16>, vector<16x64xf32> -> vector<16x64xf32>
    %c1_336 = arith.constant 1 : index
    %c0_337 = arith.constant 0 : index
    %c0_338 = arith.constant 0 : index
    %913 = vector.load %arg18[%c1_336, %c0_337, %c0_338] : memref<2x1x64xf32, #tpu.memory_space<vmem>>, vector<1x1x64xf32>
    %914 = vector.shape_cast %913 : vector<1x1x64xf32> to vector<1x64xf32>
    %915 = vector.broadcast %914 : vector<1x64xf32> to vector<16x64xf32>
    %916 = arith.addf %912, %915 : vector<16x64xf32>
    %cst_339 = arith.constant 0.000000e+00 : f32
    %917 = vector.broadcast %cst_339 : f32 to vector<16x64xf32>
    %918 = arith.maximumf %916, %917 : vector<16x64xf32>
    %919 = arith.truncf %918 : vector<16x64xf32> to vector<16x64xbf16>
    %c1_340 = arith.constant 1 : index
    %c0_341 = arith.constant 0 : index
    %c0_342 = arith.constant 0 : index
    %920 = vector.load %arg19[%c1_340, %c0_341, %c0_342] : memref<2x64x32xbf16, #tpu.memory_space<vmem>>, vector<1x64x32xbf16>
    %921 = vector.shape_cast %920 : vector<1x64x32xbf16> to vector<64x32xbf16>
    %cst_343 = arith.constant dense<0.000000e+00> : vector<16x32xf32>
    %922 = tpu.matmul %919, %921, %cst_343 {dimension_numbers = #tpu.dot_dimension_numbers<[1], [0], [0], [1], [0, 0, 1, 1], [], []>} : vector<16x64xbf16>, vector<64x32xbf16>, vector<16x32xf32> -> vector<16x32xf32>
    %c1_344 = arith.constant 1 : index
    %c0_345 = arith.constant 0 : index
    %c0_346 = arith.constant 0 : index
    %923 = vector.load %arg20[%c1_344, %c0_345, %c0_346] : memref<2x1x32xf32, #tpu.memory_space<vmem>>, vector<1x1x32xf32>
    %924 = vector.shape_cast %923 : vector<1x1x32xf32> to vector<1x32xf32>
    %925 = vector.broadcast %924 : vector<1x32xf32> to vector<16x32xf32>
    %926 = arith.addf %922, %925 : vector<16x32xf32>
    %927 = arith.addf %926, %908 : vector<16x32xf32>
    %c1_347 = arith.constant 1 : index
    %c0_348 = arith.constant 0 : index
    %c0_349 = arith.constant 0 : index
    %928 = vector.load %arg25[%c1_347, %c0_348, %c0_349] : memref<2x1x32xf32, #tpu.memory_space<vmem>>, vector<1x1x32xf32>
    %929 = vector.shape_cast %928 : vector<1x1x32xf32> to vector<1x32xf32>
    %c1_350 = arith.constant 1 : index
    %c0_351 = arith.constant 0 : index
    %c0_352 = arith.constant 0 : index
    %930 = vector.load %arg26[%c1_350, %c0_351, %c0_352] : memref<2x1x32xf32, #tpu.memory_space<vmem>>, vector<1x1x32xf32>
    %931 = vector.shape_cast %930 : vector<1x1x32xf32> to vector<1x32xf32>
    %cst_353 = arith.constant dense<0.000000e+00> : vector<16xf32>
    %932 = vector.multi_reduction <add>, %927, %cst_353 [1] : vector<16x32xf32> to vector<16xf32>
    %933 = vector.shape_cast %932 : vector<16xf32> to vector<16x1xf32>
    %cst_354 = arith.constant 3.200000e+01 : f32
    %934 = vector.broadcast %cst_354 : f32 to vector<16x1xf32>
    %935 = arith.divf %933, %934 : vector<16x1xf32>
    %936 = vector.broadcast %935 : vector<16x1xf32> to vector<16x32xf32>
    %937 = arith.subf %927, %936 : vector<16x32xf32>
    %938 = arith.mulf %937, %937 : vector<16x32xf32>
    %cst_355 = arith.constant dense<0.000000e+00> : vector<16xf32>
    %939 = vector.multi_reduction <add>, %938, %cst_355 [1] : vector<16x32xf32> to vector<16xf32>
    %940 = vector.shape_cast %939 : vector<16xf32> to vector<16x1xf32>
    %cst_356 = arith.constant 3.200000e+01 : f32
    %941 = vector.broadcast %cst_356 : f32 to vector<16x1xf32>
    %942 = arith.divf %940, %941 : vector<16x1xf32>
    %cst_357 = arith.constant 9.99999974E-6 : f32
    %943 = vector.broadcast %cst_357 : f32 to vector<16x1xf32>
    %944 = arith.addf %942, %943 : vector<16x1xf32>
    %945 = math.rsqrt %944 : vector<16x1xf32>
    %946 = vector.broadcast %945 : vector<16x1xf32> to vector<16x32xf32>
    %947 = arith.mulf %937, %946 : vector<16x32xf32>
    %948 = vector.broadcast %929 : vector<1x32xf32> to vector<16x32xf32>
    %949 = arith.mulf %947, %948 : vector<16x32xf32>
    %950 = vector.broadcast %931 : vector<1x32xf32> to vector<16x32xf32>
    %951 = arith.addf %949, %950 : vector<16x32xf32>
    %c0_358 = arith.constant 0 : index
    %c0_359 = arith.constant 0 : index
    %952 = vector.load %arg27[%c0_358, %c0_359] : memref<16x32xf32, #tpu.memory_space<vmem>>, vector<16x32xf32>
    tpu.vector_store %arg27[%c0_358, %c0_359], %951 {strides = array<i32>} : memref<16x32xf32, #tpu.memory_space<vmem>>, vector<16x32xf32>,
    return
  }
  func.func @transform_0(%arg0: i32) -> (i32, i32) {
    %c0_i32 = arith.constant 0 : i32
    %c0_i32_0 = arith.constant 0 : i32
    %c0_i32_1 = arith.constant 0 : i32
    return %c0_i32, %c0_i32_0 : i32, i32
  }
  func.func @transform_1(%arg0: i32) -> (i32, i32) {
    %c0_i32 = arith.constant 0 : i32
    %c0_i32_0 = arith.constant 0 : i32
    %c0_i32_1 = arith.constant 0 : i32
    return %c0_i32, %c0_i32_0 : i32, i32
  }
  func.func @transform_2(%arg0: i32) -> (i32, i32) {
    %c0_i32 = arith.constant 0 : i32
    %c0_i32_0 = arith.constant 0 : i32
    %c0_i32_1 = arith.constant 0 : i32
    return %c0_i32, %c0_i32_0 : i32, i32
  }
  func.func @transform_3(%arg0: i32) -> (i32, i32) {
    %c0_i32 = arith.constant 0 : i32
    %c0_i32_0 = arith.constant 0 : i32
    %c0_i32_1 = arith.constant 0 : i32
    return %c0_i32, %c0_i32_0 : i32, i32
  }
  func.func @transform_4(%arg0: i32) -> (i32, i32) {
    %c0_i32 = arith.constant 0 : i32
    %c0_i32_0 = arith.constant 0 : i32
    %c0_i32_1 = arith.constant 0 : i32
    return %c0_i32, %c0_i32_0 : i32, i32
  }
  func.func @transform_5(%arg0: i32) -> (i32, i32) {
    %c0_i32 = arith.constant 0 : i32
    %c0_i32_0 = arith.constant 0 : i32
    %c0_i32_1 = arith.constant 0 : i32
    return %c0_i32, %c0_i32_0 : i32, i32
  }
  func.func @transform_6(%arg0: i32) -> (i32, i32, i32) {
    %c0_i32 = arith.constant 0 : i32
    %c0_i32_0 = arith.constant 0 : i32
    %c0_i32_1 = arith.constant 0 : i32
    %c0_i32_2 = arith.constant 0 : i32
    return %c0_i32, %c0_i32_0, %c0_i32_1 : i32, i32, i32
  }
  func.func @transform_7(%arg0: i32) -> (i32, i32, i32) {
    %c0_i32 = arith.constant 0 : i32
    %c0_i32_0 = arith.constant 0 : i32
    %c0_i32_1 = arith.constant 0 : i32
    %c0_i32_2 = arith.constant 0 : i32
    return %c0_i32, %c0_i32_0, %c0_i32_1 : i32, i32, i32
  }
  func.func @transform_8(%arg0: i32) -> (i32, i32, i32) {
    %c0_i32 = arith.constant 0 : i32
    %c0_i32_0 = arith.constant 0 : i32
    %c0_i32_1 = arith.constant 0 : i32
    %c0_i32_2 = arith.constant 0 : i32
    return %c0_i32, %c0_i32_0, %c0_i32_1 : i32, i32, i32
  }
  func.func @transform_9(%arg0: i32) -> (i32, i32, i32) {
    %c0_i32 = arith.constant 0 : i32
    %c0_i32_0 = arith.constant 0 : i32
    %c0_i32_1 = arith.constant 0 : i32
    %c0_i32_2 = arith.constant 0 : i32
    return %c0_i32, %c0_i32_0, %c0_i32_1 : i32, i32, i32
  }
  func.func @transform_10(%arg0: i32) -> (i32, i32, i32) {
    %c0_i32 = arith.constant 0 : i32
    %c0_i32_0 = arith.constant 0 : i32
    %c0_i32_1 = arith.constant 0 : i32
    %c0_i32_2 = arith.constant 0 : i32
    return %c0_i32, %c0_i32_0, %c0_i32_1 : i32, i32, i32
  }
  func.func @transform_11(%arg0: i32) -> (i32, i32, i32) {
    %c0_i32 = arith.constant 0 : i32
    %c0_i32_0 = arith.constant 0 : i32
    %c0_i32_1 = arith.constant 0 : i32
    %c0_i32_2 = arith.constant 0 : i32
    return %c0_i32, %c0_i32_0, %c0_i32_1 : i32, i32, i32
  }
  func.func @transform_12(%arg0: i32) -> (i32, i32, i32) {
    %c0_i32 = arith.constant 0 : i32
    %c0_i32_0 = arith.constant 0 : i32
    %c0_i32_1 = arith.constant 0 : i32
    %c0_i32_2 = arith.constant 0 : i32
    return %c0_i32, %c0_i32_0, %c0_i32_1 : i32, i32, i32
  }
  func.func @transform_13(%arg0: i32) -> (i32, i32, i32) {
    %c0_i32 = arith.constant 0 : i32
    %c0_i32_0 = arith.constant 0 : i32
    %c0_i32_1 = arith.constant 0 : i32
    %c0_i32_2 = arith.constant 0 : i32
    return %c0_i32, %c0_i32_0, %c0_i32_1 : i32, i32, i32
  }
  func.func @transform_14(%arg0: i32) -> (i32, i32, i32) {
    %c0_i32 = arith.constant 0 : i32
    %c0_i32_0 = arith.constant 0 : i32
    %c0_i32_1 = arith.constant 0 : i32
    %c0_i32_2 = arith.constant 0 : i32
    return %c0_i32, %c0_i32_0, %c0_i32_1 : i32, i32, i32
  }
  func.func @transform_15(%arg0: i32) -> (i32, i32, i32) {
    %c0_i32 = arith.constant 0 : i32
    %c0_i32_0 = arith.constant 0 : i32
    %c0_i32_1 = arith.constant 0 : i32
    %c0_i32_2 = arith.constant 0 : i32
    return %c0_i32, %c0_i32_0, %c0_i32_1 : i32, i32, i32
  }
  func.func @transform_16(%arg0: i32) -> (i32, i32, i32) {
    %c0_i32 = arith.constant 0 : i32
    %c0_i32_0 = arith.constant 0 : i32
    %c0_i32_1 = arith.constant 0 : i32
    %c0_i32_2 = arith.constant 0 : i32
    return %c0_i32, %c0_i32_0, %c0_i32_1 : i32, i32, i32
  }
  func.func @transform_17(%arg0: i32) -> (i32, i32, i32) {
    %c0_i32 = arith.constant 0 : i32
    %c0_i32_0 = arith.constant 0 : i32
    %c0_i32_1 = arith.constant 0 : i32
    %c0_i32_2 = arith.constant 0 : i32
    return %c0_i32, %c0_i32_0, %c0_i32_1 : i32, i32, i32
  }
  func.func @transform_18(%arg0: i32) -> (i32, i32, i32) {
    %c0_i32 = arith.constant 0 : i32
    %c0_i32_0 = arith.constant 0 : i32
    %c0_i32_1 = arith.constant 0 : i32
    %c0_i32_2 = arith.constant 0 : i32
    return %c0_i32, %c0_i32_0, %c0_i32_1 : i32, i32, i32
  }
  func.func @transform_19(%arg0: i32) -> (i32, i32, i32) {
    %c0_i32 = arith.constant 0 : i32
    %c0_i32_0 = arith.constant 0 : i32
    %c0_i32_1 = arith.constant 0 : i32
    %c0_i32_2 = arith.constant 0 : i32
    return %c0_i32, %c0_i32_0, %c0_i32_1 : i32, i32, i32
  }
  func.func @transform_20(%arg0: i32) -> (i32, i32, i32) {
    %c0_i32 = arith.constant 0 : i32
    %c0_i32_0 = arith.constant 0 : i32
    %c0_i32_1 = arith.constant 0 : i32
    %c0_i32_2 = arith.constant 0 : i32
    return %c0_i32, %c0_i32_0, %c0_i32_1 : i32, i32, i32
  }
  func.func @transform_21(%arg0: i32) -> (i32, i32, i32) {
    %c0_i32 = arith.constant 0 : i32
    %c0_i32_0 = arith.constant 0 : i32
    %c0_i32_1 = arith.constant 0 : i32
    %c0_i32_2 = arith.constant 0 : i32
    return %c0_i32, %c0_i32_0, %c0_i32_1 : i32, i32, i32
  }
  func.func @transform_22(%arg0: i32) -> (i32, i32, i32) {
    %c0_i32 = arith.constant 0 : i32
    %c0_i32_0 = arith.constant 0 : i32
    %c0_i32_1 = arith.constant 0 : i32
    %c0_i32_2 = arith.constant 0 : i32
    return %c0_i32, %c0_i32_0, %c0_i32_1 : i32, i32, i32
  }
  func.func @transform_23(%arg0: i32) -> (i32, i32, i32) {
    %c0_i32 = arith.constant 0 : i32
    %c0_i32_0 = arith.constant 0 : i32
    %c0_i32_1 = arith.constant 0 : i32
    %c0_i32_2 = arith.constant 0 : i32
    return %c0_i32, %c0_i32_0, %c0_i32_1 : i32, i32, i32
  }
  func.func @transform_24(%arg0: i32) -> (i32, i32, i32) {
    %c0_i32 = arith.constant 0 : i32
    %c0_i32_0 = arith.constant 0 : i32
    %c0_i32_1 = arith.constant 0 : i32
    %c0_i32_2 = arith.constant 0 : i32
    return %c0_i32, %c0_i32_0, %c0_i32_1 : i32, i32, i32
  }
  func.func @transform_25(%arg0: i32) -> (i32, i32, i32) {
    %c0_i32 = arith.constant 0 : i32
    %c0_i32_0 = arith.constant 0 : i32
    %c0_i32_1 = arith.constant 0 : i32
    %c0_i32_2 = arith.constant 0 : i32
    return %c0_i32, %c0_i32_0, %c0_i32_1 : i32, i32, i32
  }
  func.func @transform_26(%arg0: i32) -> (i32, i32) {
    %c0_i32 = arith.constant 0 : i32
    %c0_i32_0 = arith.constant 0 : i32
    %c0_i32_1 = arith.constant 0 : i32
    return %c0_i32, %c0_i32_0 : i32, i32
  }
}

</mosaic_0001>

<bundles_post_ra>
// kernel: decoder_forward.1
= control target key start
LH: loop header
LB: loop body
LE: loop exit
PB: predicated region body
PF: predicated region fallthrough
CT: control target
= control target key end

     0   :  { %s10456_s0 = inlined_call_operand.vmem [shape: s32[16,1], index: 0, kind: input, shape index: {}]   ;;  %s10457_s1 = inlined_call_operand.vmem [shape: f32[16,32], index: 1, kind: input, shape index: {}]   ;;  %s10458_s2 = inlined_call_operand.vmem [shape: f32[64,32], index: 2, kind: input, shape index: {}]   ;;  %s10459_s3 = inlined_call_operand.vmem [shape: f32[64,32], index: 3, kind: input, shape index: {}]   ;;  %s10460_s4 = inlined_call_operand.vmem [shape: f32[8,8], index: 4, kind: input, shape index: {}]   ;;  %s10461_s5 = inlined_call_operand.vmem [shape: f32[8,8], index: 5, kind: input, shape index: {}]   ;;  %s10462_s6 = inlined_call_operand.vmem [shape: bf16[2,32,96], index: 6, kind: input, shape index: {}]   ;;  %s10463_s7 = inlined_call_operand.hbm [shape: f32[2,1,96], index: 7, kind: input, shape index: {}]   ;;  %s10464_s8 = inlined_call_operand.vmem [shape: f32[2,32,32], index: 8, kind: input, shape index: {}]   ;;  %s10465_s9 = inlined_call_operand.hbm [shape: f32[2,1,32], index: 9, kind: input, shape index: {}]   ;;  %s10466_s10 = inlined_call_operand.vmem [shape: bf16[2,32,32], index: 10, kind: input, shape index: {}]   ;;  %s10467_s11 = inlined_call_operand.hbm [shape: f32[2,1,32], index: 11, kind: input, shape index: {}]   ;;  %s10468_s12 = inlined_call_operand.vmem [shape: bf16[2,32,64], index: 12, kind: input, shape index: {}]   ;;  %s10469_s13 = inlined_call_operand.vmem [shape: f32[2,1,64], index: 13, kind: input, shape index: {}]   ;;  %s10470_s14 = inlined_call_operand.vmem [shape: f32[2,32,32], index: 14, kind: input, shape index: {}]   ;;  %s10471_s15 = inlined_call_operand.vmem [shape: f32[2,1,32], index: 15, kind: input, shape index: {}]   ;;  %s10472_s16 = inlined_call_operand.vmem [shape: bf16[2,32,64], index: 16, kind: input, shape index: {}]   ;;  %s10473_s17 = inlined_call_operand.vmem [shape: f32[2,1,64], index: 17, kind: input, shape index: {}]   ;;  %s10474_s18 = inlined_call_operand.vmem [shape: bf16[2,64,32], index: 18, kind: input, shape index: {}]   ;;  %s10475_s19 = inlined_call_operand.vmem [shape: f32[2,1,32], index: 19, kind: input, shape index: {}]   ;;  %s10476_s20 = inlined_call_operand.vmem [shape: f32[2,1,32], index: 20, kind: input, shape index: {}]   ;;  %s10477_s21 = inlined_call_operand.vmem [shape: f32[2,1,32], index: 21, kind: input, shape index: {}]   ;;  %s10478_s22 = inlined_call_operand.vmem [shape: f32[2,1,32], index: 22, kind: input, shape index: {}]   ;;  %s10479_s23 = inlined_call_operand.vmem [shape: f32[2,1,32], index: 23, kind: input, shape index: {}]   ;;  %s10480_s24 = inlined_call_operand.vmem [shape: f32[2,1,32], index: 24, kind: input, shape index: {}]   ;;  %s10481_s25 = inlined_call_operand.vmem [shape: f32[2,1,32], index: 25, kind: input, shape index: {}]   ;;  %s10482_s26 = inlined_call_operand.hbm [shape: f32[16,32], index: 26, kind: output, shape index: {}]  }
   0x1   :  { %10506 = sst [smem:[#allocation12_spill]] %s10456_s0 }
   0x2   :  { %10507 = sst [smem:[#allocation13_spill]] %s10457_s1 }
   0x3   :  { %10508 = sst [smem:[#allocation14_spill]] %s10458_s2 }
   0x4   :  { %10509 = sst [smem:[#allocation15_spill]] %s10459_s3 }
   0x5   :  { %10510 = sst [smem:[#allocation16_spill]] %s10460_s4 }
   0x6   :  { %10511 = sst [smem:[#allocation17_spill]] %s10461_s5 }
   0x7   :  { %10512 = sst [smem:[#allocation18_spill]] %s10462_s6 }
   0x8   :  { %10513 = sst [smem:[#allocation19_spill]] %s10463_s7 }
   0x9   :  { %10514 = sst [smem:[#allocation20_spill]] %s10464_s8 }
   0xa   :  { %10515 = sst [smem:[#allocation21_spill]] %s10465_s9 }
   0xb   :  { %10516 = sst [smem:[#allocation22_spill]] %s10466_s10 }
   0xc   :  { %10517 = sst [smem:[#allocation23_spill]] %s10482_s26 }
   0xd   :  { %31 = vsyncpa [#allocation3], 0 }
   0xe   :  { %32 = vsyncpa [#allocation6], 0 }
   0xf   :  { %33 = vsyncpa [#allocation4], 0  ;;  %s9263_s27 = smov [#allocation5]   ;;  %s9264_s7 = smov [#allocation2]  }
  0x10   :  { %s67_s3 = sshll.u32 %s9263_s27, 4  ;;  %s53_s28 = sshll.u32 %s9264_s7, 4  ;;  %s68_s3 = int_to_ptr.vmem [resolvable:$true] %s67_s3  ;;  %s9421_s28 = int_to_ptr.vmem [resolvable:$true] %s53_s28 }
  0x11   :  { %s10518_s29 = sld [smem:[#allocation21_spill]] }
  0x17   :  { %s9169_s0 = scalar_lea.hbm %s10518_s29, 32 }
  0x18   :  { %p9170_p0 = scmp.ne.s32.totalorder %s10518_s29, %s9169_s0  ;;  %p9173_p1 = scmp.lt.u32.totalorder %s9169_s0, %s10518_s29 }
  0x1a   :  { %p9175_p2 = pnand %p9173_p1, %p9170_p0 }
  0x1c   :  { %9178 = shalt.err (!%p9175_p2)
}
  0x1d   :  { %s9179_s10 = scalar_lea.vmem %s68_s3, 32  ;;  %p9184_p4 = scmp.lt.s32.totalorder %s68_s3, %s68_s3 }
  0x1e   :  { %p9180_p3 = scmp.ne.s32.totalorder %s68_s3, %s9179_s10  ;;  %p9185_p5 = scmp.lt.s32.totalorder %s9179_s10, %s9179_s10 }
  0x20   :  { %p9186_p6 = por %p9185_p5, %p9184_p4 }
  0x22   :  { %p9187_p7 = pnand %p9186_p6, %p9180_p3 }
  0x24   :  { %9190 = shalt.err (!%p9187_p7)
}
  0x25   :  { %s9265_s6 = smov 16   ;;  %s9266_s1 = smov 1  }
  0x26   :  { %73 = dma.hbm_to_vmem [thread:$0]  %s10518_s29, 32, %s68_s3, [#allocation6], %s9265_s6, %s9265_s6, %s9266_s1  }
  0x27   :  { %s10519_s0 = sld [smem:[#allocation19_spill]] }
  0x2d   :  { %s9191_s9 = scalar_lea.hbm %s10519_s0, 32 }
  0x2e   :  { %p9192_p8 = scmp.ne.s32.totalorder %s10519_s0, %s9191_s9  ;;  %p9195_p9 = scmp.lt.u32.totalorder %s9191_s9, %s10519_s0 }
  0x30   :  { %p9197_p10 = pnand %p9195_p9, %p9192_p8 }
  0x32   :  { %9200 = shalt.err (!%p9197_p10)
}
  0x33   :  { %s9201_s26 = scalar_lea.vmem %s9421_s28, 32  ;;  %p9206_p12 = scmp.lt.s32.totalorder %s9421_s28, %s9421_s28 }
  0x34   :  { %p9202_p11 = scmp.ne.s32.totalorder %s9421_s28, %s9201_s26  ;;  %p9207_p13 = scmp.lt.s32.totalorder %s9201_s26, %s9201_s26 }
  0x36   :  { %p9208_p0 = por %p9207_p13, %p9206_p12 }
  0x38   :  { %p9209_p1 = pnand %p9208_p0, %p9202_p11 }
  0x3a   :  { %9212 = shalt.err (!%p9209_p1)
}
  0x3b   :  { %59 = dma.hbm_to_vmem [thread:$0]  %s10519_s0, 32, %s9421_s28, [#allocation3], %s9265_s6, %s9265_s6, %s9266_s1  }
  0x3c   :  { %s9267_s27 = smov [#allocation7]   ;;  %s9213_s9 = scalar_lea.hbm %s10467_s11, 32 }
  0x3d   :  { %s81_s7 = sshll.u32 %s9267_s27, 4  ;;  %p9214_p2 = scmp.ne.s32.totalorder %s10467_s11, %s9213_s9  ;;  %s82_s7 = int_to_ptr.vmem [resolvable:$true] %s81_s7 }
  0x3e   :  { %p9217_p3 = scmp.lt.u32.totalorder %s9213_s9, %s10467_s11 }
  0x40   :  { %p9219_p4 = pnand %p9217_p3, %p9214_p2 }
  0x42   :  { %9222 = shalt.err (!%p9219_p4)
}
  0x43   :  { %s9223_s10 = scalar_lea.vmem %s82_s7, 32  ;;  %p9228_p6 = scmp.lt.s32.totalorder %s82_s7, %s82_s7 }
  0x44   :  { %p9224_p5 = scmp.ne.s32.totalorder %s82_s7, %s9223_s10  ;;  %p9229_p7 = scmp.lt.s32.totalorder %s9223_s10, %s9223_s10 }
  0x46   :  { %p9230_p8 = por %p9229_p7, %p9228_p6 }
  0x48   :  { %p9231_p9 = pnand %p9230_p8, %p9224_p5 }
  0x4a   :  { %9234 = shalt.err (!%p9231_p9)
}
  0x4b   :  { %87 = dma.hbm_to_vmem [thread:$0]  %s10467_s11, 32, %s82_s7, [#allocation6], %s9265_s6, %s9265_s6, %s9266_s1  }
  0x4c   :  { %9257 = dma.done.wait [#allocation3], 32  }
  0x4d   :  { %9258 = vsyncadd [#allocation3], 4294967264 }
  0x4e   :  { %9259 = dma.done.wait [#allocation6], 64  }
  0x4f   :  { %9260 = vsyncadd [#allocation6], 4294967232  ;;  %v9268_v0 = vmov 0   ;;  %s10520_s27 = sld [smem:[#allocation12_spill]]  ;;  %s10521_s9 = sld [smem:[#allocation14_spill]]  ;;  %v9269_v10 = vmov 0.0   ;;  %v128_v17 = vlaneseq }
  0x50   :  { %8992 = vset.pattern.permute.xlu0 %v9268_v0  ;;  %8441 = vmatprep.subr.bf16.mxu1 %v9269_v10  ;;  %s10522_s11 = sld [smem:[#allocation18_spill]]  ;;  %vm151_vm0 = vcmask 523264   ;;  %vm9270_vm3 = vmmov 0   ;;  %s10523_s2 = sld [smem:[#allocation15_spill]]  ;;  %vm265_vm4 = vcmask 261120   ;;  %vm318_vm5 = vcmask 64512  }
  0x51   :  { %v129_v18 = vand.u32 127, %v128_v17  ;;  %8445 = vmatprep.mubr.msk.bf16.mxu1 %vm9270_vm3, %v9269_v10  ;;  %v7972_v30 = vld [vmem:[#allocation2] ss:$0 sm:$0xff]  ;;  %s9271_s5 = smov 88   ;;  %s9272_s10 = smov 96  }
  0x52   :  { %s9273_s28 = smov 120   ;;  %s10524_s29 = sld [smem:[#allocation16_spill]]  ;;  %v9274_v45 = vmov -1e+09  }
  0x53   :  { %s10498_s8 = smov 64   ;;  %s9277_s4 = smov 112  }
  0x54   :  { %s10504_s30 = smov 80   ;;  %s10525_s6 = sld [smem:[#allocation20_spill]] }
  0x55   :  { %v126_v1 = vld [vmem:[%s10520_s27] sm:$0xff]  ;;  %v143_v3 = vld [vmem:[%s10521_s9 + $0x8] sm:$0xff]  ;;  %v144_v4 = vld [vmem:[%s10521_s9 + $0x10] sm:$0xff]  ;;  %s10500_s0 = smov 72   ;;  %s10502_s3 = smov 104  }
  0x56   :  { %v142_v2 = vld [vmem:[%s10521_s9] sm:$0xff]  ;;  %131 = vperm.xlu0 %8992, %v126_v1   ;;  %v145_v5 = vld [vmem:[%s10521_s9 + $0x18] sm:$0xff]  ;;  %v127_v6 = vld [vmem:[%s10520_s27 + $0x8] sm:$0xff]  ;;  %s10496_s27 = smov 56   ;;  %s10528_s7 = sld [smem:[#allocation17_spill]] }
  0x57   :  { %v8929_v7 = vpack.c.bf16 %v143_v3, %v142_v2  ;;  %v8933_v8 = vpack.c.bf16 %v145_v5, %v144_v4  ;;  %v146_v9 = vld [vmem:[%s10521_s9 + $0x20] sm:$0xff]  ;;  %v147_v11 = vld [vmem:[%s10521_s9 + $0x28] sm:$0xff]  ;;  %v148_v12 = vld [vmem:[%s10521_s9 + $0x30] sm:$0xff]  ;;  %s10530_s1 = smov 72   ;;  %s10531_s26 = smov 64  }
  0x58   :  { %v149_v13 = vld [vmem:[%s10521_s9 + $0x38] sm:$0xff]  ;;  %v8937_v14 = vpack.c.bf16 %v147_v11, %v146_v9  ;;  %v8993_v15 = vld [vmem:[%s10522_s11] sm:$0xff]   ;;  %v8994_v23 = vld [vmem:[%s10522_s11 + $0x8] sm:$0xff]   ;;  %s10492_s9 = smov 40  }
  0x59   :  { %8930 = vmatprep.subr.bf16.mxu0 %v8929_v7  ;;  %8442 = vmatpush3.bf16.msra.mxu1 %v8993_v15  ;;  %v8941_v16 = vpack.c.bf16 %v149_v13, %v148_v12  ;;  %v150_v24 = vld [vmem:[%s10523_s2] sm:$0xff]  ;;  %s10494_s2 = smov 48  }
  0x5a   :  { %134 = vperm.xlu0 %8992, %v127_v6   ;;  %8932 = vmatpush3.bf16.msra.mxu0 %v8929_v7  ;;  %v233_v43 = vld [vmem:[%s10524_s29] sm:$0xff] }
  0x5b   :  { %8934 = vmatprep.subr.bf16.mxu0 %v8933_v8  ;;  %8443 = vmatprep.subr.bf16.mxu1 %v9269_v10  ;;  %vm234_vm6 = vcmp.gt.f32.partialorder %v233_v43, 0.0 }
  0x5c   :  { %v9572_v46 = vsel %vm234_vm6, 0.0, %v9274_v45 }
  0x5d   :  { %8444 = vmatpush3.bf16.msra.mxu1 %v8994_v23 }
  0x5e   :  { %8936 = vmatpush3.bf16.msra.mxu0 %v8933_v8  ;;  %8459 = vmatprep.subr.mxu1 %v9269_v10 }
  0x5f   :  { %8938 = vmatprep.subr.bf16.mxu0 %v8937_v14 }
  0x62   :  { %8940 = vmatpush3.bf16.msra.mxu0 %v8937_v14 }
  0x63   :  { %8942 = vmatprep.subr.bf16.mxu0 %v8941_v16 }
  0x66   :  { %8944 = vmatpush3.bf16.msra.mxu0 %v8941_v16 }
  0x67   :  { %8449 = vmatprep.subr.mxu0 %v9269_v10 }
  0xd5   :  { %v132_v19 = vpop.permute.xlu0 %131 }
  0xd6   :  { %vm136_vm1 = vcmp.eq.s32.totalorder %v132_v19, %v129_v18 }
  0xd7   :  { %v7968_v20 = vsel %vm136_vm1, 1.0, %v9269_v10 }
  0xd8   :  { %8438 = vmatprep.mubr.msk.f32.mxu0 %vm151_vm0, %v7968_v20 }
  0xd9   :  { %v135_v21 = vpop.permute.xlu0 %134 }
  0xda   :  { %vm137_vm2 = vcmp.eq.s32.totalorder %v135_v21, %v129_v18 }
  0xdb   :  { %v7969_v22 = vsel %vm137_vm2, 1.0, %v9269_v10 }
  0xdc   :  { %8439 = vmatmul.mubr.msk.f32.vlgmr.msra.gmra.mrb[0].mxu0 %vm151_vm0, %v7969_v22 }
  0xdd   :  { %8451 = vmatprep.mubr.msk.f32.mxu0 %vm9270_vm3, %v9269_v10 }
 0x1af   :  { %v8440_v25 = vpop.f32.mrb[0].mxu0 }
 0x1b0   :  { %v9524_v26 = vadd.f32 %v8440_v25, %v150_v24  ;;  %v224_v27 = vpop.f32.mrb[1].mxu0 }
 0x1b1   :  { %v9526_v28 = vadd.f32 %v224_v27, %v150_v24 }
 0x1b3   :  { %v241_v29 = vpack.c.bf16 %v9524_v26, %v9526_v28 }
 0x1b5   :  { %8446 = vmatmul.mubr.msk.bf16.vlgmr.msra.gmra.mrb[0].mxu1 %vm265_vm4, %v241_v29 }
 0x1b6   :  { %8461 = vmatprep.mubr.msk.f32.mxu1 %vm9270_vm3, %v9269_v10 }
 0x288   :  { %v303_v31 = vpop.f32.mrb[0].mxu1 }
 0x289   :  { %v9533_v32 = vadd.f32 %v7972_v30, %v303_v31  ;;  %v8447_v33 = vpop.f32.mrb[1].mxu1 }
 0x28a   :  { %v306_v34 = vpop.f32.mrb[2].mxu1 }
 0x28b   :  { %650 = vrot.lane.b32.xlu0 %v9533_v32, %s9271_s5  ;;  %316 = vrot.lane.b32.xlu1 %v9533_v32, %s9272_s10  ;;  %v8448_v35 = vpop.f32.mrb[3].mxu1  ;;  %v9539_v36 = vadd.f32 %v7972_v30, %v306_v34 }
 0x28f   :  { %817 = vrot.lane.b32.xlu0 %v9539_v36, %s9271_s5  ;;  %483 = vrot.lane.b32.xlu1 %v9539_v36, %s9272_s10 }
 0x293   :  { %648 = vrot.lane.b32.xlu1 %v9533_v32, %s9273_s28 }
 0x297   :  { %815 = vrot.lane.b32.xlu1 %v9539_v36, %s9273_s28 }
 0x2fd   :  { %v317_v37 = vpop.permute.xlu1 %316  ;;  %v651_v39 = vpop.permute.xlu0 %650 }
 0x2fe   :  { %8450 = vmatpush3.xpose.msk.msra.mxu0 %vm318_vm5, %v317_v37 }
 0x2ff   :  { %8454 = vmatprep.subr.mxu0 %v9269_v10 }
 0x301   :  { %8452 = vmatmul.mubr.msk.f32.vlgmr.msra.gmra.mrb[2].mxu0 %vm318_vm5, %v9533_v32  ;;  %v484_v38 = vpop.permute.xlu1 %483  ;;  %v818_v41 = vpop.permute.xlu0 %817 }
 0x302   :  { %8460 = vmatpush3.xpose.msk.msra.mxu1 %vm318_vm5, %v484_v38  ;;  %8456 = vmatprep.mubr.msk.f32.mxu0 %vm9270_vm3, %v9269_v10 }
 0x303   :  { %8469 = vmatprep.subr.mxu1 %v9269_v10 }
 0x305   :  { %8462 = vmatmul.mubr.msk.f32.vlgmr.msra.gmra.mrb[4].mxu1 %vm318_vm5, %v9539_v36  ;;  %v649_v40 = vpop.permute.xlu1 %648 }
 0x306   :  { %8470 = vmatpush3.xpose.msk.msra.mxu1 %vm318_vm5, %v651_v39  ;;  %8471 = vmatprep.mubr.msk.f32.mxu1 %vm9270_vm3, %v9269_v10 }
 0x307   :  { %8479 = vmatprep.subr.mxu1 %v9269_v10 }
 0x309   :  { %8472 = vmatmul.mubr.msk.f32.vlgmr.msra.gmra.mrb[6].mxu1 %vm318_vm5, %v649_v40  ;;  %v816_v42 = vpop.permute.xlu1 %815 }
 0x30a   :  { %8480 = vmatpush3.xpose.msk.msra.mxu1 %vm318_vm5, %v818_v41  ;;  %8481 = vmatprep.mubr.msk.f32.mxu1 %vm9270_vm3, %v9269_v10 }
 0x30d   :  { %8482 = vmatmul.mubr.msk.f32.vlgmr.msra.gmra.mrb[8].mxu1 %vm318_vm5, %v816_v42 }
 0x3d4   :  { %v389_v44 = vpop.f32.mrb[2].mxu0 }
 0x3d5   :  { %v393_v47 = vmul.f32 0.35355338, %v389_v44  ;;  %v8453_v48 = vpop.f32.mrb[3].mxu0 }
 0x3d6   :  { %v310_v48 = vld [vmem:[%s10525_s6] sm:$0xff] }
 0x3d7   :  { %v394_v49 = vadd.f32 %v393_v47, %v9572_v46  ;;  %v311_v47 = vld [vmem:[%s10525_s6 + $0x8] sm:$0xff] }
 0x3d8   :  { %v555_v50 = vpop.f32.mrb[4].mxu1  ;;  %8489 = vmatprep.subr.mxu1 %v311_v47 }
 0x3d9   :  { %v559_v51 = vmul.f32 0.35355338, %v555_v50  ;;  %v8463_v52 = vpop.f32.mrb[5].mxu1  ;;  %v395_v53 = vsel %vm318_vm5, %v394_v49, -inf  ;;  %8490 = vmatpush3.msra.mxu1 %v311_v47 }
 0x3da   :  { %396 = vmax.xlane.f32.xlu0 %v395_v53  ;;  %8494 = vmatprep.subr.mxu1 %v310_v48 }
 0x3db   :  { %v560_v54 = vadd.f32 %v559_v51, %v9572_v46 }
 0x3dc   :  { %v722_v55 = vpop.f32.mrb[6].mxu1 }
 0x3dd   :  { %v726_v56 = vmul.f32 0.35355338, %v722_v55  ;;  %v8473_v57 = vpop.f32.mrb[7].mxu1  ;;  %v561_v58 = vsel %vm318_vm5, %v560_v54, -inf }
 0x3de   :  { %562 = vmax.xlane.f32.xlu1 %v561_v58 }
 0x3df   :  { %v727_v59 = vadd.f32 %v726_v56, %v9572_v46 }
 0x3e0   :  { %v889_v60 = vpop.f32.mrb[8].mxu1 }
 0x3e1   :  { %v893_v61 = vmul.f32 0.35355338, %v889_v60  ;;  %v8483_v62 = vpop.f32.mrb[9].mxu1  ;;  %v728_v63 = vsel %vm318_vm5, %v727_v59, -inf }
 0x3e2   :  { %729 = vmax.xlane.f32.xlu0 %v728_v63 }
 0x3e3   :  { %v894_v0 = vadd.f32 %v893_v61, %v9572_v46 }
 0x3e5   :  { %v895_v1 = vsel %vm318_vm5, %v894_v0, -inf }
 0x3e6   :  { %896 = vmax.xlane.f32.xlu0 %v895_v1 }
 0x3ef   :  { %406 = vrot.lane.b32.xlu1 %v9533_v32, %s10498_s8 }
 0x467   :  { %v397_v2 = vpop.xlane.xlu0 %396 }
 0x468   :  { %v398_v3 = vsub.f32 %v394_v49, %v397_v2 }
 0x46a   :  { %v399_v4 = vmul.f32 1.442695, %v398_v3 }
 0x46b   :  { %v563_v5 = vpop.xlane.xlu1 %562 }
 0x46c   :  { %9017 = vpow2.f32 %v399_v4  ;;  %v564_v6 = vsub.f32 %v560_v54, %v563_v5 }
 0x46e   :  { %v565_v7 = vmul.f32 1.442695, %v564_v6 }
 0x46f   :  { %v407_v8 = vpop.permute.xlu1 %406  ;;  %v730_v9 = vpop.xlane.xlu0 %729 }
 0x470   :  { %9019 = vpow2.f32 %v565_v7  ;;  %v731_v11 = vsub.f32 %v727_v59, %v730_v9  ;;  %8455 = vmatpush3.msra.mxu0 %v407_v8 }
 0x471   :  { %8464 = vmatprep.subr.mxu0 %v9269_v10 }
 0x472   :  { %v732_v12 = vmul.f32 1.442695, %v731_v11 }
 0x473   :  { %v897_v13 = vpop.xlane.xlu0 %896 }
 0x474   :  { %9021 = vpow2.f32 %v732_v12  ;;  %v898_v14 = vsub.f32 %v894_v0, %v897_v13 }
 0x476   :  { %v9018_v15 = vpop.eup %9017  ;;  %v899_v16 = vmul.f32 1.442695, %v898_v14 }
 0x477   :  { %v401_v17 = vsel %vm318_vm5, %v9018_v15, 0.0 }
 0x478   :  { %9023 = vpow2.f32 %v899_v16  ;;  %402 = vadd.xlane.f32.xlu1 %v401_v17 }
 0x47a   :  { %v9020_v18 = vpop.eup %9019 }
 0x47b   :  { %v567_v19 = vsel %vm318_vm5, %v9020_v18, 0.0 }
 0x47c   :  { %568 = vadd.xlane.f32.xlu0 %v567_v19 }
 0x47e   :  { %v9022_v20 = vpop.eup %9021 }
 0x47f   :  { %v734_v21 = vsel %vm318_vm5, %v9022_v20, 0.0 }
 0x480   :  { %735 = vadd.xlane.f32.xlu1 %v734_v21 }
 0x482   :  { %v9024_v22 = vpop.eup %9023 }
 0x483   :  { %v901_v23 = vsel %vm318_vm5, %v9024_v22, 0.0 }
 0x484   :  { %902 = vadd.xlane.f32.xlu0 %v901_v23 }
 0x491   :  { %739 = vrot.lane.b32.xlu1 %v9533_v32, %s10496_s27 }
 0x495   :  { %906 = vrot.lane.b32.xlu1 %v9539_v36, %s10496_s27  ;;  %s10526_s27 = sld [smem:[#allocation13_spill]] }
 0x499   :  { %1144 = vrot.lane.b32.xlu1 %v9533_v32, %s9277_s4 }
 0x49a   :  { %572 = vrot.lane.b32.xlu0 %v9539_v36, %s10498_s8  ;;  %s10533_s8 = smov 80  }
 0x49d   :  { %1311 = vrot.lane.b32.xlu1 %v9539_v36, %s9277_s4 }
 0x49e   :  { %1146 = vrot.lane.b32.xlu0 %v9533_v32, %s10504_s30 }
 0x4a2   :  { %1313 = vrot.lane.b32.xlu0 %v9539_v36, %s10504_s30 }
 0x505   :  { %v403_v24 = vpop.xlane.xlu1 %402 }
 0x506   :  { %9025 = vrcp.f32 %v403_v24 }
 0x509   :  { %v569_v25 = vpop.xlane.xlu0 %568 }
 0x50a   :  { %9027 = vrcp.f32 %v569_v25 }
 0x50d   :  { %v736_v27 = vpop.xlane.xlu1 %735 }
 0x50e   :  { %9029 = vrcp.f32 %v736_v27 }
 0x510   :  { %v9026_v29 = vpop.eup %9025 }
 0x511   :  { %v903_v30 = vpop.xlane.xlu0 %902  ;;  %v405_v31 = vmul.f32 %v9026_v29, %v9018_v15  ;;  %v740_v34 = vpop.permute.xlu1 %739 }
 0x512   :  { %9031 = vrcp.f32 %v903_v30 }
 0x513   :  { %8457 = vmatmul.mubr.msk.f32.vlgmr.msra.gmra.mrb[4].mxu0 %vm318_vm5, %v405_v31 }
 0x514   :  { %v9028_v33 = vpop.eup %9027  ;;  %8466 = vmatprep.mubr.msk.f32.mxu0 %vm9270_vm3, %v9269_v10 }
 0x515   :  { %v573_v35 = vpop.permute.xlu0 %572  ;;  %v571_v37 = vmul.f32 %v9028_v33, %v9020_v18  ;;  %v907_v40 = vpop.permute.xlu1 %906 }
 0x516   :  { %8465 = vmatpush3.msra.mxu0 %v573_v35 }
 0x517   :  { %8467 = vmatmul.mubr.msk.f32.vlgmr.msra.gmra.mrb[6].mxu0 %vm318_vm5, %v571_v37  ;;  %8474 = vmatprep.subr.mxu0 %v9269_v10 }
 0x518   :  { %v9030_v38 = vpop.eup %9029  ;;  %8475 = vmatpush3.msra.mxu0 %v740_v34  ;;  %8476 = vmatprep.mubr.msk.f32.mxu0 %vm9270_vm3, %v9269_v10 }
 0x519   :  { %8484 = vmatprep.subr.mxu0 %v9269_v10  ;;  %v738_v39 = vmul.f32 %v9030_v38, %v9022_v20  ;;  %v1147_v43 = vpop.permute.xlu0 %1146  ;;  %v1145_v44 = vpop.permute.xlu1 %1144  ;;  %v312_v20 = vld [vmem:[%s10525_s6 + $0x10] sm:$0xff] }
 0x51b   :  { %8477 = vmatmul.mubr.msk.f32.vlgmr.msra.gmra.mrb[8].mxu0 %vm318_vm5, %v738_v39 }
 0x51c   :  { %v9032_v41 = vpop.eup %9031  ;;  %8485 = vmatpush3.msra.mxu0 %v907_v40  ;;  %8486 = vmatprep.mubr.msk.f32.mxu0 %vm9270_vm3, %v9269_v10 }
 0x51d   :  { %v905_v42 = vmul.f32 %v9032_v41, %v9024_v22  ;;  %8499 = vmatprep.subr.mxu0 %v9269_v10  ;;  %v1314_v60 = vpop.permute.xlu0 %1313  ;;  %v1312_v62 = vpop.permute.xlu1 %1311 }
 0x51f   :  { %8487 = vmatmul.mubr.msk.f32.vlgmr.msra.gmra.mrb[10].mxu0 %vm318_vm5, %v905_v42 }
 0x520   :  { %8501 = vmatprep.mubr.msk.f32.mxu0 %vm9270_vm3, %v9269_v10 }
 0x523   :  { %8500 = vmatpush3.xpose.msk.msra.mxu0 %vm318_vm5, %v1147_v43 }
 0x524   :  { %8504 = vmatprep.subr.mxu0 %v9269_v10 }
 0x526   :  { %8502 = vmatmul.mubr.msk.f32.vlgmr.msra.gmra.mrb[12].mxu0 %vm318_vm5, %v1145_v44 }
 0x527   :  { %8506 = vmatprep.mubr.msk.f32.mxu0 %vm9270_vm3, %v9269_v10 }
 0x5e6   :  { %v478_v49 = vpop.f32.mrb[4].mxu0 }
 0x5e7   :  { %v8458_v50 = vpop.f32.mrb[5].mxu0 }
 0x5ea   :  { %v644_v51 = vpop.f32.mrb[6].mxu0 }
 0x5eb   :  { %v8468_v52 = vpop.f32.mrb[7].mxu0 }
 0x5ee   :  { %v811_v53 = vpop.f32.mrb[8].mxu0 }
 0x5ef   :  { %v8478_v54 = vpop.f32.mrb[9].mxu0  ;;  %8491 = vmatprep.mubr.msk.f32.mxu1 %vm318_vm5, %v811_v53 }
 0x5f2   :  { %v978_v55 = vpop.f32.mrb[10].mxu0 }
 0x5f3   :  { %v8488_v56 = vpop.f32.mrb[11].mxu0  ;;  %8492 = vmatmul.mubr.msk.f32.vlgmr.msra.gmra.mrb[10].mxu1 %vm318_vm5, %v978_v55 }
 0x5f4   :  { %8495 = vmatpush3.msra.mxu1 %v310_v48  ;;  %8496 = vmatprep.mubr.msk.f32.mxu1 %vm318_vm5, %v478_v49 }
 0x5f5   :  { %8509 = vmatprep.subr.mxu1 %v9269_v10 }
 0x5f9   :  { %v1218_v57 = vpop.f32.mrb[12].mxu0 }
 0x5fa   :  { %v1222_v58 = vmul.f32 0.35355338, %v1218_v57  ;;  %v8503_v59 = vpop.f32.mrb[13].mxu0 }
 0x5fb   :  { %8497 = vmatmul.mubr.msk.f32.vlgmr.msra.gmra.mrb[10].mxu1 %vm318_vm5, %v644_v51 }
 0x5fc   :  { %8510 = vmatpush3.xpose.msk.msra.mxu1 %vm318_vm5, %v1314_v60  ;;  %8511 = vmatprep.mubr.msk.f32.mxu1 %vm9270_vm3, %v9269_v10  ;;  %v1223_v61 = vadd.f32 %v1222_v58, %v9572_v46 }
 0x5fd   :  { %8519 = vmatprep.subr.mxu1 %v312_v20 }
 0x5fe   :  { %v1224_v63 = vsel %vm318_vm5, %v1223_v61, -inf }
 0x5ff   :  { %1225 = vmax.xlane.f32.xlu0 %v1224_v63  ;;  %8512 = vmatmul.mubr.msk.f32.vlgmr.msra.gmra.mrb[12].mxu1 %vm318_vm5, %v1312_v62 }
 0x600   :  { %8520 = vmatpush3.msra.mxu1 %v312_v20 }
 0x601   :  { %8529 = vmatprep.subr.mxu1 %v9269_v10 }
 0x68c   :  { %v1226_v0 = vpop.xlane.xlu0 %1225 }
 0x68d   :  { %v1227_v1 = vsub.f32 %v1223_v61, %v1226_v0 }
 0x68f   :  { %v1228_v2 = vmul.f32 1.442695, %v1227_v1 }
 0x691   :  { %9033 = vpow2.f32 %v1228_v2 }
 0x69b   :  { %v9034_v3 = vpop.eup %9033 }
 0x69c   :  { %v1230_v4 = vsel %vm318_vm5, %v9034_v3, 0.0 }
 0x69d   :  { %1231 = vadd.xlane.f32.xlu0 %v1230_v4 }
 0x6d2   :  { %v1385_v5 = vpop.f32.mrb[12].mxu1 }
 0x6d3   :  { %v1389_v6 = vmul.f32 0.35355338, %v1385_v5  ;;  %v8513_v7 = vpop.f32.mrb[13].mxu1 }
 0x6d5   :  { %v1390_v8 = vadd.f32 %v1389_v6, %v9572_v46  ;;  %v8008_v6 = vld [vmem:[#allocation5] ss:$0 sm:$0xff] }
 0x6d7   :  { %v1391_v9 = vsel %vm318_vm5, %v1390_v8, -inf }
 0x6d8   :  { %1392 = vmax.xlane.f32.xlu1 %v1391_v9 }
 0x6e9   :  { %1235 = vrot.lane.b32.xlu1 %v9533_v32, %s10494_s2 }
 0x6ed   :  { %1563 = vrot.lane.b32.xlu1 %v9533_v32, %s10500_s0 }
 0x6f1   :  { %1561 = vrot.lane.b32.xlu1 %v9533_v32, %s10502_s3 }
 0x6f5   :  { %1728 = vrot.lane.b32.xlu1 %v9539_v36, %s10502_s3  ;;  %s10527_s3 = sld [smem:[#allocation22_spill]] }
 0x72a   :  { %v1232_v11 = vpop.xlane.xlu0 %1231 }
 0x72b   :  { %9035 = vrcp.f32 %v1232_v11 }
 0x735   :  { %v9036_v13 = vpop.eup %9035 }
 0x736   :  { %v1234_v17 = vmul.f32 %v9036_v13, %v9034_v3 }
 0x765   :  { %v1393_v12 = vpop.xlane.xlu1 %1392 }
 0x766   :  { %v1394_v14 = vsub.f32 %v1390_v8, %v1393_v12 }
 0x768   :  { %v1395_v15 = vmul.f32 1.442695, %v1394_v14 }
 0x769   :  { %v1236_v16 = vpop.permute.xlu1 %1235 }
 0x76a   :  { %9037 = vpow2.f32 %v1395_v15  ;;  %8505 = vmatpush3.msra.mxu0 %v1236_v16 }
 0x76b   :  { %8507 = vmatmul.mubr.msk.f32.vlgmr.msra.gmra.mrb[14].mxu0 %vm318_vm5, %v1234_v17  ;;  %8514 = vmatprep.subr.mxu0 %v9269_v10 }
 0x76c   :  { %8516 = vmatprep.mubr.msk.f32.mxu0 %vm9270_vm3, %v9269_v10 }
 0x76d   :  { %v1564_v23 = vpop.permute.xlu1 %1563 }
 0x771   :  { %v1562_v27 = vpop.permute.xlu1 %1561 }
 0x774   :  { %v9038_v18 = vpop.eup %9037 }
 0x775   :  { %v1397_v19 = vsel %vm318_vm5, %v9038_v18, 0.0  ;;  %v1729_v30 = vpop.permute.xlu1 %1728 }
 0x776   :  { %1398 = vadd.xlane.f32.xlu0 %v1397_v19 }
 0x78c   :  { %1402 = vrot.lane.b32.xlu0 %v9539_v36, %s10494_s2 }
 0x790   :  { %1730 = vrot.lane.b32.xlu0 %v9539_v36, %s10500_s0 }
 0x803   :  { %v1399_v21 = vpop.xlane.xlu0 %1398 }
 0x804   :  { %9039 = vrcp.f32 %v1399_v21 }
 0x807   :  { %v1403_v22 = vpop.permute.xlu0 %1402 }
 0x808   :  { %8515 = vmatpush3.msra.mxu0 %v1403_v22 }
 0x809   :  { %8524 = vmatprep.subr.mxu0 %v9269_v10 }
 0x80b   :  { %v1731_v29 = vpop.permute.xlu0 %1730 }
 0x80e   :  { %v9040_v24 = vpop.eup %9039 }
 0x80f   :  { %v1401_v25 = vmul.f32 %v9040_v24, %v9038_v18 }
 0x811   :  { %8517 = vmatmul.mubr.msk.f32.vlgmr.msra.gmra.mrb[16].mxu0 %vm318_vm5, %v1401_v25  ;;  %v8996_v25 = vld [vmem:[%s10468_s12 + $0x8] sm:$0xff]  }
 0x812   :  { %8525 = vmatpush3.xpose.msk.msra.mxu0 %vm318_vm5, %v1564_v23  ;;  %8526 = vmatprep.mubr.msk.f32.mxu0 %vm9270_vm3, %v9269_v10 }
 0x813   :  { %8534 = vmatprep.subr.mxu0 %v9269_v10 }
 0x815   :  { %8527 = vmatmul.mubr.msk.f32.vlgmr.msra.gmra.mrb[18].mxu0 %vm318_vm5, %v1562_v27  ;;  %v236_v27 = vld [vmem:[%s10526_s27] sm:$0xff] }
 0x816   :  { %8535 = vmatpush3.xpose.msk.msra.mxu0 %vm318_vm5, %v1731_v29  ;;  %8536 = vmatprep.mubr.msk.f32.mxu0 %vm9270_vm3, %v9269_v10  ;;  %v237_v29 = vld [vmem:[%s10526_s27 + $0x8] sm:$0xff] }
 0x817   :  { %8549 = vmatprep.subr.bf16.mxu0 %v9269_v10 }
 0x819   :  { %8537 = vmatmul.mubr.msk.f32.vlgmr.msra.gmra.mrb[20].mxu0 %vm318_vm5, %v1729_v30  ;;  %v9724_v30 = vpack.c.bf16 %v237_v29, %v236_v27 }
 0x81a   :  { %8553 = vmatprep.mubr.msk.bf16.mxu0 %vm9270_vm3, %v9269_v10 }
 0x83e   :  { %v1307_v31 = vpop.f32.mrb[14].mxu0 }
 0x83f   :  { %v8508_v33 = vpop.f32.mrb[15].mxu0  ;;  %8521 = vmatprep.mubr.msk.f32.mxu1 %vm318_vm5, %v1307_v31  ;;  %v8997_v31 = vld [vmem:[%s10527_s3] sm:$0xff]  }
 0x840   :  { %8550 = vmatpush3.bf16.msra.mxu0 %v8997_v31  ;;  %v8998_v33 = vld [vmem:[%s10527_s3 + $0x8] sm:$0xff]  }
 0x841   :  { %8551 = vmatprep.subr.bf16.mxu0 %v9269_v10 }
 0x844   :  { %8552 = vmatpush3.bf16.msra.mxu0 %v8998_v33 }
 0x845   :  { %8565 = vmatprep.subr.mxu0 %v9269_v10 }
 0x8e4   :  { %v1474_v34 = vpop.f32.mrb[16].mxu0 }
 0x8e5   :  { %v8518_v35 = vpop.f32.mrb[17].mxu0  ;;  %8522 = vmatmul.mubr.msk.f32.vlgmr.msra.gmra.mrb[10].mxu1 %vm318_vm5, %v1474_v34 }
 0x8e6   :  { %8531 = vmatprep.mubr.msk.f32.mxu1 %vm9270_vm3, %v9269_v10 }
 0x8e8   :  { %v1635_v37 = vpop.f32.mrb[18].mxu0 }
 0x8e9   :  { %v1639_v38 = vmul.f32 0.35355338, %v1635_v37  ;;  %v8528_v39 = vpop.f32.mrb[19].mxu0 }
 0x8eb   :  { %v1640_v40 = vadd.f32 %v1639_v38, %v9572_v46 }
 0x8ec   :  { %v1802_v41 = vpop.f32.mrb[20].mxu0 }
 0x8ed   :  { %v1806_v42 = vmul.f32 0.35355338, %v1802_v41  ;;  %v8538_v43 = vpop.f32.mrb[21].mxu0  ;;  %v1641_v44 = vsel %vm318_vm5, %v1640_v40, -inf }
 0x8ee   :  { %1642 = vmax.xlane.f32.xlu0 %v1641_v44 }
 0x8ef   :  { %v1807_v47 = vadd.f32 %v1806_v42, %v9572_v46  ;;  %v8009_v42 = vld [vmem:[%s10476_s20] ss:$0 sm:$0xff] }
 0x8f1   :  { %v1808_v48 = vsel %vm318_vm5, %v1807_v47, -inf }
 0x8f2   :  { %1809 = vmax.xlane.f32.xlu1 %v1808_v48  ;;  %v8010_v48 = vld [vmem:[%s10477_s21] ss:$0 sm:$0xff] }
 0x903   :  { %1652 = vrot.lane.b32.xlu1 %v9533_v32, %s10492_s9 }
 0x97b   :  { %v1643_v49 = vpop.xlane.xlu0 %1642 }
 0x97c   :  { %v1644_v50 = vsub.f32 %v1640_v40, %v1643_v49 }
 0x97e   :  { %v1645_v51 = vmul.f32 1.442695, %v1644_v50 }
 0x97f   :  { %v1810_v52 = vpop.xlane.xlu1 %1809 }
 0x980   :  { %9041 = vpow2.f32 %v1645_v51  ;;  %v1811_v53 = vsub.f32 %v1807_v47, %v1810_v52 }
 0x982   :  { %v1812_v54 = vmul.f32 1.442695, %v1811_v53 }
 0x983   :  { %v1653_v55 = vpop.permute.xlu1 %1652 }
 0x984   :  { %9043 = vpow2.f32 %v1812_v54  ;;  %8530 = vmatpush3.msra.mxu1 %v1653_v55  ;;  %v8015_v54 = vld [vmem:[%s10469_s13] ss:$0 sm:$0xff] }
 0x985   :  { %8539 = vmatprep.subr.mxu1 %v9269_v10 }
 0x98a   :  { %v9042_v56 = vpop.eup %9041 }
 0x98b   :  { %v1647_v57 = vsel %vm318_vm5, %v9042_v56, 0.0 }
 0x98c   :  { %1648 = vadd.xlane.f32.xlu0 %v1647_v57 }
 0x98e   :  { %v9044_v58 = vpop.eup %9043 }
 0x98f   :  { %v1814_v59 = vsel %vm318_vm5, %v9044_v58, 0.0 }
 0x990   :  { %1815 = vadd.xlane.f32.xlu0 %v1814_v59 }
 0x9a6   :  { %1819 = vrot.lane.b32.xlu0 %v9539_v36, %s10492_s9  ;;  %v313_v36 = vld [vmem:[%s10525_s6 + $0x18] sm:$0xff]  ;;  %s10529_s9 = smov 104  }
 0xa19   :  { %v1649_v32 = vpop.xlane.xlu0 %1648 }
 0xa1a   :  { %9045 = vrcp.f32 %v1649_v32 }
 0xa1d   :  { %v1816_v60 = vpop.xlane.xlu0 %1815 }
 0xa1e   :  { %9047 = vrcp.f32 %v1816_v60  ;;  %v8011_v60 = vld [vmem:[#allocation7] ss:$0 sm:$0xff] }
 0xa21   :  { %v1820_v63 = vpop.permute.xlu0 %1819 }
 0xa24   :  { %v9046_v61 = vpop.eup %9045 }
 0xa25   :  { %v1651_v62 = vmul.f32 %v9046_v61, %v9042_v56 }
 0xa27   :  { %8532 = vmatmul.mubr.msk.f32.vlgmr.msra.gmra.mrb[14].mxu1 %vm318_vm5, %v1651_v62 }
 0xa28   :  { %v9048_v0 = vpop.eup %9047  ;;  %8540 = vmatpush3.msra.mxu1 %v1820_v63  ;;  %8541 = vmatprep.mubr.msk.f32.mxu1 %vm9270_vm3, %v9269_v10 }
 0xa29   :  { %v1818_v1 = vmul.f32 %v9048_v0, %v9044_v58  ;;  %8544 = vmatprep.subr.mxu1 %v313_v36 }
 0xa2b   :  { %8542 = vmatmul.mubr.msk.f32.vlgmr.msra.gmra.mrb[16].mxu1 %vm318_vm5, %v1818_v1 }
 0xa2c   :  { %8545 = vmatpush3.msra.mxu1 %v313_v36 }
 0xa2d   :  { %8557 = vmatprep.subr.bf16.mxu1 %v9269_v10 }
 0xafa   :  { %v1724_v2 = vpop.f32.mrb[14].mxu1 }
 0xafb   :  { %v8533_v3 = vpop.f32.mrb[15].mxu1  ;;  %8546 = vmatprep.mubr.msk.f32.mxu1 %vm318_vm5, %v1724_v2 }
 0xafe   :  { %v1891_v4 = vpop.f32.mrb[16].mxu1 }
 0xaff   :  { %v8543_v5 = vpop.f32.mrb[17].mxu1  ;;  %8547 = vmatmul.mubr.msk.f32.vlgmr.msra.gmra.mrb[10].mxu1 %vm318_vm5, %v1891_v4 }
 0xb00   :  { %8561 = vmatprep.mubr.msk.bf16.mxu1 %vm9270_vm3, %v9269_v10 }
 0xbd2   :  { %v8548_v7 = vpop.f32.mrb[10].mxu1 }
 0xbd3   :  { %v1985_v8 = vadd.f32 %v8548_v7, %v8008_v6  ;;  %v1967_v9 = vpop.f32.mrb[11].mxu1 }
 0xbd4   :  { %v1984_v11 = vadd.f32 %v8008_v6, %v1967_v9  ;;  %v238_v6 = vld [vmem:[%s10528_s7] sm:$0xff]  ;;  %s10532_s7 = smov 56  }
 0xbd5   :  { %v1987_v12 = vadd.f32 %v1985_v8, %v9524_v26  ;;  %vm239_vm7 = vcmp.gt.f32.partialorder %v238_v6, 0.0 }
 0xbd6   :  { %v1986_v13 = vadd.f32 %v1984_v11, %v9526_v28  ;;  %v8995_v28 = vld [vmem:[%s10468_s12] sm:$0xff]   ;;  %v9798_v8 = vsel %vm239_vm7, 0.0, %v9274_v45 }
 0xbd7   :  { %v1993_v14 = vsel %vm265_vm4, %v1987_v12, 0.0  ;;  %8558 = vmatpush3.bf16.msra.mxu1 %v8995_v28 }
 0xbd8   :  { %1994 = vadd.xlane.f32.xlu0 %v1993_v14  ;;  %v1990_v15 = vsel %vm265_vm4, %v1986_v13, 0.0  ;;  %8559 = vmatprep.subr.bf16.mxu1 %v9269_v10 }
 0xbd9   :  { %1991 = vadd.xlane.f32.xlu1 %v1990_v15 }
 0xbdb   :  { %8560 = vmatpush3.bf16.msra.mxu1 %v8996_v25 }
 0xbdc   :  { %8575 = vmatprep.subr.mxu1 %v9269_v10 }
 0xbde   :  { %8562 = vmatmul.mubr.msk.bf16.vlgmr.msra.gmra.mrb[20].mxu1 %vm265_vm4, %v9724_v30 }
 0xbdf   :  { %8577 = vmatprep.mubr.msk.f32.mxu1 %vm9270_vm3, %v9269_v10 }
 0xc65   :  { %v1995_v16 = vpop.xlane.xlu0 %1994 }
 0xc66   :  { %v1998_v17 = vmul.f32 0.03125, %v1995_v16  ;;  %v1992_v18 = vpop.xlane.xlu1 %1991 }
 0xc67   :  { %v1997_v19 = vmul.f32 0.03125, %v1992_v18 }
 0xc68   :  { %v2000_v20 = vsub.f32 %v1987_v12, %v1998_v17 }
 0xc69   :  { %v1999_v21 = vsub.f32 %v1986_v13, %v1997_v19 }
 0xc6a   :  { %v2002_v22 = vmul.f32 %v2000_v20, %v2000_v20 }
 0xc6b   :  { %v2001_v23 = vmul.f32 %v1999_v21, %v1999_v21 }
 0xc6c   :  { %v2006_v24 = vsel %vm265_vm4, %v2002_v22, 0.0 }
 0xc6d   :  { %2007 = vadd.xlane.f32.xlu0 %v2006_v24  ;;  %v2003_v26 = vsel %vm265_vm4, %v2001_v23, 0.0 }
 0xc6e   :  { %2004 = vadd.xlane.f32.xlu1 %v2003_v26 }
 0xcb1   :  { %v2162_v55 = vpop.f32.mrb[20].mxu1 }
 0xcb2   :  { %v9757_v56 = vadd.f32 %v8015_v54, %v2162_v55  ;;  %v8563_v57 = vpop.f32.mrb[21].mxu1 }
 0xcb3   :  { %v2165_v58 = vpop.f32.mrb[22].mxu1 }
 0xcb4   :  { %v9759_v59 = vadd.f32 %v8015_v54, %v2165_v58  ;;  %2506 = vrot.lane.b32.xlu1 %v9757_v56, %s9273_s28  ;;  %v8564_v32 = vpop.f32.mrb[23].mxu1 }
 0xcb6   :  { %8576 = vmatpush3.xpose.msk.msra.mxu1 %vm318_vm5, %v9759_v59 }
 0xcb7   :  { %8585 = vmatprep.subr.mxu1 %v9269_v10 }
 0xcb8   :  { %2673 = vrot.lane.b32.xlu1 %v9759_v59, %s9273_s28 }
 0xcfa   :  { %v2008_v34 = vpop.xlane.xlu0 %2007 }
 0xcfb   :  { %v2010_v35 = vmul.f32 0.03125, %v2008_v34  ;;  %v2005_v37 = vpop.xlane.xlu1 %2004 }
 0xcfc   :  { %v2009_v38 = vmul.f32 0.03125, %v2005_v37 }
 0xcfd   :  { %v2012_v39 = vadd.f32 1e-05, %v2010_v35 }
 0xcfe   :  { %v2011_v40 = vadd.f32 1e-05, %v2009_v38 }
 0xcff   :  { %9049 = vrsqrt.f32 %v2012_v39 }
 0xd00   :  { %9051 = vrsqrt.f32 %v2011_v40 }
 0xd09   :  { %v9050_v41 = vpop.eup %9049 }
 0xd0a   :  { %v9052_v43 = vpop.eup %9051  ;;  %v2016_v44 = vmul.f32 %v9050_v41, %v2000_v20 }
 0xd0b   :  { %v2015_v47 = vmul.f32 %v9052_v43, %v1999_v21 }
 0xd0c   :  { %v2024_v49 = vmul.f32 %v8009_v42, %v2016_v44 }
 0xd0d   :  { %v2023_v50 = vmul.f32 %v8009_v42, %v2015_v47 }
 0xd0e   :  { %v9745_v51 = vadd.f32 %v8010_v48, %v2024_v49 }
 0xd0f   :  { %v9747_v52 = vadd.f32 %v8010_v48, %v2023_v50 }
 0xd11   :  { %v2033_v53 = vpack.c.bf16 %v9745_v51, %v9747_v52 }
 0xd13   :  { %8554 = vmatmul.mubr.msk.bf16.vlgmr.msra.gmra.mrb[24].mxu0 %vm265_vm4, %v2033_v53 }
 0xd14   :  { %8567 = vmatprep.mubr.msk.f32.mxu0 %vm9270_vm3, %v9269_v10  ;;  %8566 = vmatpush3.xpose.msk.msra.mxu0 %vm318_vm5, %v9757_v56 }
 0xd15   :  { %8570 = vmatprep.subr.mxu0 %v9269_v10 }
 0xd26   :  { %v2507_v2 = vpop.permute.xlu1 %2506 }
 0xd2a   :  { %v2674_v3 = vpop.permute.xlu1 %2673 }
 0xde6   :  { %v2094_v61 = vpop.f32.mrb[24].mxu0 }
 0xde7   :  { %v9771_v62 = vadd.f32 %v8011_v60, %v2094_v61  ;;  %v8555_v63 = vpop.f32.mrb[25].mxu0 }
 0xde8   :  { %v2097_v0 = vpop.f32.mrb[26].mxu0 }
 0xde9   :  { %v9773_v1 = vadd.f32 %v8011_v60, %v2097_v0  ;;  %2504 = vrot.lane.b32.xlu0 %v9771_v62, %s9273_s28  ;;  %v8556_v36 = vpop.f32.mrb[27].mxu0  ;;  %8568 = vmatmul.mubr.msk.f32.vlgmr.msra.gmra.mrb[22].mxu0 %vm318_vm5, %v9771_v62 }
 0xdea   :  { %8572 = vmatprep.mubr.msk.f32.mxu0 %vm9270_vm3, %v9269_v10 }
 0xdeb   :  { %2671 = vrot.lane.b32.xlu1 %v9773_v1, %s9273_s28  ;;  %8578 = vmatmul.mubr.msk.f32.vlgmr.msra.gmra.mrb[18].mxu1 %vm318_vm5, %v9773_v1 }
 0xdec   :  { %8586 = vmatpush3.xpose.msk.msra.mxu1 %vm318_vm5, %v2507_v2  ;;  %8587 = vmatprep.mubr.msk.f32.mxu1 %vm9270_vm3, %v9269_v10 }
 0xded   :  { %8595 = vmatprep.subr.mxu1 %v9269_v10 }
 0xe5b   :  { %v2505_v4 = vpop.permute.xlu0 %2504 }
 0xe5c   :  { %8588 = vmatmul.mubr.msk.f32.vlgmr.msra.gmra.mrb[24].mxu1 %vm318_vm5, %v2505_v4 }
 0xe5d   :  { %8596 = vmatpush3.xpose.msk.msra.mxu1 %vm318_vm5, %v2674_v3  ;;  %8597 = vmatprep.mubr.msk.f32.mxu1 %vm9270_vm3, %v9269_v10  ;;  %v2672_v5 = vpop.permute.xlu1 %2671 }
 0xe60   :  { %8598 = vmatmul.mubr.msk.f32.vlgmr.msra.gmra.mrb[26].mxu1 %vm318_vm5, %v2672_v5 }
 0xebc   :  { %v2246_v7 = vpop.f32.mrb[22].mxu0 }
 0xebd   :  { %v2250_v9 = vmul.f32 0.35355338, %v2246_v7  ;;  %v8569_v11 = vpop.f32.mrb[23].mxu0 }
 0xebe   :  { %v2411_v12 = vpop.f32.mrb[18].mxu1 }
 0xebf   :  { %v2415_v13 = vmul.f32 0.35355338, %v2411_v12  ;;  %v8579_v14 = vpop.f32.mrb[19].mxu1  ;;  %v2251_v15 = vadd.f32 %v2250_v9, %v9798_v8 }
 0xec0   :  { %v2169_v14 = vld [vmem:[%s10470_s14] sm:$0xff] }
 0xec1   :  { %v2252_v16 = vsel %vm318_vm5, %v2251_v15, -inf  ;;  %v2416_v17 = vadd.f32 %v2415_v13, %v9798_v8  ;;  %v2170_v13 = vld [vmem:[%s10470_s14 + $0x8] sm:$0xff] }
 0xec2   :  { %2253 = vmax.xlane.f32.xlu0 %v2252_v16  ;;  %8605 = vmatprep.subr.mxu1 %v2170_v13 }
 0xec3   :  { %v2417_v18 = vsel %vm318_vm5, %v2416_v17, -inf  ;;  %8606 = vmatpush3.msra.mxu1 %v2170_v13 }
 0xec4   :  { %2418 = vmax.xlane.f32.xlu1 %v2417_v18  ;;  %8610 = vmatprep.subr.mxu1 %v2169_v14 }
 0xed5   :  { %2263 = vrot.lane.b32.xlu1 %v9757_v56, %s9272_s10 }
 0xf2f   :  { %v2578_v45 = vpop.f32.mrb[24].mxu1 }
 0xf30   :  { %v2582_v19 = vmul.f32 0.35355338, %v2578_v45  ;;  %v8589_v20 = vpop.f32.mrb[25].mxu1 }
 0xf32   :  { %v2583_v21 = vadd.f32 %v2582_v19, %v9798_v8 }
 0xf33   :  { %v2745_v22 = vpop.f32.mrb[26].mxu1 }
 0xf34   :  { %v2749_v23 = vmul.f32 0.35355338, %v2745_v22  ;;  %v8599_v24 = vpop.f32.mrb[27].mxu1  ;;  %v2584_v26 = vsel %vm318_vm5, %v2583_v21, -inf }
 0xf35   :  { %2585 = vmax.xlane.f32.xlu0 %v2584_v26 }
 0xf36   :  { %v2750_v28 = vadd.f32 %v2749_v23, %v9798_v8 }
 0xf38   :  { %v2751_v25 = vsel %vm318_vm5, %v2750_v28, -inf }
 0xf39   :  { %2752 = vmax.xlane.f32.xlu0 %v2751_v25 }
 0xf4f   :  { %v2254_v27 = vpop.xlane.xlu0 %2253 }
 0xf50   :  { %v2255_v29 = vsub.f32 %v2251_v15, %v2254_v27 }
 0xf51   :  { %v2419_v31 = vpop.xlane.xlu1 %2418 }
 0xf52   :  { %v2256_v33 = vmul.f32 1.442695, %v2255_v29  ;;  %v2420_v34 = vsub.f32 %v2416_v17, %v2419_v31 }
 0xf54   :  { %9053 = vpow2.f32 %v2256_v33  ;;  %v2421_v35 = vmul.f32 1.442695, %v2420_v34 }
 0xf55   :  { %v2264_v37 = vpop.permute.xlu1 %2263 }
 0xf56   :  { %9055 = vpow2.f32 %v2421_v35  ;;  %8571 = vmatpush3.msra.mxu0 %v2264_v37 }
 0xf57   :  { %8580 = vmatprep.subr.mxu0 %v9269_v10 }
 0xf5e   :  { %v9054_v38 = vpop.eup %9053 }
 0xf5f   :  { %v2258_v39 = vsel %vm318_vm5, %v9054_v38, 0.0 }
 0xf60   :  { %v9056_v40 = vpop.eup %9055  ;;  %2259 = vadd.xlane.f32.xlu1 %v2258_v39 }
 0xf61   :  { %v2423_v41 = vsel %vm318_vm5, %v9056_v40, 0.0 }
 0xf62   :  { %2424 = vadd.xlane.f32.xlu0 %v2423_v41 }
 0xfc2   :  { %v2586_v42 = vpop.xlane.xlu0 %2585 }
 0xfc3   :  { %v2587_v43 = vsub.f32 %v2583_v21, %v2586_v42 }
 0xfc5   :  { %v2588_v44 = vmul.f32 1.442695, %v2587_v43 }
 0xfc6   :  { %v2753_v47 = vpop.xlane.xlu0 %2752 }
 0xfc7   :  { %9057 = vpow2.f32 %v2588_v44  ;;  %v2754_v48 = vsub.f32 %v2750_v28, %v2753_v47 }
 0xfc9   :  { %v2755_v49 = vmul.f32 1.442695, %v2754_v48 }
 0xfcb   :  { %9059 = vpow2.f32 %v2755_v49 }
 0xfd1   :  { %v9058_v50 = vpop.eup %9057 }
 0xfd2   :  { %v2590_v53 = vsel %vm318_vm5, %v9058_v50, 0.0 }
 0xfd3   :  { %2591 = vadd.xlane.f32.xlu1 %v2590_v53  ;;  %v2171_v53 = vld [vmem:[%s10470_s14 + $0x10] sm:$0xff] }
 0xfd5   :  { %v9060_v54 = vpop.eup %9059 }
 0xfd6   :  { %v2757_v55 = vsel %vm318_vm5, %v9060_v54, 0.0 }
 0xfd7   :  { %2758 = vadd.xlane.f32.xlu0 %v2757_v55 }
 0xfe4   :  { %2595 = vrot.lane.b32.xlu1 %v9757_v56, %s9271_s5 }
 0xfe8   :  { %2762 = vrot.lane.b32.xlu1 %v9759_v59, %s9271_s5 }
 0xfec   :  { %3000 = vrot.lane.b32.xlu1 %v9771_v62, %s9277_s4 }
 0xfed   :  { %2428 = vrot.lane.b32.xlu0 %v9759_v59, %s9272_s10  ;;  %v2260_v57 = vpop.xlane.xlu1 %2259 }
 0xfee   :  { %9061 = vrcp.f32 %v2260_v57 }
 0xfef   :  { %v2425_v60 = vpop.xlane.xlu0 %2424 }
 0xff0   :  { %3167 = vrot.lane.b32.xlu1 %v9773_v1, %s9277_s4  ;;  %9063 = vrcp.f32 %v2425_v60 }
 0xff1   :  { %3002 = vrot.lane.b32.xlu0 %v9757_v56, %s9277_s4 }
 0xff5   :  { %3169 = vrot.lane.b32.xlu0 %v9759_v59, %s9277_s4 }
 0xff8   :  { %v9062_v58 = vpop.eup %9061 }
 0xff9   :  { %v2262_v32 = vmul.f32 %v9062_v58, %v9054_v38 }
 0xffa   :  { %v9064_v0 = vpop.eup %9063 }
 0xffb   :  { %8573 = vmatmul.mubr.msk.f32.vlgmr.msra.gmra.mrb[28].mxu0 %vm318_vm5, %v2262_v32  ;;  %v2427_v3 = vmul.f32 %v9064_v0, %v9056_v40 }
 0xffc   :  { %8582 = vmatprep.mubr.msk.f32.mxu0 %vm9270_vm3, %v9269_v10 }
0x1060   :  { %v2592_v61 = vpop.xlane.xlu1 %2591 }
0x1061   :  { %9065 = vrcp.f32 %v2592_v61 }
0x1064   :  { %v2759_v63 = vpop.xlane.xlu0 %2758  ;;  %v2596_v36 = vpop.permute.xlu1 %2595 }
0x1065   :  { %9067 = vrcp.f32 %v2759_v63 }
0x1068   :  { %v2429_v2 = vpop.permute.xlu0 %2428  ;;  %v2763_v6 = vpop.permute.xlu1 %2762 }
0x1069   :  { %8581 = vmatpush3.msra.mxu0 %v2429_v2 }
0x106a   :  { %8583 = vmatmul.mubr.msk.f32.vlgmr.msra.gmra.mrb[30].mxu0 %vm318_vm5, %v2427_v3  ;;  %8590 = vmatprep.subr.mxu0 %v9269_v10 }
0x106b   :  { %v9066_v4 = vpop.eup %9065  ;;  %8591 = vmatpush3.msra.mxu0 %v2596_v36  ;;  %8592 = vmatprep.mubr.msk.f32.mxu0 %vm9270_vm3, %v9269_v10 }
0x106c   :  { %8600 = vmatprep.subr.mxu0 %v9269_v10  ;;  %v2594_v5 = vmul.f32 %v9066_v4, %v9058_v50  ;;  %v3003_v11 = vpop.permute.xlu0 %3002  ;;  %v3001_v12 = vpop.permute.xlu1 %3000 }
0x106e   :  { %8593 = vmatmul.mubr.msk.f32.vlgmr.msra.gmra.mrb[32].mxu0 %vm318_vm5, %v2594_v5 }
0x106f   :  { %v9068_v7 = vpop.eup %9067  ;;  %8601 = vmatpush3.msra.mxu0 %v2763_v6  ;;  %8602 = vmatprep.mubr.msk.f32.mxu0 %vm9270_vm3, %v9269_v10 }
0x1070   :  { %v2761_v9 = vmul.f32 %v9068_v7, %v9060_v54  ;;  %8615 = vmatprep.subr.mxu0 %v9269_v10  ;;  %v3170_v26 = vpop.permute.xlu0 %3169  ;;  %v3168_v25 = vpop.permute.xlu1 %3167 }
0x1072   :  { %8603 = vmatmul.mubr.msk.f32.vlgmr.msra.gmra.mrb[34].mxu0 %vm318_vm5, %v2761_v9 }
0x1073   :  { %8617 = vmatprep.mubr.msk.f32.mxu0 %vm9270_vm3, %v9269_v10 }
0x1076   :  { %8616 = vmatpush3.xpose.msk.msra.mxu0 %vm318_vm5, %v3003_v11 }
0x1077   :  { %8620 = vmatprep.subr.mxu0 %v9269_v10 }
0x1079   :  { %8618 = vmatmul.mubr.msk.f32.vlgmr.msra.gmra.mrb[36].mxu0 %vm318_vm5, %v3001_v12 }
0x107a   :  { %8622 = vmatprep.mubr.msk.f32.mxu0 %vm9270_vm3, %v9269_v10 }
0x10ce   :  { %v2335_v15 = vpop.f32.mrb[28].mxu0 }
0x10cf   :  { %v8574_v16 = vpop.f32.mrb[29].mxu0 }
0x113d   :  { %v2500_v17 = vpop.f32.mrb[30].mxu0 }
0x113e   :  { %v8584_v18 = vpop.f32.mrb[31].mxu0 }
0x1141   :  { %v2667_v45 = vpop.f32.mrb[32].mxu0 }
0x1142   :  { %v8594_v19 = vpop.f32.mrb[33].mxu0  ;;  %8607 = vmatprep.mubr.msk.f32.mxu1 %vm318_vm5, %v2667_v45 }
0x1145   :  { %v2834_v20 = vpop.f32.mrb[34].mxu0 }
0x1146   :  { %v8604_v21 = vpop.f32.mrb[35].mxu0  ;;  %8608 = vmatmul.mubr.msk.f32.vlgmr.msra.gmra.mrb[28].mxu1 %vm318_vm5, %v2834_v20 }
0x1147   :  { %8611 = vmatpush3.msra.mxu1 %v2169_v14  ;;  %8612 = vmatprep.mubr.msk.f32.mxu1 %vm318_vm5, %v2335_v15 }
0x1148   :  { %8625 = vmatprep.subr.mxu1 %v9269_v10 }
0x114c   :  { %v3074_v22 = vpop.f32.mrb[36].mxu0 }
0x114d   :  { %v3078_v23 = vmul.f32 0.35355338, %v3074_v22  ;;  %v8619_v24 = vpop.f32.mrb[37].mxu0 }
0x114e   :  { %8613 = vmatmul.mubr.msk.f32.vlgmr.msra.gmra.mrb[28].mxu1 %vm318_vm5, %v2500_v17 }
0x114f   :  { %8626 = vmatpush3.xpose.msk.msra.mxu1 %vm318_vm5, %v3170_v26  ;;  %8627 = vmatprep.mubr.msk.f32.mxu1 %vm9270_vm3, %v9269_v10  ;;  %v3079_v28 = vadd.f32 %v3078_v23, %v9798_v8 }
0x1150   :  { %8635 = vmatprep.subr.mxu1 %v2171_v53 }
0x1151   :  { %v3080_v27 = vsel %vm318_vm5, %v3079_v28, -inf }
0x1152   :  { %3081 = vmax.xlane.f32.xlu0 %v3080_v27  ;;  %8628 = vmatmul.mubr.msk.f32.vlgmr.msra.gmra.mrb[30].mxu1 %vm318_vm5, %v3168_v25 }
0x1153   :  { %8636 = vmatpush3.msra.mxu1 %v2171_v53 }
0x1154   :  { %8645 = vmatprep.subr.mxu1 %v9269_v10 }
0x11df   :  { %v3082_v29 = vpop.xlane.xlu0 %3081 }
0x11e0   :  { %v3083_v31 = vsub.f32 %v3079_v28, %v3082_v29 }
0x11e2   :  { %v3084_v33 = vmul.f32 1.442695, %v3083_v31 }
0x11e4   :  { %9069 = vpow2.f32 %v3084_v33 }
0x11ee   :  { %v9070_v34 = vpop.eup %9069 }
0x11ef   :  { %v3086_v35 = vsel %vm318_vm5, %v9070_v34, 0.0 }
0x11f0   :  { %3087 = vadd.xlane.f32.xlu0 %v3086_v35 }
0x1225   :  { %v3241_v37 = vpop.f32.mrb[30].mxu1 }
0x1226   :  { %v3245_v38 = vmul.f32 0.35355338, %v3241_v37  ;;  %v8629_v39 = vpop.f32.mrb[31].mxu1 }
0x1227   :  { %v8051_v39 = vld [vmem:[%s10471_s15] ss:$0 sm:$0xff] }
0x1228   :  { %v3246_v40 = vadd.f32 %v3245_v38, %v9798_v8 }
0x122a   :  { %v3247_v41 = vsel %vm318_vm5, %v3246_v40, -inf }
0x122b   :  { %3248 = vmax.xlane.f32.xlu1 %v3247_v41 }
0x123c   :  { %3091 = vrot.lane.b32.xlu1 %v9757_v56, %s10504_s30 }
0x1240   :  { %3419 = vrot.lane.b32.xlu1 %v9757_v56, %s10529_s9 }
0x1244   :  { %3417 = vrot.lane.b32.xlu1 %v9771_v62, %s10529_s9 }
0x1248   :  { %3584 = vrot.lane.b32.xlu1 %v9773_v1, %s10529_s9 }
0x127d   :  { %v3088_v42 = vpop.xlane.xlu0 %3087 }
0x127e   :  { %9071 = vrcp.f32 %v3088_v42 }
0x1288   :  { %v9072_v44 = vpop.eup %9071 }
0x1289   :  { %v3090_v50 = vmul.f32 %v9072_v44, %v9070_v34 }
0x12b8   :  { %v3249_v43 = vpop.xlane.xlu1 %3248 }
0x12b9   :  { %v3250_v47 = vsub.f32 %v3246_v40, %v3249_v43 }
0x12bb   :  { %v3251_v48 = vmul.f32 1.442695, %v3250_v47 }
0x12bc   :  { %v3092_v49 = vpop.permute.xlu1 %3091 }
0x12bd   :  { %9073 = vpow2.f32 %v3251_v48  ;;  %8621 = vmatpush3.msra.mxu0 %v3092_v49 }
0x12be   :  { %8623 = vmatmul.mubr.msk.f32.vlgmr.msra.gmra.mrb[38].mxu0 %vm318_vm5, %v3090_v50  ;;  %8630 = vmatprep.subr.mxu0 %v9269_v10 }
0x12bf   :  { %8632 = vmatprep.mubr.msk.f32.mxu0 %vm9270_vm3, %v9269_v10 }
0x12c0   :  { %v3420_v57 = vpop.permute.xlu1 %3419 }
0x12c4   :  { %v3418_v60 = vpop.permute.xlu1 %3417 }
0x12c7   :  { %v9074_v62 = vpop.eup %9073 }
0x12c8   :  { %v3253_v1 = vsel %vm318_vm5, %v9074_v62, 0.0  ;;  %v3585_v63 = vpop.permute.xlu1 %3584 }
0x12c9   :  { %3254 = vadd.xlane.f32.xlu0 %v3253_v1 }
0x12df   :  { %3258 = vrot.lane.b32.xlu0 %v9759_v59, %s10504_s30 }
0x12e3   :  { %3586 = vrot.lane.b32.xlu0 %v9759_v59, %s10529_s9 }
0x1356   :  { %v3255_v54 = vpop.xlane.xlu0 %3254 }
0x1357   :  { %9075 = vrcp.f32 %v3255_v54 }
0x135a   :  { %v3259_v55 = vpop.permute.xlu0 %3258 }
0x135b   :  { %8631 = vmatpush3.msra.mxu0 %v3259_v55 }
0x135c   :  { %8640 = vmatprep.subr.mxu0 %v9269_v10 }
0x135e   :  { %v3587_v61 = vpop.permute.xlu0 %3586 }
0x1361   :  { %v9076_v58 = vpop.eup %9075 }
0x1362   :  { %v3257_v32 = vmul.f32 %v9076_v58, %v9074_v62 }
0x1364   :  { %8633 = vmatmul.mubr.msk.f32.vlgmr.msra.gmra.mrb[40].mxu0 %vm318_vm5, %v3257_v32 }
0x1365   :  { %8641 = vmatpush3.xpose.msk.msra.mxu0 %vm318_vm5, %v3420_v57  ;;  %8642 = vmatprep.mubr.msk.f32.mxu0 %vm9270_vm3, %v9269_v10 }
0x1366   :  { %8650 = vmatprep.subr.mxu0 %v9269_v10 }
0x1368   :  { %8643 = vmatmul.mubr.msk.f32.vlgmr.msra.gmra.mrb[42].mxu0 %vm318_vm5, %v3418_v60  ;;  %v9000_v60 = vld [vmem:[%s10472_s16 + $0x8] sm:$0xff]  }
0x1369   :  { %8651 = vmatpush3.xpose.msk.msra.mxu0 %vm318_vm5, %v3587_v61  ;;  %8652 = vmatprep.mubr.msk.f32.mxu0 %vm9270_vm3, %v9269_v10  ;;  %v9001_v61 = vld [vmem:[%s10474_s18] sm:$0xff]  }
0x136a   :  { %8665 = vmatprep.subr.bf16.mxu0 %v9269_v10 }
0x136c   :  { %8653 = vmatmul.mubr.msk.f32.vlgmr.msra.gmra.mrb[44].mxu0 %vm318_vm5, %v3585_v63  ;;  %v9002_v63 = vld [vmem:[%s10474_s18 + $0x8] sm:$0xff]  }
0x136d   :  { %8669 = vmatprep.mubr.msk.bf16.mxu0 %vm9270_vm3, %v9269_v10 }
0x1391   :  { %v3163_v0 = vpop.f32.mrb[38].mxu0 }
0x1392   :  { %v8624_v36 = vpop.f32.mrb[39].mxu0  ;;  %8637 = vmatprep.mubr.msk.f32.mxu1 %vm318_vm5, %v3163_v0 }
0x1437   :  { %v3330_v2 = vpop.f32.mrb[40].mxu0 }
0x1438   :  { %v8634_v3 = vpop.f32.mrb[41].mxu0  ;;  %8638 = vmatmul.mubr.msk.f32.vlgmr.msra.gmra.mrb[28].mxu1 %vm318_vm5, %v3330_v2 }
0x1439   :  { %8647 = vmatprep.mubr.msk.f32.mxu1 %vm9270_vm3, %v9269_v10 }
0x143b   :  { %v3491_v4 = vpop.f32.mrb[42].mxu0 }
0x143c   :  { %v3495_v5 = vmul.f32 0.35355338, %v3491_v4  ;;  %v8644_v6 = vpop.f32.mrb[43].mxu0 }
0x143e   :  { %v3496_v7 = vadd.f32 %v3495_v5, %v9798_v8 }
0x143f   :  { %v3658_v9 = vpop.f32.mrb[44].mxu0 }
0x1440   :  { %v3662_v11 = vmul.f32 0.35355338, %v3658_v9  ;;  %v8654_v12 = vpop.f32.mrb[45].mxu0  ;;  %v3497_v13 = vsel %vm318_vm5, %v3496_v7, -inf }
0x1441   :  { %3498 = vmax.xlane.f32.xlu0 %v3497_v13  ;;  %v8053_v13 = vld [vmem:[%s10479_s23] ss:$0 sm:$0xff] }
0x1442   :  { %v3663_v14 = vadd.f32 %v3662_v11, %v9798_v8 }
0x1444   :  { %v3664_v15 = vsel %vm318_vm5, %v3663_v14, -inf }
0x1445   :  { %3665 = vmax.xlane.f32.xlu1 %v3664_v15 }
0x1456   :  { %3508 = vrot.lane.b32.xlu1 %v9757_v56, %s10530_s1 }
0x14ce   :  { %v3499_v16 = vpop.xlane.xlu0 %3498 }
0x14cf   :  { %v3500_v17 = vsub.f32 %v3496_v7, %v3499_v16  ;;  %v8052_v7 = vld [vmem:[%s10478_s22] ss:$0 sm:$0xff] }
0x14d1   :  { %v3501_v18 = vmul.f32 1.442695, %v3500_v17 }
0x14d2   :  { %v3666_v45 = vpop.xlane.xlu1 %3665 }
0x14d3   :  { %9077 = vpow2.f32 %v3501_v18  ;;  %v3667_v19 = vsub.f32 %v3663_v14, %v3666_v45  ;;  %v9003_v45 = vld [vmem:[%s10474_s18 + $0x10] sm:$0xff]  }
0x14d5   :  { %v3668_v20 = vmul.f32 1.442695, %v3667_v19  ;;  %v9004_v19 = vld [vmem:[%s10474_s18 + $0x18] sm:$0xff]  }
0x14d6   :  { %v3509_v21 = vpop.permute.xlu1 %3508 }
0x14d7   :  { %9079 = vpow2.f32 %v3668_v20  ;;  %8646 = vmatpush3.msra.mxu1 %v3509_v21  ;;  %v8054_v20 = vld [vmem:[%s10473_s17] ss:$0 sm:$0xff] }
0x14d8   :  { %8655 = vmatprep.subr.mxu1 %v9269_v10 }
0x14dd   :  { %v9078_v22 = vpop.eup %9077 }
0x14de   :  { %v3503_v23 = vsel %vm318_vm5, %v9078_v22, 0.0 }
0x14df   :  { %3504 = vadd.xlane.f32.xlu0 %v3503_v23 }
0x14e1   :  { %v9080_v24 = vpop.eup %9079 }
0x14e2   :  { %v3670_v26 = vsel %vm318_vm5, %v9080_v24, 0.0 }
0x14e3   :  { %3671 = vadd.xlane.f32.xlu0 %v3670_v26 }
0x14f9   :  { %3675 = vrot.lane.b32.xlu0 %v9759_v59, %s10530_s1  ;;  %v2172_v59 = vld [vmem:[%s10470_s14 + $0x18] sm:$0xff] }
0x156c   :  { %v3505_v56 = vpop.xlane.xlu0 %3504 }
0x156d   :  { %9081 = vrcp.f32 %v3505_v56 }
0x1570   :  { %v3672_v28 = vpop.xlane.xlu0 %3671 }
0x1571   :  { %9083 = vrcp.f32 %v3672_v28 }
0x1574   :  { %v3676_v29 = vpop.permute.xlu0 %3675 }
0x1577   :  { %v9082_v25 = vpop.eup %9081 }
0x1578   :  { %v3507_v27 = vmul.f32 %v9082_v25, %v9078_v22 }
0x157a   :  { %8648 = vmatmul.mubr.msk.f32.vlgmr.msra.gmra.mrb[32].mxu1 %vm318_vm5, %v3507_v27 }
0x157b   :  { %v9084_v31 = vpop.eup %9083  ;;  %8656 = vmatpush3.msra.mxu1 %v3676_v29  ;;  %8657 = vmatprep.mubr.msk.f32.mxu1 %vm9270_vm3, %v9269_v10  ;;  %v8058_v29 = vld [vmem:[%s10475_s19] ss:$0 sm:$0xff] }
0x157c   :  { %v3674_v33 = vmul.f32 %v9084_v31, %v9080_v24  ;;  %8660 = vmatprep.subr.mxu1 %v2172_v59 }
0x157e   :  { %8658 = vmatmul.mubr.msk.f32.vlgmr.msra.gmra.mrb[34].mxu1 %vm318_vm5, %v3674_v33 }
0x157f   :  { %8661 = vmatpush3.msra.mxu1 %v2172_v59 }
0x1580   :  { %8673 = vmatprep.subr.bf16.mxu1 %v9269_v10 }
0x164d   :  { %v3580_v34 = vpop.f32.mrb[32].mxu1 }
0x164e   :  { %v8649_v35 = vpop.f32.mrb[33].mxu1  ;;  %8662 = vmatprep.mubr.msk.f32.mxu1 %vm318_vm5, %v3580_v34 }
0x1651   :  { %v3747_v37 = vpop.f32.mrb[34].mxu1 }
0x1652   :  { %v8659_v38 = vpop.f32.mrb[35].mxu1  ;;  %8663 = vmatmul.mubr.msk.f32.vlgmr.msra.gmra.mrb[28].mxu1 %vm318_vm5, %v3747_v37 }
0x1653   :  { %8681 = vmatprep.mubr.msk.bf16.mxu1 %vm9270_vm3, %v9269_v10  ;;  %8674 = vmatpush3.bf16.msra.mxu1 %v9001_v61 }
0x1654   :  { %8675 = vmatprep.subr.bf16.mxu1 %v9269_v10 }
0x1657   :  { %8676 = vmatpush3.bf16.msra.mxu1 %v9002_v63  ;;  %v8064_v63 = vld [vmem:[%s10480_s24] ss:$0 sm:$0xff] }
0x1658   :  { %8677 = vmatprep.subr.bf16.mxu1 %v9269_v10 }
0x165b   :  { %8678 = vmatpush3.bf16.msra.mxu1 %v9003_v45 }
0x165c   :  { %8679 = vmatprep.subr.bf16.mxu1 %v9269_v10 }
0x165f   :  { %8680 = vmatpush3.bf16.msra.mxu1 %v9004_v19 }
0x1660   :  { %8703 = vmatprep.subr.mxu1 %v9269_v10 }
0x1725   :  { %v8664_v40 = vpop.f32.mrb[28].mxu1 }
0x1726   :  { %v3841_v41 = vadd.f32 %v8664_v40, %v8051_v39  ;;  %v3823_v42 = vpop.f32.mrb[29].mxu1 }
0x1727   :  { %v3840_v43 = vadd.f32 %v8051_v39, %v3823_v42 }
0x1728   :  { %v3843_v44 = vadd.f32 %v3841_v41, %v9745_v51 }
0x1729   :  { %v3842_v47 = vadd.f32 %v3840_v43, %v9747_v52  ;;  %v8999_v52 = vld [vmem:[%s10472_s16] sm:$0xff]  }
0x172a   :  { %v3849_v48 = vsel %vm265_vm4, %v3843_v44, 0.0  ;;  %8666 = vmatpush3.bf16.msra.mxu0 %v8999_v52 }
0x172b   :  { %3850 = vadd.xlane.f32.xlu0 %v3849_v48  ;;  %v3846_v49 = vsel %vm265_vm4, %v3842_v47, 0.0  ;;  %8667 = vmatprep.subr.bf16.mxu0 %v9269_v10 }
0x172c   :  { %3847 = vadd.xlane.f32.xlu1 %v3846_v49 }
0x172e   :  { %8668 = vmatpush3.bf16.msra.mxu0 %v9000_v60 }
0x172f   :  { %8685 = vmatprep.subr.bf16.mxu0 %v9269_v10 }
0x17b8   :  { %v3851_v50 = vpop.xlane.xlu0 %3850 }
0x17b9   :  { %v3853_v62 = vmul.f32 0.03125, %v3851_v50  ;;  %v3848_v1 = vpop.xlane.xlu1 %3847 }
0x17ba   :  { %v3852_v53 = vmul.f32 0.03125, %v3848_v1 }
0x17bb   :  { %v3855_v54 = vsub.f32 %v3843_v44, %v3853_v62 }
0x17bc   :  { %v3854_v55 = vsub.f32 %v3842_v47, %v3852_v53 }
0x17bd   :  { %v3857_v57 = vmul.f32 %v3855_v54, %v3855_v54 }
0x17be   :  { %v3856_v58 = vmul.f32 %v3854_v55, %v3854_v55 }
0x17bf   :  { %v3861_v32 = vsel %vm265_vm4, %v3857_v57, 0.0 }
0x17c0   :  { %3862 = vadd.xlane.f32.xlu0 %v3861_v32  ;;  %v3858_v51 = vsel %vm265_vm4, %v3856_v58, 0.0 }
0x17c1   :  { %3859 = vadd.xlane.f32.xlu1 %v3858_v51 }
0x184d   :  { %v3863_v0 = vpop.xlane.xlu0 %3862 }
0x184e   :  { %v3865_v36 = vmul.f32 0.03125, %v3863_v0  ;;  %v3860_v2 = vpop.xlane.xlu1 %3859 }
0x184f   :  { %v3864_v3 = vmul.f32 0.03125, %v3860_v2 }
0x1850   :  { %v3867_v4 = vadd.f32 1e-05, %v3865_v36 }
0x1851   :  { %v3866_v5 = vadd.f32 1e-05, %v3864_v3 }
0x1852   :  { %9085 = vrsqrt.f32 %v3867_v4  ;;  %v8065_v4 = vld [vmem:[%s10481_s25] ss:$0 sm:$0xff] }
0x1853   :  { %9087 = vrsqrt.f32 %v3866_v5 }
0x185c   :  { %v9086_v6 = vpop.eup %9085 }
0x185d   :  { %v9088_v9 = vpop.eup %9087  ;;  %v3871_v11 = vmul.f32 %v9086_v6, %v3855_v54  ;;  %v9005_v54 = vld [vmem:[%s10522_s11 + $0x10] sm:$0xff]  }
0x185e   :  { %v3870_v12 = vmul.f32 %v9088_v9, %v3854_v55  ;;  %v9006_v55 = vld [vmem:[%s10522_s11 + $0x18] sm:$0xff]   ;;  %s10534_s11 = smov 48  }
0x185f   :  { %v3879_v14 = vmul.f32 %v8052_v7, %v3871_v11  ;;  %v8070_v11 = vld [vmem:[#allocation2 + $0x1] ss:$0 sm:$0xff] }
0x1860   :  { %v3878_v15 = vmul.f32 %v8052_v7, %v3870_v12 }
0x1861   :  { %v3887_v16 = vadd.f32 %v8053_v13, %v3879_v14 }
0x1862   :  { %v3886_v17 = vadd.f32 %v8053_v13, %v3878_v15 }
0x1864   :  { %v3888_v18 = vpack.c.bf16 %v3887_v16, %v3886_v17 }
0x1866   :  { %8670 = vmatmul.mubr.msk.bf16.vlgmr.msra.gmra.mrb[48].mxu0 %vm265_vm4, %v3888_v18 }
0x1867   :  { %8689 = vmatprep.mubr.msk.bf16.mxu0 %vm9270_vm3, %v9269_v10  ;;  %8686 = vmatpush3.bf16.msra.mxu0 %v9005_v54 }
0x1868   :  { %8687 = vmatprep.subr.bf16.mxu0 %v9269_v10 }
0x186b   :  { %8688 = vmatpush3.bf16.msra.mxu0 %v9006_v55 }
0x186c   :  { %8693 = vmatprep.subr.mxu0 %v9269_v10 }
0x1939   :  { %v3949_v21 = vpop.f32.mrb[48].mxu0 }
0x193a   :  { %v3950_v22 = vadd.f32 %v8054_v20, %v3949_v21  ;;  %v8671_v23 = vpop.f32.mrb[49].mxu0 }
0x193b   :  { %v3952_v24 = vpop.f32.mrb[50].mxu0 }
0x193c   :  { %v3953_v26 = vadd.f32 %v8054_v20, %v3952_v24  ;;  %v8672_v56 = vpop.f32.mrb[51].mxu0  ;;  %v3956_v28 = vmax.f32 %v3950_v22, 0.0 }
0x193e   :  { %v3957_v25 = vmax.f32 %v3953_v26, 0.0 }
0x1940   :  { %v3958_v27 = vpack.c.bf16 %v3957_v25, %v3956_v28 }
0x1942   :  { %8682 = vmatmul.mubr.msk.bf16.vlgmr.msra.gmra.mrb[36].mxu1 %vm151_vm0, %v3958_v27 }
0x1943   :  { %8705 = vmatprep.mubr.msk.f32.mxu1 %vm9270_vm3, %v9269_v10 }
0x1a15   :  { %v4035_v31 = vpop.f32.mrb[36].mxu1 }
0x1a16   :  { %v4036_v33 = vadd.f32 %v8058_v29, %v4035_v31  ;;  %v8683_v59 = vpop.f32.mrb[37].mxu1 }
0x1a17   :  { %v4038_v34 = vpop.f32.mrb[38].mxu1 }
0x1a18   :  { %v4039_v35 = vadd.f32 %v8058_v29, %v4038_v34  ;;  %v8684_v37 = vpop.f32.mrb[39].mxu1  ;;  %v4042_v38 = vadd.f32 %v4036_v33, %v3886_v17 }
0x1a1a   :  { %v4046_v39 = vsel %vm265_vm4, %v4042_v38, 0.0  ;;  %v4043_v40 = vadd.f32 %v4039_v35, %v3887_v16 }
0x1a1b   :  { %4047 = vadd.xlane.f32.xlu1 %v4046_v39 }
0x1a1c   :  { %v4049_v41 = vsel %vm265_vm4, %v4043_v40, 0.0 }
0x1a1d   :  { %4050 = vadd.xlane.f32.xlu0 %v4049_v41 }
0x1aa8   :  { %v4048_v42 = vpop.xlane.xlu1 %4047 }
0x1aa9   :  { %v4052_v43 = vmul.f32 0.03125, %v4048_v42 }
0x1aaa   :  { %v4051_v44 = vpop.xlane.xlu0 %4050 }
0x1aab   :  { %v4054_v47 = vsub.f32 %v4042_v38, %v4052_v43  ;;  %v4053_v48 = vmul.f32 0.03125, %v4051_v44 }
0x1aad   :  { %v4055_v49 = vsub.f32 %v4043_v40, %v4053_v48  ;;  %v4056_v50 = vmul.f32 %v4054_v47, %v4054_v47 }
0x1aaf   :  { %v4058_v62 = vsel %vm265_vm4, %v4056_v50, 0.0  ;;  %v4057_v1 = vmul.f32 %v4055_v49, %v4055_v49 }
0x1ab0   :  { %4059 = vadd.xlane.f32.xlu1 %v4058_v62 }
0x1ab1   :  { %v4061_v53 = vsel %vm265_vm4, %v4057_v1, 0.0 }
0x1ab2   :  { %4062 = vadd.xlane.f32.xlu0 %v4061_v53 }
0x1b3d   :  { %v4060_v57 = vpop.xlane.xlu1 %4059 }
0x1b3e   :  { %v4064_v58 = vmul.f32 0.03125, %v4060_v57 }
0x1b3f   :  { %v4063_v32 = vpop.xlane.xlu0 %4062 }
0x1b40   :  { %v4066_v51 = vadd.f32 1e-05, %v4064_v58  ;;  %v4065_v52 = vmul.f32 0.03125, %v4063_v32 }
0x1b42   :  { %9089 = vrsqrt.f32 %v4066_v51  ;;  %v4067_v60 = vadd.f32 1e-05, %v4065_v52 }
0x1b44   :  { %9091 = vrsqrt.f32 %v4067_v60 }
0x1b4c   :  { %v9090_v61 = vpop.eup %9089 }
0x1b4d   :  { %v4070_v0 = vmul.f32 %v9090_v61, %v4054_v47 }
0x1b4e   :  { %v9092_v36 = vpop.eup %9091 }
0x1b4f   :  { %v4078_v2 = vmul.f32 %v8064_v63, %v4070_v0  ;;  %v4071_v3 = vmul.f32 %v9092_v36, %v4055_v49 }
0x1b51   :  { %v4079_v5 = vmul.f32 %v8064_v63, %v4071_v3  ;;  %v10000_v6 = vadd.f32 %v8065_v4, %v4078_v2 }
0x1b53   :  { %v10002_v7 = vadd.f32 %v8065_v4, %v4079_v5 }
0x1b55   :  { %v4088_v9 = vpack.c.bf16 %v10002_v7, %v10000_v6 }
0x1b57   :  { %8690 = vmatmul.mubr.msk.bf16.vlgmr.msra.gmra.mrb[52].mxu0 %vm265_vm4, %v4088_v9 }
0x1b58   :  { %8695 = vmatprep.mubr.msk.f32.mxu0 %vm9270_vm3, %v9269_v10 }
0x1c2a   :  { %v4151_v12 = vpop.f32.mrb[52].mxu0 }
0x1c2b   :  { %v10009_v13 = vadd.f32 %v8070_v11, %v4151_v12  ;;  %v8691_v14 = vpop.f32.mrb[53].mxu0 }
0x1c2c   :  { %v4154_v15 = vpop.f32.mrb[54].mxu0 }
0x1c2d   :  { %v10011_v16 = vadd.f32 %v8070_v11, %v4154_v15  ;;  %4166 = vrot.lane.b32.xlu1 %v10009_v13, %s9272_s10  ;;  %v8692_v17 = vpop.f32.mrb[55].mxu0 }
0x1c2f   :  { %4332 = vrot.lane.b32.xlu0 %v10011_v16, %s9272_s10 }
0x1c31   :  { %4499 = vrot.lane.b32.xlu1 %v10009_v13, %s9271_s5 }
0x1c33   :  { %4666 = vrot.lane.b32.xlu0 %v10011_v16, %s9271_s5 }
0x1c35   :  { %4497 = vrot.lane.b32.xlu1 %v10009_v13, %s9273_s28 }
0x1c39   :  { %4664 = vrot.lane.b32.xlu1 %v10011_v16, %s9273_s28 }
0x1c9f   :  { %v4167_v18 = vpop.permute.xlu1 %4166 }
0x1ca0   :  { %8694 = vmatpush3.xpose.msk.msra.mxu0 %vm318_vm5, %v4167_v18 }
0x1ca1   :  { %v4333_v45 = vpop.permute.xlu0 %4332  ;;  %8698 = vmatprep.subr.mxu0 %v9269_v10 }
0x1ca2   :  { %8704 = vmatpush3.xpose.msk.msra.mxu1 %vm318_vm5, %v4333_v45 }
0x1ca3   :  { %8696 = vmatmul.mubr.msk.f32.vlgmr.msra.gmra.mrb[46].mxu0 %vm318_vm5, %v10009_v13  ;;  %v4500_v19 = vpop.permute.xlu1 %4499  ;;  %8713 = vmatprep.subr.mxu1 %v9269_v10 }
0x1ca4   :  { %8700 = vmatprep.mubr.msk.f32.mxu0 %vm9270_vm3, %v9269_v10 }
0x1ca5   :  { %8706 = vmatmul.mubr.msk.f32.vlgmr.msra.gmra.mrb[40].mxu1 %vm318_vm5, %v10011_v16  ;;  %v4667_v21 = vpop.permute.xlu0 %4666 }
0x1ca6   :  { %8714 = vmatpush3.xpose.msk.msra.mxu1 %vm318_vm5, %v4500_v19  ;;  %8715 = vmatprep.mubr.msk.f32.mxu1 %vm9270_vm3, %v9269_v10 }
0x1ca7   :  { %v4498_v20 = vpop.permute.xlu1 %4497  ;;  %8723 = vmatprep.subr.mxu1 %v9269_v10 }
0x1ca9   :  { %8716 = vmatmul.mubr.msk.f32.vlgmr.msra.gmra.mrb[42].mxu1 %vm318_vm5, %v4498_v20 }
0x1caa   :  { %8724 = vmatpush3.xpose.msk.msra.mxu1 %vm318_vm5, %v4667_v21  ;;  %8725 = vmatprep.mubr.msk.f32.mxu1 %vm9270_vm3, %v9269_v10 }
0x1cab   :  { %v4665_v22 = vpop.permute.xlu1 %4664 }
0x1cad   :  { %8726 = vmatmul.mubr.msk.f32.vlgmr.msra.gmra.mrb[44].mxu1 %vm318_vm5, %v4665_v22 }
0x1d76   :  { %v4238_v23 = vpop.f32.mrb[46].mxu0 }
0x1d77   :  { %v4242_v24 = vmul.f32 0.35355338, %v4238_v23  ;;  %v8697_v26 = vpop.f32.mrb[47].mxu0 }
0x1d78   :  { %v4404_v56 = vpop.f32.mrb[40].mxu1  ;;  %v8075_v26 = vld [vmem:[%s10525_s6 + $0x28] sm:$0xff] }
0x1d79   :  { %v4408_v28 = vmul.f32 0.35355338, %v4404_v56  ;;  %v8707_v25 = vpop.f32.mrb[41].mxu1  ;;  %v4243_v27 = vadd.f32 %v4242_v24, %v9572_v46  ;;  %8733 = vmatprep.subr.mxu1 %v8075_v26  ;;  %v8074_v56 = vld [vmem:[%s10525_s6 + $0x20] sm:$0xff] }
0x1d7a   :  { %8734 = vmatpush3.msra.mxu1 %v8075_v26 }
0x1d7b   :  { %v4244_v29 = vsel %vm318_vm5, %v4243_v27, -inf  ;;  %v4409_v31 = vadd.f32 %v4408_v28, %v9572_v46  ;;  %8738 = vmatprep.subr.mxu1 %v8074_v56 }
0x1d7c   :  { %v4571_v33 = vpop.f32.mrb[42].mxu1  ;;  %4245 = vmax.xlane.f32.xlu0 %v4244_v29 }
0x1d7d   :  { %v4575_v59 = vmul.f32 0.35355338, %v4571_v33  ;;  %v8717_v34 = vpop.f32.mrb[43].mxu1  ;;  %v4410_v35 = vsel %vm318_vm5, %v4409_v31, -inf }
0x1d7e   :  { %4411 = vmax.xlane.f32.xlu1 %v4410_v35 }
0x1d7f   :  { %v4576_v37 = vadd.f32 %v4575_v59, %v9572_v46 }
0x1d80   :  { %v4738_v38 = vpop.f32.mrb[44].mxu1 }
0x1d81   :  { %v4742_v39 = vmul.f32 0.35355338, %v4738_v38  ;;  %v8727_v40 = vpop.f32.mrb[45].mxu1  ;;  %v4577_v41 = vsel %vm318_vm5, %v4576_v37, -inf }
0x1d82   :  { %4578 = vmax.xlane.f32.xlu0 %v4577_v41 }
0x1d83   :  { %v4743_v42 = vadd.f32 %v4742_v39, %v9572_v46 }
0x1d85   :  { %v4744_v43 = vsel %vm318_vm5, %v4743_v42, -inf }
0x1d86   :  { %4745 = vmax.xlane.f32.xlu0 %v4744_v43 }
0x1d8f   :  { %4255 = vrot.lane.b32.xlu1 %v10009_v13, %s10531_s26 }
0x1e09   :  { %v4246_v44 = vpop.xlane.xlu0 %4245 }
0x1e0a   :  { %v4247_v47 = vsub.f32 %v4243_v27, %v4246_v44 }
0x1e0b   :  { %v4412_v48 = vpop.xlane.xlu1 %4411 }
0x1e0c   :  { %v4248_v49 = vmul.f32 1.442695, %v4247_v47  ;;  %v4413_v50 = vsub.f32 %v4409_v31, %v4412_v48 }
0x1e0e   :  { %9093 = vpow2.f32 %v4248_v49  ;;  %v4414_v62 = vmul.f32 1.442695, %v4413_v50 }
0x1e0f   :  { %v4256_v1 = vpop.permute.xlu1 %4255  ;;  %v4579_v53 = vpop.xlane.xlu0 %4578 }
0x1e10   :  { %9095 = vpow2.f32 %v4414_v62  ;;  %v4580_v54 = vsub.f32 %v4576_v37, %v4579_v53  ;;  %8699 = vmatpush3.msra.mxu0 %v4256_v1 }
0x1e11   :  { %8708 = vmatprep.subr.mxu0 %v9269_v10 }
0x1e12   :  { %v4581_v55 = vmul.f32 1.442695, %v4580_v54 }
0x1e13   :  { %v4746_v57 = vpop.xlane.xlu0 %4745 }
0x1e14   :  { %9097 = vpow2.f32 %v4581_v55  ;;  %v4747_v58 = vsub.f32 %v4743_v42, %v4746_v57 }
0x1e16   :  { %v4748_v32 = vmul.f32 1.442695, %v4747_v58 }
0x1e18   :  { %v9094_v51 = vpop.eup %9093  ;;  %9099 = vpow2.f32 %v4748_v32 }
0x1e19   :  { %v4250_v52 = vsel %vm318_vm5, %v9094_v51, 0.0 }
0x1e1a   :  { %v9096_v60 = vpop.eup %9095  ;;  %4251 = vadd.xlane.f32.xlu1 %v4250_v52 }
0x1e1b   :  { %v4416_v61 = vsel %vm318_vm5, %v9096_v60, 0.0 }
0x1e1c   :  { %4417 = vadd.xlane.f32.xlu0 %v4416_v61 }
0x1e1e   :  { %v9098_v63 = vpop.eup %9097 }
0x1e1f   :  { %v4583_v0 = vsel %vm318_vm5, %v9098_v63, 0.0 }
0x1e20   :  { %4584 = vadd.xlane.f32.xlu1 %v4583_v0  ;;  %v8076_v0 = vld [vmem:[%s10525_s6 + $0x30] sm:$0xff] }
0x1e22   :  { %v9100_v36 = vpop.eup %9099 }
0x1e23   :  { %v4750_v2 = vsel %vm318_vm5, %v9100_v36, 0.0 }
0x1e24   :  { %4751 = vadd.xlane.f32.xlu0 %v4750_v2 }
0x1e31   :  { %4588 = vrot.lane.b32.xlu1 %v10009_v13, %s10532_s7 }
0x1e35   :  { %4755 = vrot.lane.b32.xlu1 %v10011_v16, %s10532_s7  ;;  %s10535_s7 = smov 40  }
0x1e39   :  { %4993 = vrot.lane.b32.xlu1 %v10009_v13, %s9277_s4 }
0x1e3a   :  { %4421 = vrot.lane.b32.xlu0 %v10011_v16, %s10531_s26 }
0x1e3d   :  { %5160 = vrot.lane.b32.xlu1 %v10011_v16, %s9277_s4 }
0x1e3e   :  { %4995 = vrot.lane.b32.xlu0 %v10009_v13, %s10533_s8 }
0x1e42   :  { %5162 = vrot.lane.b32.xlu0 %v10011_v16, %s10533_s8 }
0x1ea7   :  { %v4252_v3 = vpop.xlane.xlu1 %4251 }
0x1ea8   :  { %9101 = vrcp.f32 %v4252_v3 }
0x1ea9   :  { %v4418_v4 = vpop.xlane.xlu0 %4417 }
0x1eaa   :  { %9103 = vrcp.f32 %v4418_v4 }
0x1ead   :  { %v4585_v5 = vpop.xlane.xlu1 %4584 }
0x1eae   :  { %9105 = vrcp.f32 %v4585_v5 }
0x1eb1   :  { %v4752_v9 = vpop.xlane.xlu0 %4751  ;;  %v4589_v18 = vpop.permute.xlu1 %4588 }
0x1eb2   :  { %v9102_v11 = vpop.eup %9101  ;;  %9107 = vrcp.f32 %v4752_v9 }
0x1eb3   :  { %v4254_v12 = vmul.f32 %v9102_v11, %v9094_v51 }
0x1eb4   :  { %v9104_v14 = vpop.eup %9103 }
0x1eb5   :  { %8701 = vmatmul.mubr.msk.f32.vlgmr.msra.gmra.mrb[56].mxu0 %vm318_vm5, %v4254_v12  ;;  %v4422_v15 = vpop.permute.xlu0 %4421  ;;  %v4420_v17 = vmul.f32 %v9104_v14, %v9096_v60  ;;  %v4756_v21 = vpop.permute.xlu1 %4755 }
0x1eb6   :  { %8709 = vmatpush3.msra.mxu0 %v4422_v15  ;;  %8710 = vmatprep.mubr.msk.f32.mxu0 %vm9270_vm3, %v9269_v10 }
0x1eb7   :  { %8718 = vmatprep.subr.mxu0 %v9269_v10 }
0x1eb8   :  { %v9106_v45 = vpop.eup %9105 }
0x1eb9   :  { %8711 = vmatmul.mubr.msk.f32.vlgmr.msra.gmra.mrb[58].mxu0 %vm318_vm5, %v4420_v17  ;;  %v4587_v19 = vmul.f32 %v9106_v45, %v9098_v63  ;;  %v4996_v23 = vpop.permute.xlu0 %4995  ;;  %v4994_v24 = vpop.permute.xlu1 %4993 }
0x1eba   :  { %8719 = vmatpush3.msra.mxu0 %v4589_v18  ;;  %8720 = vmatprep.mubr.msk.f32.mxu0 %vm9270_vm3, %v9269_v10 }
0x1ebb   :  { %8728 = vmatprep.subr.mxu0 %v9269_v10 }
0x1ebc   :  { %v9108_v20 = vpop.eup %9107 }
0x1ebd   :  { %8721 = vmatmul.mubr.msk.f32.vlgmr.msra.gmra.mrb[60].mxu0 %vm318_vm5, %v4587_v19  ;;  %v4754_v22 = vmul.f32 %v9108_v20, %v9100_v36  ;;  %v5163_v39 = vpop.permute.xlu0 %5162  ;;  %v5161_v41 = vpop.permute.xlu1 %5160 }
0x1ebe   :  { %8729 = vmatpush3.msra.mxu0 %v4756_v21  ;;  %8730 = vmatprep.mubr.msk.f32.mxu0 %vm9270_vm3, %v9269_v10 }
0x1ebf   :  { %8743 = vmatprep.subr.mxu0 %v9269_v10 }
0x1ec1   :  { %8731 = vmatmul.mubr.msk.f32.vlgmr.msra.gmra.mrb[62].mxu0 %vm318_vm5, %v4754_v22 }
0x1ec2   :  { %8745 = vmatprep.mubr.msk.f32.mxu0 %vm9270_vm3, %v9269_v10 }
0x1ec5   :  { %8744 = vmatpush3.xpose.msk.msra.mxu0 %vm318_vm5, %v4996_v23 }
0x1ec6   :  { %8748 = vmatprep.subr.mxu0 %v9269_v10 }
0x1ec8   :  { %8746 = vmatmul.mubr.msk.f32.vlgmr.msra.gmra.mrb[64].mxu0 %vm318_vm5, %v4994_v24 }
0x1ec9   :  { %8750 = vmatprep.mubr.msk.f32.mxu0 %vm9270_vm3, %v9269_v10 }
0x1f88   :  { %v4327_v28 = vpop.f32.mrb[56].mxu0 }
0x1f89   :  { %v8702_v25 = vpop.f32.mrb[57].mxu0 }
0x1f8c   :  { %v4493_v27 = vpop.f32.mrb[58].mxu0 }
0x1f8d   :  { %v8712_v29 = vpop.f32.mrb[59].mxu0 }
0x1f90   :  { %v4660_v31 = vpop.f32.mrb[60].mxu0 }
0x1f91   :  { %v8722_v33 = vpop.f32.mrb[61].mxu0  ;;  %8735 = vmatprep.mubr.msk.f32.mxu1 %vm318_vm5, %v4660_v31 }
0x1f94   :  { %v4827_v59 = vpop.f32.mrb[62].mxu0 }
0x1f95   :  { %v8732_v34 = vpop.f32.mrb[63].mxu0  ;;  %8736 = vmatmul.mubr.msk.f32.vlgmr.msra.gmra.mrb[46].mxu1 %vm318_vm5, %v4827_v59 }
0x1f96   :  { %8739 = vmatpush3.msra.mxu1 %v8074_v56  ;;  %8740 = vmatprep.mubr.msk.f32.mxu1 %vm318_vm5, %v4327_v28 }
0x1f97   :  { %8753 = vmatprep.subr.mxu1 %v9269_v10 }
0x1f9b   :  { %v5067_v35 = vpop.f32.mrb[64].mxu0 }
0x1f9c   :  { %v5071_v37 = vmul.f32 0.35355338, %v5067_v35  ;;  %v8747_v38 = vpop.f32.mrb[65].mxu0 }
0x1f9d   :  { %8741 = vmatmul.mubr.msk.f32.vlgmr.msra.gmra.mrb[46].mxu1 %vm318_vm5, %v4493_v27 }
0x1f9e   :  { %v5072_v40 = vadd.f32 %v5071_v37, %v9572_v46  ;;  %8754 = vmatpush3.xpose.msk.msra.mxu1 %vm318_vm5, %v5163_v39  ;;  %8755 = vmatprep.mubr.msk.f32.mxu1 %vm9270_vm3, %v9269_v10 }
0x1f9f   :  { %8763 = vmatprep.subr.mxu1 %v8076_v0 }
0x1fa0   :  { %v5073_v42 = vsel %vm318_vm5, %v5072_v40, -inf }
0x1fa1   :  { %5074 = vmax.xlane.f32.xlu0 %v5073_v42  ;;  %8756 = vmatmul.mubr.msk.f32.vlgmr.msra.gmra.mrb[48].mxu1 %vm318_vm5, %v5161_v41 }
0x1fa2   :  { %8764 = vmatpush3.msra.mxu1 %v8076_v0 }
0x1fa3   :  { %8773 = vmatprep.subr.mxu1 %v9269_v10 }
0x202e   :  { %v5075_v43 = vpop.xlane.xlu0 %5074 }
0x202f   :  { %v5076_v44 = vsub.f32 %v5072_v40, %v5075_v43 }
0x2031   :  { %v5077_v47 = vmul.f32 1.442695, %v5076_v44 }
0x2033   :  { %9109 = vpow2.f32 %v5077_v47 }
0x203d   :  { %v9110_v48 = vpop.eup %9109 }
0x203e   :  { %v5079_v49 = vsel %vm318_vm5, %v9110_v48, 0.0 }
0x203f   :  { %5080 = vadd.xlane.f32.xlu0 %v5079_v49 }
0x2074   :  { %v5234_v50 = vpop.f32.mrb[48].mxu1 }
0x2075   :  { %v5238_v62 = vmul.f32 0.35355338, %v5234_v50  ;;  %v8757_v1 = vpop.f32.mrb[49].mxu1 }
0x2077   :  { %v5239_v53 = vadd.f32 %v5238_v62, %v9572_v46  ;;  %v8110_v62 = vld [vmem:[#allocation5 + $0x1] ss:$0 sm:$0xff] }
0x2079   :  { %v5240_v54 = vsel %vm318_vm5, %v5239_v53, -inf }
0x207a   :  { %5241 = vmax.xlane.f32.xlu1 %v5240_v54 }
0x208b   :  { %5084 = vrot.lane.b32.xlu1 %v10009_v13, %s10534_s11 }
0x208f   :  { %5412 = vrot.lane.b32.xlu1 %v10009_v13, %s10530_s1 }
0x2093   :  { %5410 = vrot.lane.b32.xlu1 %v10009_v13, %s10529_s9 }
0x2097   :  { %5577 = vrot.lane.b32.xlu1 %v10011_v16, %s10529_s9 }
0x20cc   :  { %v5081_v55 = vpop.xlane.xlu0 %5080 }
0x20cd   :  { %9111 = vrcp.f32 %v5081_v55 }
0x20d7   :  { %v9112_v58 = vpop.eup %9111 }
0x20d8   :  { %v5083_v52 = vmul.f32 %v9112_v58, %v9110_v48 }
0x2107   :  { %v5242_v57 = vpop.xlane.xlu1 %5241 }
0x2108   :  { %v5243_v32 = vsub.f32 %v5239_v53, %v5242_v57 }
0x210a   :  { %v5244_v51 = vmul.f32 1.442695, %v5243_v32 }
0x210b   :  { %v5085_v60 = vpop.permute.xlu1 %5084 }
0x210c   :  { %9113 = vpow2.f32 %v5244_v51  ;;  %8749 = vmatpush3.msra.mxu0 %v5085_v60 }
0x210d   :  { %8751 = vmatmul.mubr.msk.f32.vlgmr.msra.gmra.mrb[66].mxu0 %vm318_vm5, %v5083_v52  ;;  %8758 = vmatprep.subr.mxu0 %v9269_v10 }
0x210e   :  { %8760 = vmatprep.mubr.msk.f32.mxu0 %vm9270_vm3, %v9269_v10 }
0x210f   :  { %v5413_v3 = vpop.permute.xlu1 %5412 }
0x2113   :  { %v5411_v9 = vpop.permute.xlu1 %5410 }
0x2116   :  { %v9114_v61 = vpop.eup %9113 }
0x2117   :  { %v5246_v63 = vsel %vm318_vm5, %v9114_v61, 0.0  ;;  %v5578_v12 = vpop.permute.xlu1 %5577 }
0x2118   :  { %5247 = vadd.xlane.f32.xlu0 %v5246_v63 }
0x212e   :  { %5251 = vrot.lane.b32.xlu0 %v10011_v16, %s10534_s11 }
0x2132   :  { %5579 = vrot.lane.b32.xlu0 %v10011_v16, %s10530_s1 }
0x21a5   :  { %v5248_v36 = vpop.xlane.xlu0 %5247 }
0x21a6   :  { %9115 = vrcp.f32 %v5248_v36 }
0x21a9   :  { %v5252_v2 = vpop.permute.xlu0 %5251 }
0x21aa   :  { %8759 = vmatpush3.msra.mxu0 %v5252_v2 }
0x21ab   :  { %8768 = vmatprep.subr.mxu0 %v9269_v10 }
0x21ad   :  { %v5580_v11 = vpop.permute.xlu0 %5579 }
0x21b0   :  { %v9116_v4 = vpop.eup %9115 }
0x21b1   :  { %v5250_v5 = vmul.f32 %v9116_v4, %v9114_v61 }
0x21b3   :  { %8761 = vmatmul.mubr.msk.f32.vlgmr.msra.gmra.mrb[68].mxu0 %vm318_vm5, %v5250_v5  ;;  %v9008_v5 = vld [vmem:[%s10468_s12 + $0x18] sm:$0xff]  }
0x21b4   :  { %8769 = vmatpush3.xpose.msk.msra.mxu0 %vm318_vm5, %v5413_v3  ;;  %8770 = vmatprep.mubr.msk.f32.mxu0 %vm9270_vm3, %v9269_v10 }
0x21b5   :  { %8778 = vmatprep.subr.mxu0 %v9269_v10 }
0x21b7   :  { %8771 = vmatmul.mubr.msk.f32.vlgmr.msra.gmra.mrb[70].mxu0 %vm318_vm5, %v5411_v9  ;;  %v9009_v9 = vld [vmem:[%s10527_s3 + $0x10] sm:$0xff]  }
0x21b8   :  { %8779 = vmatpush3.xpose.msk.msra.mxu0 %vm318_vm5, %v5580_v11  ;;  %8780 = vmatprep.mubr.msk.f32.mxu0 %vm9270_vm3, %v9269_v10  ;;  %v9010_v11 = vld [vmem:[%s10527_s3 + $0x18] sm:$0xff]  }
0x21b9   :  { %8793 = vmatprep.subr.bf16.mxu0 %v9269_v10 }
0x21bb   :  { %8781 = vmatmul.mubr.msk.f32.vlgmr.msra.gmra.mrb[72].mxu0 %vm318_vm5, %v5578_v12 }
0x21bc   :  { %8797 = vmatprep.mubr.msk.bf16.mxu0 %vm9270_vm3, %v9269_v10  ;;  %8794 = vmatpush3.bf16.msra.mxu0 %v9009_v9 }
0x21bd   :  { %8795 = vmatprep.subr.bf16.mxu0 %v9269_v10 }
0x21c0   :  { %8796 = vmatpush3.bf16.msra.mxu0 %v9010_v11 }
0x21c1   :  { %8809 = vmatprep.subr.mxu0 %v9269_v10 }
0x21e0   :  { %v5156_v14 = vpop.f32.mrb[66].mxu0 }
0x21e1   :  { %v8752_v15 = vpop.f32.mrb[67].mxu0  ;;  %8765 = vmatprep.mubr.msk.f32.mxu1 %vm318_vm5, %v5156_v14 }
0x2286   :  { %v5323_v17 = vpop.f32.mrb[68].mxu0 }
0x2287   :  { %v8762_v18 = vpop.f32.mrb[69].mxu0  ;;  %8766 = vmatmul.mubr.msk.f32.vlgmr.msra.gmra.mrb[46].mxu1 %vm318_vm5, %v5323_v17 }
0x2288   :  { %8775 = vmatprep.mubr.msk.f32.mxu1 %vm9270_vm3, %v9269_v10 }
0x228a   :  { %v5484_v45 = vpop.f32.mrb[70].mxu0 }
0x228b   :  { %v5488_v19 = vmul.f32 0.35355338, %v5484_v45  ;;  %v8772_v20 = vpop.f32.mrb[71].mxu0 }
0x228d   :  { %v5489_v21 = vadd.f32 %v5488_v19, %v9572_v46  ;;  %v8113_v19 = vld [vmem:[%s10476_s20 + $0x1] ss:$0 sm:$0xff] }
0x228e   :  { %v5651_v22 = vpop.f32.mrb[72].mxu0 }
0x228f   :  { %v5655_v23 = vmul.f32 0.35355338, %v5651_v22  ;;  %v8782_v24 = vpop.f32.mrb[73].mxu0  ;;  %v5490_v26 = vsel %vm318_vm5, %v5489_v21, -inf }
0x2290   :  { %5491 = vmax.xlane.f32.xlu0 %v5490_v26 }
0x2291   :  { %v5656_v56 = vadd.f32 %v5655_v23, %v9572_v46  ;;  %v8114_v23 = vld [vmem:[%s10477_s21 + $0x1] ss:$0 sm:$0xff] }
0x2293   :  { %v5657_v28 = vsel %vm318_vm5, %v5656_v56, -inf }
0x2294   :  { %5658 = vmax.xlane.f32.xlu1 %v5657_v28 }
0x22a5   :  { %5501 = vrot.lane.b32.xlu1 %v10009_v13, %s10535_s7 }
0x231d   :  { %v5492_v25 = vpop.xlane.xlu0 %5491 }
0x231e   :  { %v5493_v27 = vsub.f32 %v5489_v21, %v5492_v25 }
0x2320   :  { %v5494_v29 = vmul.f32 1.442695, %v5493_v27  ;;  %v8128_v27 = vld [vmem:[%s10469_s13 + $0x1] ss:$0 sm:$0xff] }
0x2321   :  { %v5659_v31 = vpop.xlane.xlu1 %5658 }
0x2322   :  { %9117 = vpow2.f32 %v5494_v29  ;;  %v5660_v33 = vsub.f32 %v5656_v56, %v5659_v31 }
0x2324   :  { %v5661_v59 = vmul.f32 1.442695, %v5660_v33 }
0x2325   :  { %v5502_v34 = vpop.permute.xlu1 %5501 }
0x2326   :  { %9119 = vpow2.f32 %v5661_v59  ;;  %8774 = vmatpush3.msra.mxu1 %v5502_v34 }
0x2327   :  { %8783 = vmatprep.subr.mxu1 %v9269_v10 }
0x232c   :  { %v9118_v35 = vpop.eup %9117 }
0x232d   :  { %v5496_v46 = vsel %vm318_vm5, %v9118_v35, 0.0 }
0x232e   :  { %5497 = vadd.xlane.f32.xlu0 %v5496_v46  ;;  %v8119_v46 = vld [vmem:[#allocation7 + $0x1] ss:$0 sm:$0xff] }
0x2330   :  { %v9120_v37 = vpop.eup %9119 }
0x2331   :  { %v5663_v38 = vsel %vm318_vm5, %v9120_v37, 0.0 }
0x2332   :  { %5664 = vadd.xlane.f32.xlu0 %v5663_v38 }
0x2348   :  { %5668 = vrot.lane.b32.xlu0 %v10011_v16, %s10535_s7  ;;  %v8077_v16 = vld [vmem:[%s10525_s6 + $0x38] sm:$0xff] }
0x23bb   :  { %v5498_v13 = vpop.xlane.xlu0 %5497 }
0x23bc   :  { %9121 = vrcp.f32 %v5498_v13 }
0x23bf   :  { %v5665_v39 = vpop.xlane.xlu0 %5664 }
0x23c0   :  { %9123 = vrcp.f32 %v5665_v39 }
0x23c3   :  { %v5669_v42 = vpop.permute.xlu0 %5668 }
0x23c6   :  { %v9122_v40 = vpop.eup %9121 }
0x23c7   :  { %v5500_v41 = vmul.f32 %v9122_v40, %v9118_v35 }
0x23c9   :  { %8776 = vmatmul.mubr.msk.f32.vlgmr.msra.gmra.mrb[50].mxu1 %vm318_vm5, %v5500_v41 }
0x23ca   :  { %v9124_v43 = vpop.eup %9123  ;;  %8784 = vmatpush3.msra.mxu1 %v5669_v42  ;;  %8785 = vmatprep.mubr.msk.f32.mxu1 %vm9270_vm3, %v9269_v10 }
0x23cb   :  { %v5667_v44 = vmul.f32 %v9124_v43, %v9120_v37  ;;  %8788 = vmatprep.subr.mxu1 %v8077_v16 }
0x23cd   :  { %8786 = vmatmul.mubr.msk.f32.vlgmr.msra.gmra.mrb[52].mxu1 %vm318_vm5, %v5667_v44 }
0x23ce   :  { %8789 = vmatpush3.msra.mxu1 %v8077_v16 }
0x23cf   :  { %8801 = vmatprep.subr.bf16.mxu1 %v9269_v10 }
0x249c   :  { %v5573_v47 = vpop.f32.mrb[50].mxu1 }
0x249d   :  { %v8777_v48 = vpop.f32.mrb[51].mxu1  ;;  %8790 = vmatprep.mubr.msk.f32.mxu1 %vm318_vm5, %v5573_v47 }
0x24a0   :  { %v5740_v49 = vpop.f32.mrb[52].mxu1 }
0x24a1   :  { %v8787_v50 = vpop.f32.mrb[53].mxu1  ;;  %8791 = vmatmul.mubr.msk.f32.vlgmr.msra.gmra.mrb[46].mxu1 %vm318_vm5, %v5740_v49 }
0x24a2   :  { %8805 = vmatprep.mubr.msk.bf16.mxu1 %vm9270_vm3, %v9269_v10 }
0x2574   :  { %v8792_v1 = vpop.f32.mrb[46].mxu1 }
0x2575   :  { %v5834_v53 = vadd.f32 %v8792_v1, %v8110_v62  ;;  %v5816_v54 = vpop.f32.mrb[47].mxu1 }
0x2576   :  { %v5833_v55 = vadd.f32 %v8110_v62, %v5816_v54 }
0x2577   :  { %v5836_v57 = vadd.f32 %v5834_v53, %v10002_v7 }
0x2578   :  { %v5835_v58 = vadd.f32 %v5833_v55, %v10000_v6  ;;  %v9007_v6 = vld [vmem:[%s10468_s12 + $0x10] sm:$0xff]  }
0x2579   :  { %v5844_v32 = vsel %vm265_vm4, %v5836_v57, 0.0  ;;  %8802 = vmatpush3.bf16.msra.mxu1 %v9007_v6 }
0x257a   :  { %5845 = vadd.xlane.f32.xlu0 %v5844_v32  ;;  %v5841_v51 = vsel %vm265_vm4, %v5835_v58, 0.0  ;;  %8803 = vmatprep.subr.bf16.mxu1 %v9269_v10 }
0x257b   :  { %5842 = vadd.xlane.f32.xlu1 %v5841_v51 }
0x257d   :  { %8804 = vmatpush3.bf16.msra.mxu1 %v9008_v5 }
0x257e   :  { %8819 = vmatprep.subr.mxu1 %v9269_v10 }
0x2580   :  { %8806 = vmatmul.mubr.msk.bf16.vlgmr.msra.gmra.mrb[56].mxu1 %vm265_vm4, %v9724_v30 }
0x2581   :  { %8821 = vmatprep.mubr.msk.f32.mxu1 %vm9270_vm3, %v9269_v10 }
0x2607   :  { %v5846_v52 = vpop.xlane.xlu0 %5845 }
0x2608   :  { %v5848_v60 = vmul.f32 0.03125, %v5846_v52  ;;  %v5843_v61 = vpop.xlane.xlu1 %5842 }
0x2609   :  { %v5847_v63 = vmul.f32 0.03125, %v5843_v61 }
0x260a   :  { %v5850_v0 = vsub.f32 %v5836_v57, %v5848_v60 }
0x260b   :  { %v5849_v36 = vsub.f32 %v5835_v58, %v5847_v63 }
0x260c   :  { %v5852_v2 = vmul.f32 %v5850_v0, %v5850_v0 }
0x260d   :  { %v5851_v3 = vmul.f32 %v5849_v36, %v5849_v36 }
0x260e   :  { %v5856_v4 = vsel %vm265_vm4, %v5852_v2, 0.0 }
0x260f   :  { %5857 = vadd.xlane.f32.xlu0 %v5856_v4  ;;  %v5853_v7 = vsel %vm265_vm4, %v5851_v3, 0.0 }
0x2610   :  { %5854 = vadd.xlane.f32.xlu1 %v5853_v7 }
0x2653   :  { %v6012_v29 = vpop.f32.mrb[56].mxu1 }
0x2654   :  { %v10219_v31 = vadd.f32 %v8128_v27, %v6012_v29  ;;  %v8807_v33 = vpop.f32.mrb[57].mxu1 }
0x2655   :  { %v6015_v59 = vpop.f32.mrb[58].mxu1 }
0x2656   :  { %v10221_v34 = vadd.f32 %v8128_v27, %v6015_v59  ;;  %6358 = vrot.lane.b32.xlu1 %v10219_v31, %s9273_s28  ;;  %v8808_v35 = vpop.f32.mrb[59].mxu1 }
0x2658   :  { %8820 = vmatpush3.xpose.msk.msra.mxu1 %vm318_vm5, %v10221_v34 }
0x2659   :  { %8829 = vmatprep.subr.mxu1 %v9269_v10 }
0x265a   :  { %6525 = vrot.lane.b32.xlu1 %v10221_v34, %s9273_s28 }
0x269c   :  { %v5858_v12 = vpop.xlane.xlu0 %5857 }
0x269d   :  { %v5860_v14 = vmul.f32 0.03125, %v5858_v12  ;;  %v5855_v15 = vpop.xlane.xlu1 %5854 }
0x269e   :  { %v5859_v17 = vmul.f32 0.03125, %v5855_v15 }
0x269f   :  { %v5862_v18 = vadd.f32 1e-05, %v5860_v14 }
0x26a0   :  { %v5861_v45 = vadd.f32 1e-05, %v5859_v17 }
0x26a1   :  { %9125 = vrsqrt.f32 %v5862_v18 }
0x26a2   :  { %9127 = vrsqrt.f32 %v5861_v45 }
0x26ab   :  { %v9126_v30 = vpop.eup %9125 }
0x26ac   :  { %v9128_v20 = vpop.eup %9127  ;;  %v5866_v21 = vmul.f32 %v9126_v30, %v5850_v0 }
0x26ad   :  { %v5865_v22 = vmul.f32 %v9128_v20, %v5849_v36 }
0x26ae   :  { %v5874_v24 = vmul.f32 %v8113_v19, %v5866_v21 }
0x26af   :  { %v5873_v26 = vmul.f32 %v8113_v19, %v5865_v22 }
0x26b0   :  { %v10207_v56 = vadd.f32 %v8114_v23, %v5874_v24 }
0x26b1   :  { %v10209_v28 = vadd.f32 %v8114_v23, %v5873_v26 }
0x26b3   :  { %v5883_v25 = vpack.c.bf16 %v10207_v56, %v10209_v28 }
0x26b5   :  { %8798 = vmatmul.mubr.msk.bf16.vlgmr.msra.gmra.mrb[76].mxu0 %vm265_vm4, %v5883_v25 }
0x26b6   :  { %8811 = vmatprep.mubr.msk.f32.mxu0 %vm9270_vm3, %v9269_v10  ;;  %8810 = vmatpush3.xpose.msk.msra.mxu0 %vm318_vm5, %v10219_v31 }
0x26b7   :  { %8814 = vmatprep.subr.mxu0 %v9269_v10 }
0x26c8   :  { %v6359_v42 = vpop.permute.xlu1 %6358 }
0x26cc   :  { %v6526_v43 = vpop.permute.xlu1 %6525 }
0x2788   :  { %v5946_v37 = vpop.f32.mrb[76].mxu0 }
0x2789   :  { %v10233_v38 = vadd.f32 %v8119_v46, %v5946_v37  ;;  %v8799_v13 = vpop.f32.mrb[77].mxu0 }
0x278a   :  { %v5949_v39 = vpop.f32.mrb[78].mxu0 }
0x278b   :  { %v10235_v40 = vadd.f32 %v8119_v46, %v5949_v39  ;;  %6356 = vrot.lane.b32.xlu0 %v10233_v38, %s9273_s28  ;;  %v8800_v41 = vpop.f32.mrb[79].mxu0  ;;  %8812 = vmatmul.mubr.msk.f32.vlgmr.msra.gmra.mrb[74].mxu0 %vm318_vm5, %v10233_v38 }
0x278c   :  { %8816 = vmatprep.mubr.msk.f32.mxu0 %vm9270_vm3, %v9269_v10 }
0x278d   :  { %6523 = vrot.lane.b32.xlu1 %v10235_v40, %s9273_s28  ;;  %8822 = vmatmul.mubr.msk.f32.vlgmr.msra.gmra.mrb[54].mxu1 %vm318_vm5, %v10235_v40 }
0x278e   :  { %8830 = vmatpush3.xpose.msk.msra.mxu1 %vm318_vm5, %v6359_v42  ;;  %8831 = vmatprep.mubr.msk.f32.mxu1 %vm9270_vm3, %v9269_v10 }
0x278f   :  { %8839 = vmatprep.subr.mxu1 %v9269_v10 }
0x27fd   :  { %v6357_v44 = vpop.permute.xlu0 %6356 }
0x27fe   :  { %8832 = vmatmul.mubr.msk.f32.vlgmr.msra.gmra.mrb[60].mxu1 %vm318_vm5, %v6357_v44 }
0x27ff   :  { %8840 = vmatpush3.xpose.msk.msra.mxu1 %vm318_vm5, %v6526_v43  ;;  %8841 = vmatprep.mubr.msk.f32.mxu1 %vm9270_vm3, %v9269_v10  ;;  %v6524_v16 = vpop.permute.xlu1 %6523 }
0x2802   :  { %8842 = vmatmul.mubr.msk.f32.vlgmr.msra.gmra.mrb[62].mxu1 %vm318_vm5, %v6524_v16 }
0x285e   :  { %v6098_v47 = vpop.f32.mrb[74].mxu0 }
0x285f   :  { %v6102_v48 = vmul.f32 0.35355338, %v6098_v47  ;;  %v8813_v49 = vpop.f32.mrb[75].mxu0 }
0x2860   :  { %v6263_v50 = vpop.f32.mrb[54].mxu1  ;;  %v8133_v49 = vld [vmem:[%s10470_s14 + $0x28] sm:$0xff] }
0x2861   :  { %v6103_v62 = vadd.f32 %v6102_v48, %v9798_v8  ;;  %v6267_v1 = vmul.f32 0.35355338, %v6263_v50  ;;  %v8823_v53 = vpop.f32.mrb[55].mxu1  ;;  %8849 = vmatprep.subr.mxu1 %v8133_v49  ;;  %v8132_v50 = vld [vmem:[%s10470_s14 + $0x20] sm:$0xff] }
0x2862   :  { %8850 = vmatpush3.msra.mxu1 %v8133_v49 }
0x2863   :  { %v6268_v54 = vadd.f32 %v6267_v1, %v9798_v8  ;;  %v6104_v55 = vsel %vm318_vm5, %v6103_v62, -inf  ;;  %8854 = vmatprep.subr.mxu1 %v8132_v50 }
0x2864   :  { %6105 = vmax.xlane.f32.xlu0 %v6104_v55 }
0x2865   :  { %v6269_v57 = vsel %vm318_vm5, %v6268_v54, -inf }
0x2866   :  { %6270 = vmax.xlane.f32.xlu1 %v6269_v57 }
0x2877   :  { %6115 = vrot.lane.b32.xlu1 %v10219_v31, %s9272_s10 }
0x28d1   :  { %v6430_v58 = vpop.f32.mrb[60].mxu1 }
0x28d2   :  { %v6434_v32 = vmul.f32 0.35355338, %v6430_v58  ;;  %v8833_v51 = vpop.f32.mrb[61].mxu1 }
0x28d4   :  { %v6435_v52 = vadd.f32 %v6434_v32, %v9798_v8 }
0x28d5   :  { %v6597_v60 = vpop.f32.mrb[62].mxu1 }
0x28d6   :  { %v6601_v61 = vmul.f32 0.35355338, %v6597_v60  ;;  %v8843_v63 = vpop.f32.mrb[63].mxu1  ;;  %v6436_v0 = vsel %vm318_vm5, %v6435_v52, -inf }
0x28d7   :  { %6437 = vmax.xlane.f32.xlu0 %v6436_v0 }
0x28d8   :  { %v6602_v36 = vadd.f32 %v6601_v61, %v9798_v8 }
0x28da   :  { %v6603_v2 = vsel %vm318_vm5, %v6602_v36, -inf }
0x28db   :  { %6604 = vmax.xlane.f32.xlu0 %v6603_v2 }
0x28f1   :  { %v6106_v3 = vpop.xlane.xlu0 %6105 }
0x28f2   :  { %v6107_v4 = vsub.f32 %v6103_v62, %v6106_v3 }
0x28f3   :  { %v6271_v7 = vpop.xlane.xlu1 %6270 }
0x28f4   :  { %v6108_v6 = vmul.f32 1.442695, %v6107_v4  ;;  %v6272_v5 = vsub.f32 %v6268_v54, %v6271_v7 }
0x28f6   :  { %9129 = vpow2.f32 %v6108_v6  ;;  %v6273_v9 = vmul.f32 1.442695, %v6272_v5 }
0x28f7   :  { %v6116_v11 = vpop.permute.xlu1 %6115 }
0x28f8   :  { %9131 = vpow2.f32 %v6273_v9  ;;  %8815 = vmatpush3.msra.mxu0 %v6116_v11 }
0x28f9   :  { %8824 = vmatprep.subr.mxu0 %v9269_v10 }
0x2900   :  { %v9130_v12 = vpop.eup %9129 }
0x2901   :  { %v6110_v14 = vsel %vm318_vm5, %v9130_v12, 0.0 }
0x2902   :  { %v9132_v15 = vpop.eup %9131  ;;  %6111 = vadd.xlane.f32.xlu1 %v6110_v14 }
0x2903   :  { %v6275_v17 = vsel %vm318_vm5, %v9132_v15, 0.0 }
0x2904   :  { %6276 = vadd.xlane.f32.xlu0 %v6275_v17 }
0x2964   :  { %v6438_v18 = vpop.xlane.xlu0 %6437 }
0x2965   :  { %v6439_v45 = vsub.f32 %v6435_v52, %v6438_v18 }
0x2967   :  { %v6440_v30 = vmul.f32 1.442695, %v6439_v45 }
0x2968   :  { %v6605_v19 = vpop.xlane.xlu0 %6604 }
0x2969   :  { %9133 = vpow2.f32 %v6440_v30  ;;  %v6606_v20 = vsub.f32 %v6602_v36, %v6605_v19 }
0x296b   :  { %v6607_v21 = vmul.f32 1.442695, %v6606_v20 }
0x296d   :  { %9135 = vpow2.f32 %v6607_v21  ;;  %v8134_v21 = vld [vmem:[%s10470_s14 + $0x30] sm:$0xff] }
0x2973   :  { %v9134_v22 = vpop.eup %9133 }
0x2974   :  { %v6442_v23 = vsel %vm318_vm5, %v9134_v22, 0.0 }
0x2975   :  { %6443 = vadd.xlane.f32.xlu1 %v6442_v23 }
0x2977   :  { %v9136_v24 = vpop.eup %9135 }
0x2978   :  { %v6609_v26 = vsel %vm318_vm5, %v9136_v24, 0.0 }
0x2979   :  { %6610 = vadd.xlane.f32.xlu0 %v6609_v26 }
0x2986   :  { %6447 = vrot.lane.b32.xlu1 %v10219_v31, %s9271_s5 }
0x298a   :  { %6614 = vrot.lane.b32.xlu1 %v10221_v34, %s9271_s5 }
0x298e   :  { %6852 = vrot.lane.b32.xlu1 %v10233_v38, %s9277_s4 }
0x298f   :  { %v6112_v25 = vpop.xlane.xlu1 %6111  ;;  %6280 = vrot.lane.b32.xlu0 %v10221_v34, %s9272_s10 }
0x2990   :  { %9137 = vrcp.f32 %v6112_v25 }
0x2991   :  { %v6277_v33 = vpop.xlane.xlu0 %6276 }
0x2992   :  { %7019 = vrot.lane.b32.xlu1 %v10235_v40, %s9277_s4  ;;  %9139 = vrcp.f32 %v6277_v33 }
0x2993   :  { %6854 = vrot.lane.b32.xlu0 %v10219_v31, %s9277_s4 }
0x2997   :  { %7021 = vrot.lane.b32.xlu0 %v10221_v34, %s9277_s4  ;;  %s9283_s4 = smov [#allocation8]  }
0x299a   :  { %v9138_v27 = vpop.eup %9137 }
0x299b   :  { %v6114_v29 = vmul.f32 %v9138_v27, %v9130_v12 }
0x299c   :  { %v9140_v46 = vpop.eup %9139 }
0x299d   :  { %8817 = vmatmul.mubr.msk.f32.vlgmr.msra.gmra.mrb[80].mxu0 %vm318_vm5, %v6114_v29  ;;  %v6279_v37 = vmul.f32 %v9140_v46, %v9132_v15 }
0x299e   :  { %8826 = vmatprep.mubr.msk.f32.mxu0 %vm9270_vm3, %v9269_v10 }
0x2a02   :  { %v6444_v59 = vpop.xlane.xlu1 %6443 }
0x2a03   :  { %9141 = vrcp.f32 %v6444_v59 }
0x2a06   :  { %v6611_v35 = vpop.xlane.xlu0 %6610  ;;  %v6448_v13 = vpop.permute.xlu1 %6447 }
0x2a07   :  { %9143 = vrcp.f32 %v6611_v35 }
0x2a0a   :  { %v6281_v39 = vpop.permute.xlu0 %6280  ;;  %v6615_v43 = vpop.permute.xlu1 %6614 }
0x2a0b   :  { %8825 = vmatpush3.msra.mxu0 %v6281_v39 }
0x2a0c   :  { %8827 = vmatmul.mubr.msk.f32.vlgmr.msra.gmra.mrb[82].mxu0 %vm318_vm5, %v6279_v37  ;;  %8834 = vmatprep.subr.mxu0 %v9269_v10 }
0x2a0d   :  { %v9142_v41 = vpop.eup %9141  ;;  %8835 = vmatpush3.msra.mxu0 %v6448_v13  ;;  %8836 = vmatprep.mubr.msk.f32.mxu0 %vm9270_vm3, %v9269_v10 }
0x2a0e   :  { %v6446_v42 = vmul.f32 %v9142_v41, %v9134_v22  ;;  %8844 = vmatprep.subr.mxu0 %v9269_v10  ;;  %v6855_v47 = vpop.permute.xlu0 %6854  ;;  %v6853_v48 = vpop.permute.xlu1 %6852 }
0x2a10   :  { %8837 = vmatmul.mubr.msk.f32.vlgmr.msra.gmra.mrb[84].mxu0 %vm318_vm5, %v6446_v42 }
0x2a11   :  { %v9144_v44 = vpop.eup %9143  ;;  %8845 = vmatpush3.msra.mxu0 %v6615_v43  ;;  %8846 = vmatprep.mubr.msk.f32.mxu0 %vm9270_vm3, %v9269_v10 }
0x2a12   :  { %v6613_v16 = vmul.f32 %v9144_v44, %v9136_v24  ;;  %8859 = vmatprep.subr.mxu0 %v9269_v10  ;;  %v7022_v61 = vpop.permute.xlu0 %7021  ;;  %v7020_v0 = vpop.permute.xlu1 %7019 }
0x2a14   :  { %8847 = vmatmul.mubr.msk.f32.vlgmr.msra.gmra.mrb[86].mxu0 %vm318_vm5, %v6613_v16 }
0x2a15   :  { %8861 = vmatprep.mubr.msk.f32.mxu0 %vm9270_vm3, %v9269_v10 }
0x2a18   :  { %8860 = vmatpush3.xpose.msk.msra.mxu0 %vm318_vm5, %v6855_v47 }
0x2a19   :  { %8864 = vmatprep.subr.mxu0 %v9269_v10 }
0x2a1b   :  { %8862 = vmatmul.mubr.msk.f32.vlgmr.msra.gmra.mrb[88].mxu0 %vm318_vm5, %v6853_v48 }
0x2a1c   :  { %8866 = vmatprep.mubr.msk.f32.mxu0 %vm9270_vm3, %v9269_v10 }
0x2a70   :  { %v6187_v62 = vpop.f32.mrb[80].mxu0 }
0x2a71   :  { %v8818_v1 = vpop.f32.mrb[81].mxu0 }
0x2adf   :  { %v6352_v53 = vpop.f32.mrb[82].mxu0 }
0x2ae0   :  { %v8828_v54 = vpop.f32.mrb[83].mxu0 }
0x2ae3   :  { %v6519_v55 = vpop.f32.mrb[84].mxu0 }
0x2ae4   :  { %v8838_v57 = vpop.f32.mrb[85].mxu0  ;;  %8851 = vmatprep.mubr.msk.f32.mxu1 %vm318_vm5, %v6519_v55 }
0x2ae7   :  { %v6686_v58 = vpop.f32.mrb[86].mxu0 }
0x2ae8   :  { %v8848_v32 = vpop.f32.mrb[87].mxu0  ;;  %8852 = vmatmul.mubr.msk.f32.vlgmr.msra.gmra.mrb[64].mxu1 %vm318_vm5, %v6686_v58 }
0x2ae9   :  { %8855 = vmatpush3.msra.mxu1 %v8132_v50  ;;  %8856 = vmatprep.mubr.msk.f32.mxu1 %vm318_vm5, %v6187_v62 }
0x2aea   :  { %8869 = vmatprep.subr.mxu1 %v9269_v10 }
0x2aee   :  { %v6926_v51 = vpop.f32.mrb[88].mxu0 }
0x2aef   :  { %v6930_v52 = vmul.f32 0.35355338, %v6926_v51  ;;  %v8863_v60 = vpop.f32.mrb[89].mxu0 }
0x2af0   :  { %8857 = vmatmul.mubr.msk.f32.vlgmr.msra.gmra.mrb[64].mxu1 %vm318_vm5, %v6352_v53 }
0x2af1   :  { %v6931_v63 = vadd.f32 %v6930_v52, %v9798_v8  ;;  %8870 = vmatpush3.xpose.msk.msra.mxu1 %vm318_vm5, %v7022_v61  ;;  %8871 = vmatprep.mubr.msk.f32.mxu1 %vm9270_vm3, %v9269_v10 }
0x2af2   :  { %8879 = vmatprep.subr.mxu1 %v8134_v21 }
0x2af3   :  { %v6932_v36 = vsel %vm318_vm5, %v6931_v63, -inf }
0x2af4   :  { %6933 = vmax.xlane.f32.xlu0 %v6932_v36  ;;  %8872 = vmatmul.mubr.msk.f32.vlgmr.msra.gmra.mrb[66].mxu1 %vm318_vm5, %v7020_v0 }
0x2af5   :  { %8880 = vmatpush3.msra.mxu1 %v8134_v21 }
0x2af6   :  { %8889 = vmatprep.subr.mxu1 %v9269_v10 }
0x2b81   :  { %v6934_v2 = vpop.xlane.xlu0 %6933 }
0x2b82   :  { %v6935_v3 = vsub.f32 %v6931_v63, %v6934_v2 }
0x2b84   :  { %v6936_v4 = vmul.f32 1.442695, %v6935_v3 }
0x2b86   :  { %9145 = vpow2.f32 %v6936_v4 }
0x2b90   :  { %v9146_v7 = vpop.eup %9145 }
0x2b91   :  { %v6938_v6 = vsel %vm318_vm5, %v9146_v7, 0.0 }
0x2b92   :  { %6939 = vadd.xlane.f32.xlu0 %v6938_v6  ;;  %v8169_v6 = vld [vmem:[%s10471_s15 + $0x1] ss:$0 sm:$0xff] }
0x2bc7   :  { %v7093_v5 = vpop.f32.mrb[66].mxu1 }
0x2bc8   :  { %v7097_v9 = vmul.f32 0.35355338, %v7093_v5  ;;  %v8873_v11 = vpop.f32.mrb[67].mxu1 }
0x2bca   :  { %v7098_v12 = vadd.f32 %v7097_v9, %v9798_v8 }
0x2bcc   :  { %v7099_v14 = vsel %vm318_vm5, %v7098_v12, -inf }
0x2bcd   :  { %7100 = vmax.xlane.f32.xlu1 %v7099_v14 }
0x2bde   :  { %6943 = vrot.lane.b32.xlu1 %v10219_v31, %s10533_s8 }
0x2be2   :  { %7271 = vrot.lane.b32.xlu1 %v10219_v31, %s10529_s9 }
0x2be6   :  { %7269 = vrot.lane.b32.xlu1 %v10233_v38, %s10529_s9 }
0x2bea   :  { %7436 = vrot.lane.b32.xlu1 %v10235_v40, %s10529_s9 }
0x2c1f   :  { %v6940_v15 = vpop.xlane.xlu0 %6939 }
0x2c20   :  { %9147 = vrcp.f32 %v6940_v15 }
0x2c2a   :  { %v9148_v18 = vpop.eup %9147 }
0x2c2b   :  { %v6942_v19 = vmul.f32 %v9148_v18, %v9146_v7 }
0x2c5a   :  { %v7101_v17 = vpop.xlane.xlu1 %7100 }
0x2c5b   :  { %v7102_v45 = vsub.f32 %v7098_v12, %v7101_v17 }
0x2c5d   :  { %v7103_v30 = vmul.f32 1.442695, %v7102_v45 }
0x2c5e   :  { %v6944_v20 = vpop.permute.xlu1 %6943 }
0x2c5f   :  { %9149 = vpow2.f32 %v7103_v30  ;;  %8865 = vmatpush3.msra.mxu0 %v6944_v20 }
0x2c60   :  { %8867 = vmatmul.mubr.msk.f32.vlgmr.msra.gmra.mrb[90].mxu0 %vm318_vm5, %v6942_v19  ;;  %8874 = vmatprep.subr.mxu0 %v9269_v10 }
0x2c61   :  { %8876 = vmatprep.mubr.msk.f32.mxu0 %vm9270_vm3, %v9269_v10 }
0x2c62   :  { %v7272_v24 = vpop.permute.xlu1 %7271 }
0x2c66   :  { %v7270_v27 = vpop.permute.xlu1 %7269 }
0x2c69   :  { %v9150_v38 = vpop.eup %9149 }
0x2c6a   :  { %v7105_v40 = vsel %vm318_vm5, %v9150_v38, 0.0  ;;  %v7437_v33 = vpop.permute.xlu1 %7436 }
0x2c6b   :  { %7106 = vadd.xlane.f32.xlu0 %v7105_v40 }
0x2c81   :  { %7110 = vrot.lane.b32.xlu0 %v10221_v34, %s10533_s8 }
0x2c85   :  { %7438 = vrot.lane.b32.xlu0 %v10221_v34, %s10529_s9  ;;  %s7955_s9 = sshll.u32 %s9283_s4, 4  ;;  %s7956_s9 = int_to_ptr.vmem [resolvable:$true] %s7955_s9 }
0x2c86   :  { %s9235_s8 = scalar_lea.vmem %s7956_s9, 256  ;;  %p9240_p11 = scmp.lt.s32.totalorder %s7956_s9, %s7956_s9 }
0x2c87   :  { %p9236_p10 = scmp.ne.s32.totalorder %s7956_s9, %s9235_s8  ;;  %p9241_p12 = scmp.lt.s32.totalorder %s9235_s8, %s9235_s8 }
0x2c89   :  { %p9242_p13 = por %p9241_p12, %p9240_p11 }
0x2c8b   :  { %p9243_p0 = pnand %p9242_p13, %p9236_p10 }
0x2cf8   :  { %v7107_v22 = vpop.xlane.xlu0 %7106 }
0x2cf9   :  { %9151 = vrcp.f32 %v7107_v22 }
0x2cfc   :  { %v7111_v23 = vpop.permute.xlu0 %7110 }
0x2cfd   :  { %8875 = vmatpush3.msra.mxu0 %v7111_v23 }
0x2cfe   :  { %8884 = vmatprep.subr.mxu0 %v9269_v10 }
0x2d00   :  { %v7439_v29 = vpop.permute.xlu0 %7438 }
0x2d03   :  { %v9152_v26 = vpop.eup %9151 }
0x2d04   :  { %v7109_v25 = vmul.f32 %v9152_v26, %v9150_v38  ;;  %v9013_v26 = vld [vmem:[%s10474_s18 + $0x20] sm:$0xff]  }
0x2d06   :  { %8877 = vmatmul.mubr.msk.f32.vlgmr.msra.gmra.mrb[92].mxu0 %vm318_vm5, %v7109_v25  ;;  %v9014_v25 = vld [vmem:[%s10474_s18 + $0x28] sm:$0xff]  }
0x2d07   :  { %8885 = vmatpush3.xpose.msk.msra.mxu0 %vm318_vm5, %v7272_v24  ;;  %8886 = vmatprep.mubr.msk.f32.mxu0 %vm9270_vm3, %v9269_v10  ;;  %v9012_v24 = vld [vmem:[%s10472_s16 + $0x18] sm:$0xff]  }
0x2d08   :  { %8894 = vmatprep.subr.mxu0 %v9269_v10 }
0x2d0a   :  { %8887 = vmatmul.mubr.msk.f32.vlgmr.msra.gmra.mrb[94].mxu0 %vm318_vm5, %v7270_v27 }
0x2d0b   :  { %8895 = vmatpush3.xpose.msk.msra.mxu0 %vm318_vm5, %v7439_v29  ;;  %8896 = vmatprep.mubr.msk.f32.mxu0 %vm9270_vm3, %v9269_v10 }
0x2d0c   :  { %8909 = vmatprep.subr.bf16.mxu0 %v9269_v10 }
0x2d0e   :  { %8897 = vmatmul.mubr.msk.f32.vlgmr.msra.gmra.mrb[96].mxu0 %vm318_vm5, %v7437_v33 }
0x2d0f   :  { %8913 = vmatprep.mubr.msk.bf16.mxu0 %vm9270_vm3, %v9269_v10 }
0x2d33   :  { %v7015_v59 = vpop.f32.mrb[90].mxu0 }
0x2d34   :  { %v8868_v35 = vpop.f32.mrb[91].mxu0  ;;  %8881 = vmatprep.mubr.msk.f32.mxu1 %vm318_vm5, %v7015_v59 }
0x2dd9   :  { %v7182_v46 = vpop.f32.mrb[92].mxu0 }
0x2dda   :  { %v8878_v37 = vpop.f32.mrb[93].mxu0  ;;  %8882 = vmatmul.mubr.msk.f32.vlgmr.msra.gmra.mrb[64].mxu1 %vm318_vm5, %v7182_v46 }
0x2ddb   :  { %8891 = vmatprep.mubr.msk.f32.mxu1 %vm9270_vm3, %v9269_v10 }
0x2ddd   :  { %v7343_v13 = vpop.f32.mrb[94].mxu0 }
0x2dde   :  { %v7347_v39 = vmul.f32 0.35355338, %v7343_v13  ;;  %v8888_v41 = vpop.f32.mrb[95].mxu0  ;;  %v8172_v13 = vld [vmem:[%s10478_s22 + $0x1] ss:$0 sm:$0xff] }
0x2de0   :  { %v7348_v42 = vadd.f32 %v7347_v39, %v9798_v8 }
0x2de1   :  { %v7510_v43 = vpop.f32.mrb[96].mxu0 }
0x2de2   :  { %v7514_v44 = vmul.f32 0.35355338, %v7510_v43  ;;  %v8898_v16 = vpop.f32.mrb[97].mxu0  ;;  %v7349_v47 = vsel %vm318_vm5, %v7348_v42, -inf  ;;  %v8173_v43 = vld [vmem:[%s10479_s23 + $0x1] ss:$0 sm:$0xff] }
0x2de3   :  { %7350 = vmax.xlane.f32.xlu0 %v7349_v47 }
0x2de4   :  { %v7515_v48 = vadd.f32 %v7514_v44, %v9798_v8 }
0x2de6   :  { %v7516_v49 = vsel %vm318_vm5, %v7515_v48, -inf }
0x2de7   :  { %7517 = vmax.xlane.f32.xlu1 %v7516_v49 }
0x2df8   :  { %7360 = vrot.lane.b32.xlu1 %v10219_v31, %s10530_s1 }
0x2e70   :  { %v7351_v50 = vpop.xlane.xlu0 %7350 }
0x2e71   :  { %v7352_v62 = vsub.f32 %v7348_v42, %v7351_v50  ;;  %v9015_v50 = vld [vmem:[%s10474_s18 + $0x30] sm:$0xff]  }
0x2e73   :  { %v7353_v1 = vmul.f32 1.442695, %v7352_v62  ;;  %v9016_v62 = vld [vmem:[%s10474_s18 + $0x38] sm:$0xff]  }
0x2e74   :  { %v7518_v53 = vpop.xlane.xlu1 %7517 }
0x2e75   :  { %9153 = vpow2.f32 %v7353_v1  ;;  %v7519_v54 = vsub.f32 %v7515_v48, %v7518_v53  ;;  %v8179_v1 = vld [vmem:[%s10473_s17 + $0x1] ss:$0 sm:$0xff] }
0x2e77   :  { %v7520_v55 = vmul.f32 1.442695, %v7519_v54 }
0x2e78   :  { %v7361_v57 = vpop.permute.xlu1 %7360 }
0x2e79   :  { %9155 = vpow2.f32 %v7520_v55  ;;  %8890 = vmatpush3.msra.mxu1 %v7361_v57 }
0x2e7a   :  { %8899 = vmatprep.subr.mxu1 %v9269_v10 }
0x2e7f   :  { %v9154_v58 = vpop.eup %9153 }
0x2e80   :  { %v7355_v8 = vsel %vm318_vm5, %v9154_v58, 0.0 }
0x2e81   :  { %7356 = vadd.xlane.f32.xlu0 %v7355_v8 }
0x2e83   :  { %v9156_v32 = vpop.eup %9155 }
0x2e84   :  { %v7522_v51 = vsel %vm318_vm5, %v9156_v32, 0.0 }
0x2e85   :  { %7523 = vadd.xlane.f32.xlu0 %v7522_v51 }
0x2e9b   :  { %7527 = vrot.lane.b32.xlu0 %v10221_v34, %s10530_s1  ;;  %v8135_v34 = vld [vmem:[%s10470_s14 + $0x38] sm:$0xff] }
0x2f0e   :  { %v7357_v31 = vpop.xlane.xlu0 %7356 }
0x2f0f   :  { %9157 = vrcp.f32 %v7357_v31 }
0x2f12   :  { %v7524_v52 = vpop.xlane.xlu0 %7523 }
0x2f13   :  { %9159 = vrcp.f32 %v7524_v52 }
0x2f16   :  { %v7528_v63 = vpop.permute.xlu0 %7527 }
0x2f19   :  { %v9158_v60 = vpop.eup %9157 }
0x2f1a   :  { %v7359_v61 = vmul.f32 %v9158_v60, %v9154_v58 }
0x2f1c   :  { %8892 = vmatmul.mubr.msk.f32.vlgmr.msra.gmra.mrb[68].mxu1 %vm318_vm5, %v7359_v61 }
0x2f1d   :  { %v9160_v0 = vpop.eup %9159  ;;  %8900 = vmatpush3.msra.mxu1 %v7528_v63  ;;  %8901 = vmatprep.mubr.msk.f32.mxu1 %vm9270_vm3, %v9269_v10 }
0x2f1e   :  { %v7526_v36 = vmul.f32 %v9160_v0, %v9156_v32  ;;  %8904 = vmatprep.subr.mxu1 %v8135_v34 }
0x2f20   :  { %8902 = vmatmul.mubr.msk.f32.vlgmr.msra.gmra.mrb[70].mxu1 %vm318_vm5, %v7526_v36 }
0x2f21   :  { %8905 = vmatpush3.msra.mxu1 %v8135_v34 }
0x2f22   :  { %8917 = vmatprep.subr.bf16.mxu1 %v9269_v10 }
0x2fef   :  { %v7432_v2 = vpop.f32.mrb[68].mxu1 }
0x2ff0   :  { %v8893_v3 = vpop.f32.mrb[69].mxu1  ;;  %8906 = vmatprep.mubr.msk.f32.mxu1 %vm318_vm5, %v7432_v2 }
0x2ff3   :  { %v7599_v4 = vpop.f32.mrb[70].mxu1 }
0x2ff4   :  { %v8903_v7 = vpop.f32.mrb[71].mxu1  ;;  %8907 = vmatmul.mubr.msk.f32.vlgmr.msra.gmra.mrb[64].mxu1 %vm318_vm5, %v7599_v4 }
0x2ff5   :  { %8925 = vmatprep.mubr.msk.bf16.mxu1 %vm9270_vm3, %v9269_v10  ;;  %8918 = vmatpush3.bf16.msra.mxu1 %v9013_v26 }
0x2ff6   :  { %8919 = vmatprep.subr.bf16.mxu1 %v9269_v10 }
0x2ff9   :  { %8920 = vmatpush3.bf16.msra.mxu1 %v9014_v25 }
0x2ffa   :  { %8921 = vmatprep.subr.bf16.mxu1 %v9269_v10 }
0x2ffd   :  { %8922 = vmatpush3.bf16.msra.mxu1 %v9015_v50 }
0x2ffe   :  { %8923 = vmatprep.subr.bf16.mxu1 %v9269_v10 }
0x3001   :  { %8924 = vmatpush3.bf16.msra.mxu1 %v9016_v62 }
0x30c7   :  { %v8908_v5 = vpop.f32.mrb[64].mxu1 }
0x30c8   :  { %v7693_v9 = vadd.f32 %v8908_v5, %v8169_v6  ;;  %v7675_v11 = vpop.f32.mrb[65].mxu1 }
0x30c9   :  { %v7692_v12 = vadd.f32 %v8169_v6, %v7675_v11 }
0x30ca   :  { %v7695_v14 = vadd.f32 %v7693_v9, %v10207_v56 }
0x30cb   :  { %v7694_v15 = vadd.f32 %v7692_v12, %v10209_v28  ;;  %v9011_v28 = vld [vmem:[%s10472_s16 + $0x10] sm:$0xff]  }
0x30cc   :  { %v7703_v17 = vsel %vm265_vm4, %v7695_v14, 0.0  ;;  %8910 = vmatpush3.bf16.msra.mxu0 %v9011_v28  ;;  %v8201_v28 = vld [vmem:[%s10481_s25 + $0x1] ss:$0 sm:$0xff] }
0x30cd   :  { %7704 = vadd.xlane.f32.xlu0 %v7703_v17  ;;  %v7700_v18 = vsel %vm265_vm4, %v7694_v15, 0.0  ;;  %8911 = vmatprep.subr.bf16.mxu0 %v9269_v10  ;;  %v8192_v10 = vld [vmem:[%s10475_s19 + $0x1] ss:$0 sm:$0xff] }
0x30ce   :  { %7701 = vadd.xlane.f32.xlu1 %v7700_v18 }
0x30d0   :  { %8912 = vmatpush3.bf16.msra.mxu0 %v9012_v24 }
0x315a   :  { %v7705_v45 = vpop.xlane.xlu0 %7704 }
0x315b   :  { %v7707_v30 = vmul.f32 0.03125, %v7705_v45  ;;  %v7702_v19 = vpop.xlane.xlu1 %7701 }
0x315c   :  { %v7706_v20 = vmul.f32 0.03125, %v7702_v19 }
0x315d   :  { %v7709_v38 = vsub.f32 %v7695_v14, %v7707_v30 }
0x315e   :  { %v7708_v40 = vsub.f32 %v7694_v15, %v7706_v20 }
0x315f   :  { %v7711_v21 = vmul.f32 %v7709_v38, %v7709_v38 }
0x3160   :  { %v7710_v22 = vmul.f32 %v7708_v40, %v7708_v40 }
0x3161   :  { %v7715_v23 = vsel %vm265_vm4, %v7711_v21, 0.0 }
0x3162   :  { %7716 = vadd.xlane.f32.xlu0 %v7715_v23  ;;  %v7712_v56 = vsel %vm265_vm4, %v7710_v22, 0.0  ;;  %v8200_v22 = vld [vmem:[%s10480_s24 + $0x1] ss:$0 sm:$0xff] }
0x3163   :  { %7713 = vadd.xlane.f32.xlu1 %v7712_v56 }
0x31ef   :  { %v7717_v27 = vpop.xlane.xlu0 %7716 }
0x31f0   :  { %v7719_v29 = vmul.f32 0.03125, %v7717_v27  ;;  %v7714_v33 = vpop.xlane.xlu1 %7713 }
0x31f1   :  { %v7718_v59 = vmul.f32 0.03125, %v7714_v33 }
0x31f2   :  { %v7721_v35 = vadd.f32 1e-05, %v7719_v29 }
0x31f3   :  { %v7720_v46 = vadd.f32 1e-05, %v7718_v59 }
0x31f4   :  { %9161 = vrsqrt.f32 %v7721_v35 }
0x31f5   :  { %9163 = vrsqrt.f32 %v7720_v46 }
0x31fe   :  { %v9162_v37 = vpop.eup %9161 }
0x31ff   :  { %v9164_v39 = vpop.eup %9163  ;;  %v7725_v41 = vmul.f32 %v9162_v37, %v7709_v38 }
0x3200   :  { %v7724_v42 = vmul.f32 %v9164_v39, %v7708_v40 }
0x3201   :  { %v7733_v44 = vmul.f32 %v8172_v13, %v7725_v41 }
0x3202   :  { %v7732_v16 = vmul.f32 %v8172_v13, %v7724_v42 }
0x3203   :  { %v7741_v47 = vadd.f32 %v8173_v43, %v7733_v44 }
0x3204   :  { %v7740_v48 = vadd.f32 %v8173_v43, %v7732_v16 }
0x3206   :  { %v7742_v49 = vpack.c.bf16 %v7741_v47, %v7740_v48 }
0x3208   :  { %8914 = vmatmul.mubr.msk.bf16.vlgmr.msra.gmra.mrb[100].mxu0 %vm265_vm4, %v7742_v49 }
0x32db   :  { %v7805_v53 = vpop.f32.mrb[100].mxu0 }
0x32dc   :  { %v7806_v54 = vadd.f32 %v8179_v1, %v7805_v53  ;;  %v8915_v55 = vpop.f32.mrb[101].mxu0 }
0x32dd   :  { %v7808_v57 = vpop.f32.mrb[102].mxu0 }
0x32de   :  { %v7809_v58 = vadd.f32 %v8179_v1, %v7808_v57  ;;  %v8916_v8 = vpop.f32.mrb[103].mxu0  ;;  %v7812_v32 = vmax.f32 %v7806_v54, 0.0 }
0x32e0   :  { %v7813_v51 = vmax.f32 %v7809_v58, 0.0 }
0x32e2   :  { %v7814_v31 = vpack.c.bf16 %v7813_v51, %v7812_v32 }
0x32e4   :  { %8926 = vmatmul.mubr.msk.bf16.vlgmr.msra.gmra.mrb[72].mxu1 %vm151_vm0, %v7814_v31 }
0x33b7   :  { %v7893_v52 = vpop.f32.mrb[72].mxu1 }
0x33b8   :  { %v7894_v60 = vadd.f32 %v8192_v10, %v7893_v52  ;;  %v8927_v61 = vpop.f32.mrb[73].mxu1 }
0x33b9   :  { %v7896_v63 = vpop.f32.mrb[74].mxu1 }
0x33ba   :  { %v7900_v0 = vadd.f32 %v7894_v60, %v7740_v48  ;;  %v7897_v36 = vadd.f32 %v8192_v10, %v7896_v63  ;;  %v8928_v34 = vpop.f32.mrb[75].mxu1 }
0x33bc   :  { %v7901_v2 = vadd.f32 %v7897_v36, %v7741_v47  ;;  %v7906_v3 = vsel %vm265_vm4, %v7900_v0, 0.0 }
0x33bd   :  { %7907 = vadd.xlane.f32.xlu1 %v7906_v3 }
0x33be   :  { %v7909_v4 = vsel %vm265_vm4, %v7901_v2, 0.0 }
0x33bf   :  { %7910 = vadd.xlane.f32.xlu0 %v7909_v4 }
0x344a   :  { %v7908_v7 = vpop.xlane.xlu1 %7907 }
0x344b   :  { %v7912_v6 = vmul.f32 0.03125, %v7908_v7 }
0x344c   :  { %v7911_v5 = vpop.xlane.xlu0 %7910 }
0x344d   :  { %v7914_v9 = vsub.f32 %v7900_v0, %v7912_v6  ;;  %v7913_v11 = vmul.f32 0.03125, %v7911_v5 }
0x344f   :  { %v7915_v12 = vsub.f32 %v7901_v2, %v7913_v11  ;;  %v7916_v14 = vmul.f32 %v7914_v9, %v7914_v9 }
0x3451   :  { %v7918_v15 = vsel %vm265_vm4, %v7916_v14, 0.0  ;;  %v7917_v17 = vmul.f32 %v7915_v12, %v7915_v12 }
0x3452   :  { %7919 = vadd.xlane.f32.xlu1 %v7918_v15 }
0x3453   :  { %v7921_v18 = vsel %vm265_vm4, %v7917_v17, 0.0 }
0x3454   :  { %7922 = vadd.xlane.f32.xlu0 %v7921_v18 }
0x34df   :  { %v7920_v45 = vpop.xlane.xlu1 %7919 }
0x34e0   :  { %v7924_v30 = vmul.f32 0.03125, %v7920_v45 }
0x34e1   :  { %v7923_v19 = vpop.xlane.xlu0 %7922 }
0x34e2   :  { %v7926_v20 = vadd.f32 1e-05, %v7924_v30  ;;  %v7925_v38 = vmul.f32 0.03125, %v7923_v19 }
0x34e4   :  { %9165 = vrsqrt.f32 %v7926_v20  ;;  %v7927_v40 = vadd.f32 1e-05, %v7925_v38 }
0x34e6   :  { %9167 = vrsqrt.f32 %v7927_v40 }
0x34ee   :  { %v9166_v21 = vpop.eup %9165 }
0x34ef   :  { %v7930_v23 = vmul.f32 %v9166_v21, %v7914_v9 }
0x34f0   :  { %v9168_v56 = vpop.eup %9167 }
0x34f1   :  { %v7938_v24 = vmul.f32 %v8200_v22, %v7930_v23  ;;  %v7931_v26 = vmul.f32 %v9168_v56, %v7915_v12 }
0x34f3   :  { %v7939_v25 = vmul.f32 %v8200_v22, %v7931_v26  ;;  %v7946_v27 = vadd.f32 %v8201_v28, %v7938_v24 }
0x34f5   :  { %v7947_v29 = vadd.f32 %v8201_v28, %v7939_v25  ;;  %7948 = vst.msk [vmem:[#allocation8] sm:$0xff] %vm265_vm4, %v7946_v27 }
0x34f7   :  { %7949 = vst.msk [vmem:[#allocation8 + $0x8] sm:$0xff] %vm265_vm4, %v7947_v29 }
0x34f8   :  { %9246 = shalt.err (!%p9243_p0)
}
0x34f9   :  { %s10536_s1 = sld [smem:[#allocation23_spill]] }
0x34ff   :  { %s9247_s29 = scalar_lea.hbm %s10536_s1, 256 }
0x3500   :  { %p9248_p1 = scmp.ne.s32.totalorder %s10536_s1, %s9247_s29  ;;  %p9251_p2 = scmp.lt.u32.totalorder %s9247_s29, %s10536_s1 }
0x3502   :  { %p9253_p3 = pnand %p9251_p2, %p9248_p1 }
0x3504   :  { %9256 = shalt.err (!%p9253_p3)
}
0x3505   :  { %s9284_s26 = smov 128   ;;  %s9285_s7 = smov 8  }
0x3506   :  { %7961 = dma.vmem_to_hbm [thread:$0]  %s7956_s9, 256, %s10536_s1, [#allocation4], %s9284_s26, %s9284_s26, %s9285_s7  }
0x3507   :  { %9261 = dma.done.wait [#allocation4], 256  }
0x3508   :  { %9262 = vsyncadd [#allocation4], 4294967040 }
0x3509   :  { %7965 = vsyncpa [#allocation3], 1 }
0x350a   :  { %7966 = vsyncpa [#allocation6], 1 }
0x350b   :  { %7967 = vsyncpa [#allocation4], 1 }

</bundles_post_ra>
